<compile_context>
chip_gen: v7x
topology: tpu7x:2x2x1
jax: 0.10.0
libtpu: 0.0.40
codegen_flags: <defaults>
</compile_context>

<pallas_src>
import functools

import jax
import jax.numpy as jnp
from jax import lax
from jax.experimental import pallas as pl
from jax.experimental.pallas import tpu as pltpu

KSIZE = 7
PAD = KSIZE // 2  # 3


def _reflect_pad2d(a, p):
    """Reflect-pad a 2-D (H, W) array by p on each side (PyTorch 'reflect')."""
    H, W = a.shape
    top = [a[p - k:p - k + 1, :] for k in range(p)]          # rows p .. 1
    bot = [a[H - 2 - k:H - 1 - k, :] for k in range(p)]      # rows H-2 .. H-1-p
    a = jnp.concatenate(top + [a] + bot, axis=0)             # (H+2p, W)
    left = [a[:, p - k:p - k + 1] for k in range(p)]
    right = [a[:, W - 2 - k:W - 1 - k] for k in range(p)]
    return jnp.concatenate(left + [a] + right, axis=1)       # (H+2p, W+2p)


def _row_to_map(row, H, W):
    """(1, H*W) lane-dense row -> (H, W) map (static lane slices + sublane concat)."""
    return jnp.concatenate([row[:, i * W:(i + 1) * W] for i in range(H)], axis=0)


def _spatial_attention_kernel(w_ref, x_ref, y_ref, attn_ref, *, H, W):
    # w_ref    : (2*K*K,)        SMEM f32 scalar-prefetch (flattened OIHW weight)
    # x_ref    : (bn, C, HWp)    VMEM, lane-dense (HWp = padded H*W)
    # y_ref    : (bn, C, HWp)    VMEM
    # attn_ref : (bn, 1, HWp)    VMEM
    bn, C, HWp = x_ref.shape
    HW = H * W

    x = x_ref[...]                                           # (bn, C, HWp) native dtype

    # Channel pooling for the whole block in one pass (sublane reductions).
    # f32 accumulation for the mean; max stays exact in any dtype.
    avg = jnp.sum(x, axis=1, dtype=jnp.float32) * jnp.float32(1.0 / C)   # (bn, HWp)
    mx = jnp.max(x, axis=1).astype(jnp.float32)                          # (bn, HWp)

    # Hoist the 98 SMEM scalar weight reads (free scalar slot).
    w = [w_ref[i] for i in range(2 * KSIZE * KSIZE)]

    # Per-image reflect-padded pooled maps (tiny: (H+6, W+6) each).
    padded = []                                              # [channel][image]
    for pooled in (avg, mx):
        maps = []
        for b in range(bn):
            m = _row_to_map(pooled[b:b + 1, :HW], H, W)      # (H, W)
            maps.append(_reflect_pad2d(m, PAD))              # (H+6, W+6)
        padded.append(maps)

    # 7x7 conv, 2 -> 1 channels, factored and vectorized across the block:
    # per (channel, dj) one lane-axis column shift is built per image and the
    # images are concatenated along lanes, so every tap mul-add runs once per
    # grid step on an (H, bn*W) slab (>=128 lanes for bn*W >= 128).
    acc = None
    for c in range(2):
        for dj in range(KSIZE):
            col = jnp.concatenate(
                [padded[c][b][:, dj:dj + W] for b in range(bn)], axis=1)  # (H+6, bn*W)
            for di in range(KSIZE):
                w_s = w[c * KSIZE * KSIZE + di * KSIZE + dj]
                tap = w_s * col[di:di + H, :]                # (H, bn*W)
                acc = tap if acc is None else acc + tap
    attn_wide = jax.nn.sigmoid(acc)                          # (H, bn*W) f32

    lane_pad = None
    if HWp > HW:
        lane_pad = jnp.zeros((1, HWp - HW), jnp.float32)     # hoisted constant

    # Re-assemble lane-dense attention rows per image (H lane concats each).
    rows = []
    for b in range(bn):
        r = jnp.concatenate(
            [attn_wide[i:i + 1, b * W:(b + 1) * W] for i in range(H)], axis=1)  # (1, HW)
        if lane_pad is not None:
            r = jnp.concatenate([r, lane_pad], axis=1)       # (1, HWp)
        rows.append(r)
    attn2d = jnp.concatenate(rows, axis=0)                   # (bn, HWp) f32
    attn3d = attn2d[:, None, :]                              # (bn, 1, HWp)

    attn_ref[...] = attn3d.astype(attn_ref.dtype)
    # Dominant multiply: one broadcast over the whole block, native dtype
    # (attn is cast down instead of x being cast up).
    y_ref[...] = (x * attn3d.astype(x.dtype)).astype(y_ref.dtype)


def _vmem_limit_bytes():
    """Generation-aware VMEM limit with headroom (safe on v7x's 64 MiB/TC)."""
    try:
        cap = int(pltpu.get_tpu_info().vmem_capacity_bytes)
    except Exception:
        cap = 64 * 1024 * 1024  # conservative default (v7x per-TensorCore size)
    return max(16 * 1024 * 1024, min(cap - (8 << 20), int(cap * 0.85)))


def _pick_block_n(N, C, HWp, itemsize, budget_bytes, max_block_n=16):
    """Largest divisor of N under the VMEM budget, keeping grid length >= 2."""
    per_image = max(1, C * HWp * itemsize)
    cap = min(N, max_block_n, max(1, budget_bytes // per_image))
    if N >= 2:
        cap = min(cap, max(1, N // 2))   # grid >= 2 so both v7x TCs get work
    for bn in range(cap, 0, -1):
        if N % bn == 0:
            return bn
    return 1


def spatial_attention(x, conv_weight, *, block_n=None):
    """x: (N, C, H, W); conv_weight: (1, 2, 7, 7) (PyTorch OIHW, no bias)."""
    N, C, H, W = x.shape
    assert conv_weight.shape == (1, 2, KSIZE, KSIZE)
    assert H > PAD and W > PAD, "reflect padding of 3 requires H, W >= 4"
    HW = H * W
    HWp = ((HW + 127) // 128) * 128       # lane-dense output width (unmasked vst)
    itemsize = jnp.dtype(x.dtype).itemsize

    vmem_limit = _vmem_limit_bytes()
    # ~2x double-buffered x in + ~2x double-buffered y out + f32 temps.
    block_budget = min(16 << 20, vmem_limit // 5)

    if block_n is None:
        block_n = _pick_block_n(N, C, HWp, itemsize, block_budget)
    assert N % block_n == 0

    x_flat = x.reshape(N, C, HW)                              # lane-dense view (free)
    if HWp != HW:
        x_flat = jnp.pad(x_flat, ((0, 0), (0, 0), (0, HWp - HW)))
    w_flat = conv_weight.astype(jnp.float32).reshape(2 * KSIZE * KSIZE)

    kernel = functools.partial(_spatial_attention_kernel, H=H, W=W)

    y_flat, attn_flat = pl.pallas_call(
        kernel,
        out_shape=(
            jax.ShapeDtypeStruct((N, C, HWp), x.dtype),
            jax.ShapeDtypeStruct((N, 1, HWp), x.dtype),
        ),
        grid_spec=pltpu.PrefetchScalarGridSpec(
            num_scalar_prefetch=1,                            # conv weights -> SMEM
            grid=(N // block_n,),
            in_specs=[pl.BlockSpec((block_n, C, HWp), lambda n, w: (n, 0, 0))],
            out_specs=(
                pl.BlockSpec((block_n, C, HWp), lambda n, w: (n, 0, 0)),
                pl.BlockSpec((block_n, 1, HWp), lambda n, w: (n, 0, 0)),
            ),
        ),
        compiler_params=pltpu.CompilerParams(
            dimension_semantics=("parallel",),
            vmem_limit_bytes=int(vmem_limit),
        ),
    )(w_flat, x_flat)

    y = y_flat[..., :HW].reshape(N, C, H, W)
    attn = attn_flat[..., :HW].reshape(N, 1, H, W)
    return y, attn


def _reference(x, w):
    """Pure-JAX reference matching the PyTorch module semantics."""
    avg = jnp.mean(x, axis=1, keepdims=True)
    mx = jnp.max(x, axis=1, keepdims=True)
    pooled = jnp.concatenate([avg, mx], axis=1)                  # (N,2,H,W)
    padded = jnp.pad(pooled, ((0, 0), (0, 0), (PAD, PAD), (PAD, PAD)),
                     mode="reflect")
    out = lax.conv_general_dilated(
        padded, w, window_strides=(1, 1), padding="VALID",
        dimension_numbers=("NCHW", "OIHW", "NCHW"))
    attn = jax.nn.sigmoid(out)
    return x * attn, attn


if __name__ == "__main__":
    key = jax.random.PRNGKey(0)
    kx, kw, kx2 = jax.random.split(key, 3)

    # Deterministic conv weight (out=1, in=2, 7, 7), kaiming-uniform-ish.
    fan_in = 2 * KSIZE * KSIZE
    bound = (1.0 / fan_in) ** 0.5
    conv_w = jax.random.uniform(kw, (1, 2, KSIZE, KSIZE), dtype=jnp.float32,
                                minval=-bound, maxval=bound)

    # Primary test: batch=2, channels=4, 16x16 spatial (grid of 2 x block_n=1).
    N, C, H, W = 2, 4, 16, 16
    x = jax.random.normal(kx, (N, C, H, W), dtype=jnp.float32)

    y, attn = spatial_attention(x, conv_w)
    y = jax.block_until_ready(y)
    attn = jax.block_until_ready(attn)

    y_ref, attn_ref = _reference(x, conv_w)
    assert y.shape == (N, C, H, W) and attn.shape == (N, 1, H, W)
    assert jnp.allclose(y, y_ref, atol=1e-5, rtol=1e-5)
    assert jnp.allclose(attn, attn_ref, atol=1e-5, rtol=1e-5)

    # Second test: multi-image block + multi-step grid (N=4, block_n=2).
    x2 = jax.random.normal(kx2, (4, 4, 16, 16), dtype=jnp.float32)
    y2, attn2 = spatial_attention(x2, conv_w, block_n=2)
    y2 = jax.block_until_ready(y2)
    y2_ref, attn2_ref = _reference(x2, conv_w)
    assert jnp.allclose(y2, y2_ref, atol=1e-5, rtol=1e-5)
    assert jnp.allclose(attn2, attn2_ref, atol=1e-5, rtol=1e-5)

    print("KERNEL_OK")
</pallas_src>

<mosaic_0001>
module attributes {stable_mosaic.version = 11 : i64} {
  func.func @_spatial_attention_kernel(%arg0: i32, %arg1: memref<98xf32, #tpu.memory_space<smem>>, %arg2: memref<1x4x256xf32, #tpu.memory_space<vmem>>, %arg3: memref<1x4x256xf32, #tpu.memory_space<vmem>>, %arg4: memref<1x1x256xf32, #tpu.memory_space<vmem>>) attributes {dimension_semantics = [#tpu.dimension_semantics<parallel>], iteration_bounds = array<i64: 2>, scalar_prefetch = 1 : i64, scratch_operands = 0 : i64, tpu.core_type = #tpu.core_type<tc>, window_params = [{transform_indices = @transform_0, window_bounds = array<i64: 1, 4, 256>}, {transform_indices = @transform_1, window_bounds = array<i64: 1, 4, 256>}, {transform_indices = @transform_2, window_bounds = array<i64: 1, 1, 256>}]} {
    %c0 = arith.constant 0 : index
    %c0_0 = arith.constant 0 : index
    %c0_1 = arith.constant 0 : index
    %0 = vector.load %arg2[%c0, %c0_0, %c0_1] : memref<1x4x256xf32, #tpu.memory_space<vmem>>, vector<1x4x256xf32>
    %cst = arith.constant dense<0.000000e+00> : vector<1x256xf32>
    %1 = vector.multi_reduction <add>, %0, %cst [1] : vector<1x4x256xf32> to vector<1x256xf32>
    %cst_2 = arith.constant 2.500000e-01 : f32
    %2 = vector.broadcast %cst_2 : f32 to vector<1x256xf32>
    %3 = arith.mulf %1, %2 : vector<1x256xf32>
    %cst_3 = arith.constant dense<0xFF800000> : vector<1x256xf32>
    %4 = vector.multi_reduction <maximumf>, %0, %cst_3 [1] : vector<1x4x256xf32> to vector<1x256xf32>
    %c0_4 = arith.constant 0 : index
    %5 = memref.load %arg1[%c0_4] : memref<98xf32, #tpu.memory_space<smem>>
    %c1 = arith.constant 1 : index
    %6 = memref.load %arg1[%c1] : memref<98xf32, #tpu.memory_space<smem>>
    %c2 = arith.constant 2 : index
    %7 = memref.load %arg1[%c2] : memref<98xf32, #tpu.memory_space<smem>>
    %c3 = arith.constant 3 : index
    %8 = memref.load %arg1[%c3] : memref<98xf32, #tpu.memory_space<smem>>
    %c4 = arith.constant 4 : index
    %9 = memref.load %arg1[%c4] : memref<98xf32, #tpu.memory_space<smem>>
    %c5 = arith.constant 5 : index
    %10 = memref.load %arg1[%c5] : memref<98xf32, #tpu.memory_space<smem>>
    %c6 = arith.constant 6 : index
    %11 = memref.load %arg1[%c6] : memref<98xf32, #tpu.memory_space<smem>>
    %c7 = arith.constant 7 : index
    %12 = memref.load %arg1[%c7] : memref<98xf32, #tpu.memory_space<smem>>
    %c8 = arith.constant 8 : index
    %13 = memref.load %arg1[%c8] : memref<98xf32, #tpu.memory_space<smem>>
    %c9 = arith.constant 9 : index
    %14 = memref.load %arg1[%c9] : memref<98xf32, #tpu.memory_space<smem>>
    %c10 = arith.constant 10 : index
    %15 = memref.load %arg1[%c10] : memref<98xf32, #tpu.memory_space<smem>>
    %c11 = arith.constant 11 : index
    %16 = memref.load %arg1[%c11] : memref<98xf32, #tpu.memory_space<smem>>
    %c12 = arith.constant 12 : index
    %17 = memref.load %arg1[%c12] : memref<98xf32, #tpu.memory_space<smem>>
    %c13 = arith.constant 13 : index
    %18 = memref.load %arg1[%c13] : memref<98xf32, #tpu.memory_space<smem>>
    %c14 = arith.constant 14 : index
    %19 = memref.load %arg1[%c14] : memref<98xf32, #tpu.memory_space<smem>>
    %c15 = arith.constant 15 : index
    %20 = memref.load %arg1[%c15] : memref<98xf32, #tpu.memory_space<smem>>
    %c16 = arith.constant 16 : index
    %21 = memref.load %arg1[%c16] : memref<98xf32, #tpu.memory_space<smem>>
    %c17 = arith.constant 17 : index
    %22 = memref.load %arg1[%c17] : memref<98xf32, #tpu.memory_space<smem>>
    %c18 = arith.constant 18 : index
    %23 = memref.load %arg1[%c18] : memref<98xf32, #tpu.memory_space<smem>>
    %c19 = arith.constant 19 : index
    %24 = memref.load %arg1[%c19] : memref<98xf32, #tpu.memory_space<smem>>
    %c20 = arith.constant 20 : index
    %25 = memref.load %arg1[%c20] : memref<98xf32, #tpu.memory_space<smem>>
    %c21 = arith.constant 21 : index
    %26 = memref.load %arg1[%c21] : memref<98xf32, #tpu.memory_space<smem>>
    %c22 = arith.constant 22 : index
    %27 = memref.load %arg1[%c22] : memref<98xf32, #tpu.memory_space<smem>>
    %c23 = arith.constant 23 : index
    %28 = memref.load %arg1[%c23] : memref<98xf32, #tpu.memory_space<smem>>
    %c24 = arith.constant 24 : index
    %29 = memref.load %arg1[%c24] : memref<98xf32, #tpu.memory_space<smem>>
    %c25 = arith.constant 25 : index
    %30 = memref.load %arg1[%c25] : memref<98xf32, #tpu.memory_space<smem>>
    %c26 = arith.constant 26 : index
    %31 = memref.load %arg1[%c26] : memref<98xf32, #tpu.memory_space<smem>>
    %c27 = arith.constant 27 : index
    %32 = memref.load %arg1[%c27] : memref<98xf32, #tpu.memory_space<smem>>
    %c28 = arith.constant 28 : index
    %33 = memref.load %arg1[%c28] : memref<98xf32, #tpu.memory_space<smem>>
    %c29 = arith.constant 29 : index
    %34 = memref.load %arg1[%c29] : memref<98xf32, #tpu.memory_space<smem>>
    %c30 = arith.constant 30 : index
    %35 = memref.load %arg1[%c30] : memref<98xf32, #tpu.memory_space<smem>>
    %c31 = arith.constant 31 : index
    %36 = memref.load %arg1[%c31] : memref<98xf32, #tpu.memory_space<smem>>
    %c32 = arith.constant 32 : index
    %37 = memref.load %arg1[%c32] : memref<98xf32, #tpu.memory_space<smem>>
    %c33 = arith.constant 33 : index
    %38 = memref.load %arg1[%c33] : memref<98xf32, #tpu.memory_space<smem>>
    %c34 = arith.constant 34 : index
    %39 = memref.load %arg1[%c34] : memref<98xf32, #tpu.memory_space<smem>>
    %c35 = arith.constant 35 : index
    %40 = memref.load %arg1[%c35] : memref<98xf32, #tpu.memory_space<smem>>
    %c36 = arith.constant 36 : index
    %41 = memref.load %arg1[%c36] : memref<98xf32, #tpu.memory_space<smem>>
    %c37 = arith.constant 37 : index
    %42 = memref.load %arg1[%c37] : memref<98xf32, #tpu.memory_space<smem>>
    %c38 = arith.constant 38 : index
    %43 = memref.load %arg1[%c38] : memref<98xf32, #tpu.memory_space<smem>>
    %c39 = arith.constant 39 : index
    %44 = memref.load %arg1[%c39] : memref<98xf32, #tpu.memory_space<smem>>
    %c40 = arith.constant 40 : index
    %45 = memref.load %arg1[%c40] : memref<98xf32, #tpu.memory_space<smem>>
    %c41 = arith.constant 41 : index
    %46 = memref.load %arg1[%c41] : memref<98xf32, #tpu.memory_space<smem>>
    %c42 = arith.constant 42 : index
    %47 = memref.load %arg1[%c42] : memref<98xf32, #tpu.memory_space<smem>>
    %c43 = arith.constant 43 : index
    %48 = memref.load %arg1[%c43] : memref<98xf32, #tpu.memory_space<smem>>
    %c44 = arith.constant 44 : index
    %49 = memref.load %arg1[%c44] : memref<98xf32, #tpu.memory_space<smem>>
    %c45 = arith.constant 45 : index
    %50 = memref.load %arg1[%c45] : memref<98xf32, #tpu.memory_space<smem>>
    %c46 = arith.constant 46 : index
    %51 = memref.load %arg1[%c46] : memref<98xf32, #tpu.memory_space<smem>>
    %c47 = arith.constant 47 : index
    %52 = memref.load %arg1[%c47] : memref<98xf32, #tpu.memory_space<smem>>
    %c48 = arith.constant 48 : index
    %53 = memref.load %arg1[%c48] : memref<98xf32, #tpu.memory_space<smem>>
    %c49 = arith.constant 49 : index
    %54 = memref.load %arg1[%c49] : memref<98xf32, #tpu.memory_space<smem>>
    %c50 = arith.constant 50 : index
    %55 = memref.load %arg1[%c50] : memref<98xf32, #tpu.memory_space<smem>>
    %c51 = arith.constant 51 : index
    %56 = memref.load %arg1[%c51] : memref<98xf32, #tpu.memory_space<smem>>
    %c52 = arith.constant 52 : index
    %57 = memref.load %arg1[%c52] : memref<98xf32, #tpu.memory_space<smem>>
    %c53 = arith.constant 53 : index
    %58 = memref.load %arg1[%c53] : memref<98xf32, #tpu.memory_space<smem>>
    %c54 = arith.constant 54 : index
    %59 = memref.load %arg1[%c54] : memref<98xf32, #tpu.memory_space<smem>>
    %c55 = arith.constant 55 : index
    %60 = memref.load %arg1[%c55] : memref<98xf32, #tpu.memory_space<smem>>
    %c56 = arith.constant 56 : index
    %61 = memref.load %arg1[%c56] : memref<98xf32, #tpu.memory_space<smem>>
    %c57 = arith.constant 57 : index
    %62 = memref.load %arg1[%c57] : memref<98xf32, #tpu.memory_space<smem>>
    %c58 = arith.constant 58 : index
    %63 = memref.load %arg1[%c58] : memref<98xf32, #tpu.memory_space<smem>>
    %c59 = arith.constant 59 : index
    %64 = memref.load %arg1[%c59] : memref<98xf32, #tpu.memory_space<smem>>
    %c60 = arith.constant 60 : index
    %65 = memref.load %arg1[%c60] : memref<98xf32, #tpu.memory_space<smem>>
    %c61 = arith.constant 61 : index
    %66 = memref.load %arg1[%c61] : memref<98xf32, #tpu.memory_space<smem>>
    %c62 = arith.constant 62 : index
    %67 = memref.load %arg1[%c62] : memref<98xf32, #tpu.memory_space<smem>>
    %c63 = arith.constant 63 : index
    %68 = memref.load %arg1[%c63] : memref<98xf32, #tpu.memory_space<smem>>
    %c64 = arith.constant 64 : index
    %69 = memref.load %arg1[%c64] : memref<98xf32, #tpu.memory_space<smem>>
    %c65 = arith.constant 65 : index
    %70 = memref.load %arg1[%c65] : memref<98xf32, #tpu.memory_space<smem>>
    %c66 = arith.constant 66 : index
    %71 = memref.load %arg1[%c66] : memref<98xf32, #tpu.memory_space<smem>>
    %c67 = arith.constant 67 : index
    %72 = memref.load %arg1[%c67] : memref<98xf32, #tpu.memory_space<smem>>
    %c68 = arith.constant 68 : index
    %73 = memref.load %arg1[%c68] : memref<98xf32, #tpu.memory_space<smem>>
    %c69 = arith.constant 69 : index
    %74 = memref.load %arg1[%c69] : memref<98xf32, #tpu.memory_space<smem>>
    %c70 = arith.constant 70 : index
    %75 = memref.load %arg1[%c70] : memref<98xf32, #tpu.memory_space<smem>>
    %c71 = arith.constant 71 : index
    %76 = memref.load %arg1[%c71] : memref<98xf32, #tpu.memory_space<smem>>
    %c72 = arith.constant 72 : index
    %77 = memref.load %arg1[%c72] : memref<98xf32, #tpu.memory_space<smem>>
    %c73 = arith.constant 73 : index
    %78 = memref.load %arg1[%c73] : memref<98xf32, #tpu.memory_space<smem>>
    %c74 = arith.constant 74 : index
    %79 = memref.load %arg1[%c74] : memref<98xf32, #tpu.memory_space<smem>>
    %c75 = arith.constant 75 : index
    %80 = memref.load %arg1[%c75] : memref<98xf32, #tpu.memory_space<smem>>
    %c76 = arith.constant 76 : index
    %81 = memref.load %arg1[%c76] : memref<98xf32, #tpu.memory_space<smem>>
    %c77 = arith.constant 77 : index
    %82 = memref.load %arg1[%c77] : memref<98xf32, #tpu.memory_space<smem>>
    %c78 = arith.constant 78 : index
    %83 = memref.load %arg1[%c78] : memref<98xf32, #tpu.memory_space<smem>>
    %c79 = arith.constant 79 : index
    %84 = memref.load %arg1[%c79] : memref<98xf32, #tpu.memory_space<smem>>
    %c80 = arith.constant 80 : index
    %85 = memref.load %arg1[%c80] : memref<98xf32, #tpu.memory_space<smem>>
    %c81 = arith.constant 81 : index
    %86 = memref.load %arg1[%c81] : memref<98xf32, #tpu.memory_space<smem>>
    %c82 = arith.constant 82 : index
    %87 = memref.load %arg1[%c82] : memref<98xf32, #tpu.memory_space<smem>>
    %c83 = arith.constant 83 : index
    %88 = memref.load %arg1[%c83] : memref<98xf32, #tpu.memory_space<smem>>
    %c84 = arith.constant 84 : index
    %89 = memref.load %arg1[%c84] : memref<98xf32, #tpu.memory_space<smem>>
    %c85 = arith.constant 85 : index
    %90 = memref.load %arg1[%c85] : memref<98xf32, #tpu.memory_space<smem>>
    %c86 = arith.constant 86 : index
    %91 = memref.load %arg1[%c86] : memref<98xf32, #tpu.memory_space<smem>>
    %c87 = arith.constant 87 : index
    %92 = memref.load %arg1[%c87] : memref<98xf32, #tpu.memory_space<smem>>
    %c88 = arith.constant 88 : index
    %93 = memref.load %arg1[%c88] : memref<98xf32, #tpu.memory_space<smem>>
    %c89 = arith.constant 89 : index
    %94 = memref.load %arg1[%c89] : memref<98xf32, #tpu.memory_space<smem>>
    %c90 = arith.constant 90 : index
    %95 = memref.load %arg1[%c90] : memref<98xf32, #tpu.memory_space<smem>>
    %c91 = arith.constant 91 : index
    %96 = memref.load %arg1[%c91] : memref<98xf32, #tpu.memory_space<smem>>
    %c92 = arith.constant 92 : index
    %97 = memref.load %arg1[%c92] : memref<98xf32, #tpu.memory_space<smem>>
    %c93 = arith.constant 93 : index
    %98 = memref.load %arg1[%c93] : memref<98xf32, #tpu.memory_space<smem>>
    %c94 = arith.constant 94 : index
    %99 = memref.load %arg1[%c94] : memref<98xf32, #tpu.memory_space<smem>>
    %c95 = arith.constant 95 : index
    %100 = memref.load %arg1[%c95] : memref<98xf32, #tpu.memory_space<smem>>
    %c96 = arith.constant 96 : index
    %101 = memref.load %arg1[%c96] : memref<98xf32, #tpu.memory_space<smem>>
    %c97 = arith.constant 97 : index
    %102 = memref.load %arg1[%c97] : memref<98xf32, #tpu.memory_space<smem>>
    %103 = vector.extract_strided_slice %3 {offsets = [0, 0], sizes = [1, 16], strides = [1, 1]} : vector<1x256xf32> to vector<1x16xf32>
    %104 = vector.extract_strided_slice %3 {offsets = [0, 16], sizes = [1, 16], strides = [1, 1]} : vector<1x256xf32> to vector<1x16xf32>
    %105 = vector.extract_strided_slice %3 {offsets = [0, 32], sizes = [1, 16], strides = [1, 1]} : vector<1x256xf32> to vector<1x16xf32>
    %106 = vector.extract_strided_slice %3 {offsets = [0, 48], sizes = [1, 16], strides = [1, 1]} : vector<1x256xf32> to vector<1x16xf32>
    %107 = vector.extract_strided_slice %3 {offsets = [0, 64], sizes = [1, 16], strides = [1, 1]} : vector<1x256xf32> to vector<1x16xf32>
    %108 = vector.extract_strided_slice %3 {offsets = [0, 80], sizes = [1, 16], strides = [1, 1]} : vector<1x256xf32> to vector<1x16xf32>
    %109 = vector.extract_strided_slice %3 {offsets = [0, 96], sizes = [1, 16], strides = [1, 1]} : vector<1x256xf32> to vector<1x16xf32>
    %110 = vector.extract_strided_slice %3 {offsets = [0, 112], sizes = [1, 16], strides = [1, 1]} : vector<1x256xf32> to vector<1x16xf32>
    %111 = vector.extract_strided_slice %3 {offsets = [0, 128], sizes = [1, 16], strides = [1, 1]} : vector<1x256xf32> to vector<1x16xf32>
    %112 = vector.extract_strided_slice %3 {offsets = [0, 144], sizes = [1, 16], strides = [1, 1]} : vector<1x256xf32> to vector<1x16xf32>
    %113 = vector.extract_strided_slice %3 {offsets = [0, 160], sizes = [1, 16], strides = [1, 1]} : vector<1x256xf32> to vector<1x16xf32>
    %114 = vector.extract_strided_slice %3 {offsets = [0, 176], sizes = [1, 16], strides = [1, 1]} : vector<1x256xf32> to vector<1x16xf32>
    %115 = vector.extract_strided_slice %3 {offsets = [0, 192], sizes = [1, 16], strides = [1, 1]} : vector<1x256xf32> to vector<1x16xf32>
    %116 = vector.extract_strided_slice %3 {offsets = [0, 208], sizes = [1, 16], strides = [1, 1]} : vector<1x256xf32> to vector<1x16xf32>
    %117 = vector.extract_strided_slice %3 {offsets = [0, 224], sizes = [1, 16], strides = [1, 1]} : vector<1x256xf32> to vector<1x16xf32>
    %118 = vector.extract_strided_slice %3 {offsets = [0, 240], sizes = [1, 16], strides = [1, 1]} : vector<1x256xf32> to vector<1x16xf32>
    %119 = tpu.concatenate %103, %104, %105, %106, %107, %108, %109, %110, %111, %112, %113, %114, %115, %116, %117, %118 in 0 : vector<1x16xf32>, vector<1x16xf32>, vector<1x16xf32>, vector<1x16xf32>, vector<1x16xf32>, vector<1x16xf32>, vector<1x16xf32>, vector<1x16xf32>, vector<1x16xf32>, vector<1x16xf32>, vector<1x16xf32>, vector<1x16xf32>, vector<1x16xf32>, vector<1x16xf32>, vector<1x16xf32>, vector<1x16xf32> -> vector<16x16xf32>
    %120 = vector.extract_strided_slice %119 {offsets = [3, 0], sizes = [1, 16], strides = [1, 1]} : vector<16x16xf32> to vector<1x16xf32>
    %121 = vector.extract_strided_slice %119 {offsets = [2, 0], sizes = [1, 16], strides = [1, 1]} : vector<16x16xf32> to vector<1x16xf32>
    %122 = vector.extract_strided_slice %119 {offsets = [1, 0], sizes = [1, 16], strides = [1, 1]} : vector<16x16xf32> to vector<1x16xf32>
    %123 = vector.extract_strided_slice %119 {offsets = [14, 0], sizes = [1, 16], strides = [1, 1]} : vector<16x16xf32> to vector<1x16xf32>
    %124 = vector.extract_strided_slice %119 {offsets = [13, 0], sizes = [1, 16], strides = [1, 1]} : vector<16x16xf32> to vector<1x16xf32>
    %125 = vector.extract_strided_slice %119 {offsets = [12, 0], sizes = [1, 16], strides = [1, 1]} : vector<16x16xf32> to vector<1x16xf32>
    %126 = tpu.concatenate %120, %121, %122, %119, %123, %124, %125 in 0 : vector<1x16xf32>, vector<1x16xf32>, vector<1x16xf32>, vector<16x16xf32>, vector<1x16xf32>, vector<1x16xf32>, vector<1x16xf32> -> vector<22x16xf32>
    %127 = vector.extract_strided_slice %126 {offsets = [0, 3], sizes = [22, 1], strides = [1, 1]} : vector<22x16xf32> to vector<22x1xf32>
    %128 = vector.extract_strided_slice %126 {offsets = [0, 2], sizes = [22, 1], strides = [1, 1]} : vector<22x16xf32> to vector<22x1xf32>
    %129 = vector.extract_strided_slice %126 {offsets = [0, 1], sizes = [22, 1], strides = [1, 1]} : vector<22x16xf32> to vector<22x1xf32>
    %130 = vector.extract_strided_slice %126 {offsets = [0, 14], sizes = [22, 1], strides = [1, 1]} : vector<22x16xf32> to vector<22x1xf32>
    %131 = vector.extract_strided_slice %126 {offsets = [0, 13], sizes = [22, 1], strides = [1, 1]} : vector<22x16xf32> to vector<22x1xf32>
    %132 = vector.extract_strided_slice %126 {offsets = [0, 12], sizes = [22, 1], strides = [1, 1]} : vector<22x16xf32> to vector<22x1xf32>
    %133 = tpu.concatenate %127, %128, %129, %126, %130, %131, %132 in 1 : vector<22x1xf32>, vector<22x1xf32>, vector<22x1xf32>, vector<22x16xf32>, vector<22x1xf32>, vector<22x1xf32>, vector<22x1xf32> -> vector<22x22xf32>
    %134 = vector.extract_strided_slice %4 {offsets = [0, 0], sizes = [1, 16], strides = [1, 1]} : vector<1x256xf32> to vector<1x16xf32>
    %135 = vector.extract_strided_slice %4 {offsets = [0, 16], sizes = [1, 16], strides = [1, 1]} : vector<1x256xf32> to vector<1x16xf32>
    %136 = vector.extract_strided_slice %4 {offsets = [0, 32], sizes = [1, 16], strides = [1, 1]} : vector<1x256xf32> to vector<1x16xf32>
    %137 = vector.extract_strided_slice %4 {offsets = [0, 48], sizes = [1, 16], strides = [1, 1]} : vector<1x256xf32> to vector<1x16xf32>
    %138 = vector.extract_strided_slice %4 {offsets = [0, 64], sizes = [1, 16], strides = [1, 1]} : vector<1x256xf32> to vector<1x16xf32>
    %139 = vector.extract_strided_slice %4 {offsets = [0, 80], sizes = [1, 16], strides = [1, 1]} : vector<1x256xf32> to vector<1x16xf32>
    %140 = vector.extract_strided_slice %4 {offsets = [0, 96], sizes = [1, 16], strides = [1, 1]} : vector<1x256xf32> to vector<1x16xf32>
    %141 = vector.extract_strided_slice %4 {offsets = [0, 112], sizes = [1, 16], strides = [1, 1]} : vector<1x256xf32> to vector<1x16xf32>
    %142 = vector.extract_strided_slice %4 {offsets = [0, 128], sizes = [1, 16], strides = [1, 1]} : vector<1x256xf32> to vector<1x16xf32>
    %143 = vector.extract_strided_slice %4 {offsets = [0, 144], sizes = [1, 16], strides = [1, 1]} : vector<1x256xf32> to vector<1x16xf32>
    %144 = vector.extract_strided_slice %4 {offsets = [0, 160], sizes = [1, 16], strides = [1, 1]} : vector<1x256xf32> to vector<1x16xf32>
    %145 = vector.extract_strided_slice %4 {offsets = [0, 176], sizes = [1, 16], strides = [1, 1]} : vector<1x256xf32> to vector<1x16xf32>
    %146 = vector.extract_strided_slice %4 {offsets = [0, 192], sizes = [1, 16], strides = [1, 1]} : vector<1x256xf32> to vector<1x16xf32>
    %147 = vector.extract_strided_slice %4 {offsets = [0, 208], sizes = [1, 16], strides = [1, 1]} : vector<1x256xf32> to vector<1x16xf32>
    %148 = vector.extract_strided_slice %4 {offsets = [0, 224], sizes = [1, 16], strides = [1, 1]} : vector<1x256xf32> to vector<1x16xf32>
    %149 = vector.extract_strided_slice %4 {offsets = [0, 240], sizes = [1, 16], strides = [1, 1]} : vector<1x256xf32> to vector<1x16xf32>
    %150 = tpu.concatenate %134, %135, %136, %137, %138, %139, %140, %141, %142, %143, %144, %145, %146, %147, %148, %149 in 0 : vector<1x16xf32>, vector<1x16xf32>, vector<1x16xf32>, vector<1x16xf32>, vector<1x16xf32>, vector<1x16xf32>, vector<1x16xf32>, vector<1x16xf32>, vector<1x16xf32>, vector<1x16xf32>, vector<1x16xf32>, vector<1x16xf32>, vector<1x16xf32>, vector<1x16xf32>, vector<1x16xf32>, vector<1x16xf32> -> vector<16x16xf32>
    %151 = vector.extract_strided_slice %150 {offsets = [3, 0], sizes = [1, 16], strides = [1, 1]} : vector<16x16xf32> to vector<1x16xf32>
    %152 = vector.extract_strided_slice %150 {offsets = [2, 0], sizes = [1, 16], strides = [1, 1]} : vector<16x16xf32> to vector<1x16xf32>
    %153 = vector.extract_strided_slice %150 {offsets = [1, 0], sizes = [1, 16], strides = [1, 1]} : vector<16x16xf32> to vector<1x16xf32>
    %154 = vector.extract_strided_slice %150 {offsets = [14, 0], sizes = [1, 16], strides = [1, 1]} : vector<16x16xf32> to vector<1x16xf32>
    %155 = vector.extract_strided_slice %150 {offsets = [13, 0], sizes = [1, 16], strides = [1, 1]} : vector<16x16xf32> to vector<1x16xf32>
    %156 = vector.extract_strided_slice %150 {offsets = [12, 0], sizes = [1, 16], strides = [1, 1]} : vector<16x16xf32> to vector<1x16xf32>
    %157 = tpu.concatenate %151, %152, %153, %150, %154, %155, %156 in 0 : vector<1x16xf32>, vector<1x16xf32>, vector<1x16xf32>, vector<16x16xf32>, vector<1x16xf32>, vector<1x16xf32>, vector<1x16xf32> -> vector<22x16xf32>
    %158 = vector.extract_strided_slice %157 {offsets = [0, 3], sizes = [22, 1], strides = [1, 1]} : vector<22x16xf32> to vector<22x1xf32>
    %159 = vector.extract_strided_slice %157 {offsets = [0, 2], sizes = [22, 1], strides = [1, 1]} : vector<22x16xf32> to vector<22x1xf32>
    %160 = vector.extract_strided_slice %157 {offsets = [0, 1], sizes = [22, 1], strides = [1, 1]} : vector<22x16xf32> to vector<22x1xf32>
    %161 = vector.extract_strided_slice %157 {offsets = [0, 14], sizes = [22, 1], strides = [1, 1]} : vector<22x16xf32> to vector<22x1xf32>
    %162 = vector.extract_strided_slice %157 {offsets = [0, 13], sizes = [22, 1], strides = [1, 1]} : vector<22x16xf32> to vector<22x1xf32>
    %163 = vector.extract_strided_slice %157 {offsets = [0, 12], sizes = [22, 1], strides = [1, 1]} : vector<22x16xf32> to vector<22x1xf32>
    %164 = tpu.concatenate %158, %159, %160, %157, %161, %162, %163 in 1 : vector<22x1xf32>, vector<22x1xf32>, vector<22x1xf32>, vector<22x16xf32>, vector<22x1xf32>, vector<22x1xf32>, vector<22x1xf32> -> vector<22x22xf32>
    %165 = vector.extract_strided_slice %133 {offsets = [0, 0], sizes = [22, 16], strides = [1, 1]} : vector<22x22xf32> to vector<22x16xf32>
    %166 = vector.extract_strided_slice %165 {offsets = [0, 0], sizes = [16, 16], strides = [1, 1]} : vector<22x16xf32> to vector<16x16xf32>
    %167 = vector.broadcast %5 : f32 to vector<16x16xf32>
    %168 = arith.mulf %167, %166 : vector<16x16xf32>
    %169 = vector.extract_strided_slice %165 {offsets = [1, 0], sizes = [16, 16], strides = [1, 1]} : vector<22x16xf32> to vector<16x16xf32>
    %170 = vector.broadcast %12 : f32 to vector<16x16xf32>
    %171 = arith.mulf %170, %169 : vector<16x16xf32>
    %172 = arith.addf %168, %171 : vector<16x16xf32>
    %173 = vector.extract_strided_slice %165 {offsets = [2, 0], sizes = [16, 16], strides = [1, 1]} : vector<22x16xf32> to vector<16x16xf32>
    %174 = vector.broadcast %19 : f32 to vector<16x16xf32>
    %175 = arith.mulf %174, %173 : vector<16x16xf32>
    %176 = arith.addf %172, %175 : vector<16x16xf32>
    %177 = vector.extract_strided_slice %165 {offsets = [3, 0], sizes = [16, 16], strides = [1, 1]} : vector<22x16xf32> to vector<16x16xf32>
    %178 = vector.broadcast %26 : f32 to vector<16x16xf32>
    %179 = arith.mulf %178, %177 : vector<16x16xf32>
    %180 = arith.addf %176, %179 : vector<16x16xf32>
    %181 = vector.extract_strided_slice %165 {offsets = [4, 0], sizes = [16, 16], strides = [1, 1]} : vector<22x16xf32> to vector<16x16xf32>
    %182 = vector.broadcast %33 : f32 to vector<16x16xf32>
    %183 = arith.mulf %182, %181 : vector<16x16xf32>
    %184 = arith.addf %180, %183 : vector<16x16xf32>
    %185 = vector.extract_strided_slice %165 {offsets = [5, 0], sizes = [16, 16], strides = [1, 1]} : vector<22x16xf32> to vector<16x16xf32>
    %186 = vector.broadcast %40 : f32 to vector<16x16xf32>
    %187 = arith.mulf %186, %185 : vector<16x16xf32>
    %188 = arith.addf %184, %187 : vector<16x16xf32>
    %189 = vector.extract_strided_slice %165 {offsets = [6, 0], sizes = [16, 16], strides = [1, 1]} : vector<22x16xf32> to vector<16x16xf32>
    %190 = vector.broadcast %47 : f32 to vector<16x16xf32>
    %191 = arith.mulf %190, %189 : vector<16x16xf32>
    %192 = arith.addf %188, %191 : vector<16x16xf32>
    %193 = vector.extract_strided_slice %133 {offsets = [0, 1], sizes = [22, 16], strides = [1, 1]} : vector<22x22xf32> to vector<22x16xf32>
    %194 = vector.extract_strided_slice %193 {offsets = [0, 0], sizes = [16, 16], strides = [1, 1]} : vector<22x16xf32> to vector<16x16xf32>
    %195 = vector.broadcast %6 : f32 to vector<16x16xf32>
    %196 = arith.mulf %195, %194 : vector<16x16xf32>
    %197 = arith.addf %192, %196 : vector<16x16xf32>
    %198 = vector.extract_strided_slice %193 {offsets = [1, 0], sizes = [16, 16], strides = [1, 1]} : vector<22x16xf32> to vector<16x16xf32>
    %199 = vector.broadcast %13 : f32 to vector<16x16xf32>
    %200 = arith.mulf %199, %198 : vector<16x16xf32>
    %201 = arith.addf %197, %200 : vector<16x16xf32>
    %202 = vector.extract_strided_slice %193 {offsets = [2, 0], sizes = [16, 16], strides = [1, 1]} : vector<22x16xf32> to vector<16x16xf32>
    %203 = vector.broadcast %20 : f32 to vector<16x16xf32>
    %204 = arith.mulf %203, %202 : vector<16x16xf32>
    %205 = arith.addf %201, %204 : vector<16x16xf32>
    %206 = vector.extract_strided_slice %193 {offsets = [3, 0], sizes = [16, 16], strides = [1, 1]} : vector<22x16xf32> to vector<16x16xf32>
    %207 = vector.broadcast %27 : f32 to vector<16x16xf32>
    %208 = arith.mulf %207, %206 : vector<16x16xf32>
    %209 = arith.addf %205, %208 : vector<16x16xf32>
    %210 = vector.extract_strided_slice %193 {offsets = [4, 0], sizes = [16, 16], strides = [1, 1]} : vector<22x16xf32> to vector<16x16xf32>
    %211 = vector.broadcast %34 : f32 to vector<16x16xf32>
    %212 = arith.mulf %211, %210 : vector<16x16xf32>
    %213 = arith.addf %209, %212 : vector<16x16xf32>
    %214 = vector.extract_strided_slice %193 {offsets = [5, 0], sizes = [16, 16], strides = [1, 1]} : vector<22x16xf32> to vector<16x16xf32>
    %215 = vector.broadcast %41 : f32 to vector<16x16xf32>
    %216 = arith.mulf %215, %214 : vector<16x16xf32>
    %217 = arith.addf %213, %216 : vector<16x16xf32>
    %218 = vector.extract_strided_slice %193 {offsets = [6, 0], sizes = [16, 16], strides = [1, 1]} : vector<22x16xf32> to vector<16x16xf32>
    %219 = vector.broadcast %48 : f32 to vector<16x16xf32>
    %220 = arith.mulf %219, %218 : vector<16x16xf32>
    %221 = arith.addf %217, %220 : vector<16x16xf32>
    %222 = vector.extract_strided_slice %133 {offsets = [0, 2], sizes = [22, 16], strides = [1, 1]} : vector<22x22xf32> to vector<22x16xf32>
    %223 = vector.extract_strided_slice %222 {offsets = [0, 0], sizes = [16, 16], strides = [1, 1]} : vector<22x16xf32> to vector<16x16xf32>
    %224 = vector.broadcast %7 : f32 to vector<16x16xf32>
    %225 = arith.mulf %224, %223 : vector<16x16xf32>
    %226 = arith.addf %221, %225 : vector<16x16xf32>
    %227 = vector.extract_strided_slice %222 {offsets = [1, 0], sizes = [16, 16], strides = [1, 1]} : vector<22x16xf32> to vector<16x16xf32>
    %228 = vector.broadcast %14 : f32 to vector<16x16xf32>
    %229 = arith.mulf %228, %227 : vector<16x16xf32>
    %230 = arith.addf %226, %229 : vector<16x16xf32>
    %231 = vector.extract_strided_slice %222 {offsets = [2, 0], sizes = [16, 16], strides = [1, 1]} : vector<22x16xf32> to vector<16x16xf32>
    %232 = vector.broadcast %21 : f32 to vector<16x16xf32>
    %233 = arith.mulf %232, %231 : vector<16x16xf32>
    %234 = arith.addf %230, %233 : vector<16x16xf32>
    %235 = vector.extract_strided_slice %222 {offsets = [3, 0], sizes = [16, 16], strides = [1, 1]} : vector<22x16xf32> to vector<16x16xf32>
    %236 = vector.broadcast %28 : f32 to vector<16x16xf32>
    %237 = arith.mulf %236, %235 : vector<16x16xf32>
    %238 = arith.addf %234, %237 : vector<16x16xf32>
    %239 = vector.extract_strided_slice %222 {offsets = [4, 0], sizes = [16, 16], strides = [1, 1]} : vector<22x16xf32> to vector<16x16xf32>
    %240 = vector.broadcast %35 : f32 to vector<16x16xf32>
    %241 = arith.mulf %240, %239 : vector<16x16xf32>
    %242 = arith.addf %238, %241 : vector<16x16xf32>
    %243 = vector.extract_strided_slice %222 {offsets = [5, 0], sizes = [16, 16], strides = [1, 1]} : vector<22x16xf32> to vector<16x16xf32>
    %244 = vector.broadcast %42 : f32 to vector<16x16xf32>
    %245 = arith.mulf %244, %243 : vector<16x16xf32>
    %246 = arith.addf %242, %245 : vector<16x16xf32>
    %247 = vector.extract_strided_slice %222 {offsets = [6, 0], sizes = [16, 16], strides = [1, 1]} : vector<22x16xf32> to vector<16x16xf32>
    %248 = vector.broadcast %49 : f32 to vector<16x16xf32>
    %249 = arith.mulf %248, %247 : vector<16x16xf32>
    %250 = arith.addf %246, %249 : vector<16x16xf32>
    %251 = vector.extract_strided_slice %133 {offsets = [0, 3], sizes = [22, 16], strides = [1, 1]} : vector<22x22xf32> to vector<22x16xf32>
    %252 = vector.extract_strided_slice %251 {offsets = [0, 0], sizes = [16, 16], strides = [1, 1]} : vector<22x16xf32> to vector<16x16xf32>
    %253 = vector.broadcast %8 : f32 to vector<16x16xf32>
    %254 = arith.mulf %253, %252 : vector<16x16xf32>
    %255 = arith.addf %250, %254 : vector<16x16xf32>
    %256 = vector.extract_strided_slice %251 {offsets = [1, 0], sizes = [16, 16], strides = [1, 1]} : vector<22x16xf32> to vector<16x16xf32>
    %257 = vector.broadcast %15 : f32 to vector<16x16xf32>
    %258 = arith.mulf %257, %256 : vector<16x16xf32>
    %259 = arith.addf %255, %258 : vector<16x16xf32>
    %260 = vector.extract_strided_slice %251 {offsets = [2, 0], sizes = [16, 16], strides = [1, 1]} : vector<22x16xf32> to vector<16x16xf32>
    %261 = vector.broadcast %22 : f32 to vector<16x16xf32>
    %262 = arith.mulf %261, %260 : vector<16x16xf32>
    %263 = arith.addf %259, %262 : vector<16x16xf32>
    %264 = vector.extract_strided_slice %251 {offsets = [3, 0], sizes = [16, 16], strides = [1, 1]} : vector<22x16xf32> to vector<16x16xf32>
    %265 = vector.broadcast %29 : f32 to vector<16x16xf32>
    %266 = arith.mulf %265, %264 : vector<16x16xf32>
    %267 = arith.addf %263, %266 : vector<16x16xf32>
    %268 = vector.extract_strided_slice %251 {offsets = [4, 0], sizes = [16, 16], strides = [1, 1]} : vector<22x16xf32> to vector<16x16xf32>
    %269 = vector.broadcast %36 : f32 to vector<16x16xf32>
    %270 = arith.mulf %269, %268 : vector<16x16xf32>
    %271 = arith.addf %267, %270 : vector<16x16xf32>
    %272 = vector.extract_strided_slice %251 {offsets = [5, 0], sizes = [16, 16], strides = [1, 1]} : vector<22x16xf32> to vector<16x16xf32>
    %273 = vector.broadcast %43 : f32 to vector<16x16xf32>
    %274 = arith.mulf %273, %272 : vector<16x16xf32>
    %275 = arith.addf %271, %274 : vector<16x16xf32>
    %276 = vector.extract_strided_slice %251 {offsets = [6, 0], sizes = [16, 16], strides = [1, 1]} : vector<22x16xf32> to vector<16x16xf32>
    %277 = vector.broadcast %50 : f32 to vector<16x16xf32>
    %278 = arith.mulf %277, %276 : vector<16x16xf32>
    %279 = arith.addf %275, %278 : vector<16x16xf32>
    %280 = vector.extract_strided_slice %133 {offsets = [0, 4], sizes = [22, 16], strides = [1, 1]} : vector<22x22xf32> to vector<22x16xf32>
    %281 = vector.extract_strided_slice %280 {offsets = [0, 0], sizes = [16, 16], strides = [1, 1]} : vector<22x16xf32> to vector<16x16xf32>
    %282 = vector.broadcast %9 : f32 to vector<16x16xf32>
    %283 = arith.mulf %282, %281 : vector<16x16xf32>
    %284 = arith.addf %279, %283 : vector<16x16xf32>
    %285 = vector.extract_strided_slice %280 {offsets = [1, 0], sizes = [16, 16], strides = [1, 1]} : vector<22x16xf32> to vector<16x16xf32>
    %286 = vector.broadcast %16 : f32 to vector<16x16xf32>
    %287 = arith.mulf %286, %285 : vector<16x16xf32>
    %288 = arith.addf %284, %287 : vector<16x16xf32>
    %289 = vector.extract_strided_slice %280 {offsets = [2, 0], sizes = [16, 16], strides = [1, 1]} : vector<22x16xf32> to vector<16x16xf32>
    %290 = vector.broadcast %23 : f32 to vector<16x16xf32>
    %291 = arith.mulf %290, %289 : vector<16x16xf32>
    %292 = arith.addf %288, %291 : vector<16x16xf32>
    %293 = vector.extract_strided_slice %280 {offsets = [3, 0], sizes = [16, 16], strides = [1, 1]} : vector<22x16xf32> to vector<16x16xf32>
    %294 = vector.broadcast %30 : f32 to vector<16x16xf32>
    %295 = arith.mulf %294, %293 : vector<16x16xf32>
    %296 = arith.addf %292, %295 : vector<16x16xf32>
    %297 = vector.extract_strided_slice %280 {offsets = [4, 0], sizes = [16, 16], strides = [1, 1]} : vector<22x16xf32> to vector<16x16xf32>
    %298 = vector.broadcast %37 : f32 to vector<16x16xf32>
    %299 = arith.mulf %298, %297 : vector<16x16xf32>
    %300 = arith.addf %296, %299 : vector<16x16xf32>
    %301 = vector.extract_strided_slice %280 {offsets = [5, 0], sizes = [16, 16], strides = [1, 1]} : vector<22x16xf32> to vector<16x16xf32>
    %302 = vector.broadcast %44 : f32 to vector<16x16xf32>
    %303 = arith.mulf %302, %301 : vector<16x16xf32>
    %304 = arith.addf %300, %303 : vector<16x16xf32>
    %305 = vector.extract_strided_slice %280 {offsets = [6, 0], sizes = [16, 16], strides = [1, 1]} : vector<22x16xf32> to vector<16x16xf32>
    %306 = vector.broadcast %51 : f32 to vector<16x16xf32>
    %307 = arith.mulf %306, %305 : vector<16x16xf32>
    %308 = arith.addf %304, %307 : vector<16x16xf32>
    %309 = vector.extract_strided_slice %133 {offsets = [0, 5], sizes = [22, 16], strides = [1, 1]} : vector<22x22xf32> to vector<22x16xf32>
    %310 = vector.extract_strided_slice %309 {offsets = [0, 0], sizes = [16, 16], strides = [1, 1]} : vector<22x16xf32> to vector<16x16xf32>
    %311 = vector.broadcast %10 : f32 to vector<16x16xf32>
    %312 = arith.mulf %311, %310 : vector<16x16xf32>
    %313 = arith.addf %308, %312 : vector<16x16xf32>
    %314 = vector.extract_strided_slice %309 {offsets = [1, 0], sizes = [16, 16], strides = [1, 1]} : vector<22x16xf32> to vector<16x16xf32>
    %315 = vector.broadcast %17 : f32 to vector<16x16xf32>
    %316 = arith.mulf %315, %314 : vector<16x16xf32>
    %317 = arith.addf %313, %316 : vector<16x16xf32>
    %318 = vector.extract_strided_slice %309 {offsets = [2, 0], sizes = [16, 16], strides = [1, 1]} : vector<22x16xf32> to vector<16x16xf32>
    %319 = vector.broadcast %24 : f32 to vector<16x16xf32>
    %320 = arith.mulf %319, %318 : vector<16x16xf32>
    %321 = arith.addf %317, %320 : vector<16x16xf32>
    %322 = vector.extract_strided_slice %309 {offsets = [3, 0], sizes = [16, 16], strides = [1, 1]} : vector<22x16xf32> to vector<16x16xf32>
    %323 = vector.broadcast %31 : f32 to vector<16x16xf32>
    %324 = arith.mulf %323, %322 : vector<16x16xf32>
    %325 = arith.addf %321, %324 : vector<16x16xf32>
    %326 = vector.extract_strided_slice %309 {offsets = [4, 0], sizes = [16, 16], strides = [1, 1]} : vector<22x16xf32> to vector<16x16xf32>
    %327 = vector.broadcast %38 : f32 to vector<16x16xf32>
    %328 = arith.mulf %327, %326 : vector<16x16xf32>
    %329 = arith.addf %325, %328 : vector<16x16xf32>
    %330 = vector.extract_strided_slice %309 {offsets = [5, 0], sizes = [16, 16], strides = [1, 1]} : vector<22x16xf32> to vector<16x16xf32>
    %331 = vector.broadcast %45 : f32 to vector<16x16xf32>
    %332 = arith.mulf %331, %330 : vector<16x16xf32>
    %333 = arith.addf %329, %332 : vector<16x16xf32>
    %334 = vector.extract_strided_slice %309 {offsets = [6, 0], sizes = [16, 16], strides = [1, 1]} : vector<22x16xf32> to vector<16x16xf32>
    %335 = vector.broadcast %52 : f32 to vector<16x16xf32>
    %336 = arith.mulf %335, %334 : vector<16x16xf32>
    %337 = arith.addf %333, %336 : vector<16x16xf32>
    %338 = vector.extract_strided_slice %133 {offsets = [0, 6], sizes = [22, 16], strides = [1, 1]} : vector<22x22xf32> to vector<22x16xf32>
    %339 = vector.extract_strided_slice %338 {offsets = [0, 0], sizes = [16, 16], strides = [1, 1]} : vector<22x16xf32> to vector<16x16xf32>
    %340 = vector.broadcast %11 : f32 to vector<16x16xf32>
    %341 = arith.mulf %340, %339 : vector<16x16xf32>
    %342 = arith.addf %337, %341 : vector<16x16xf32>
    %343 = vector.extract_strided_slice %338 {offsets = [1, 0], sizes = [16, 16], strides = [1, 1]} : vector<22x16xf32> to vector<16x16xf32>
    %344 = vector.broadcast %18 : f32 to vector<16x16xf32>
    %345 = arith.mulf %344, %343 : vector<16x16xf32>
    %346 = arith.addf %342, %345 : vector<16x16xf32>
    %347 = vector.extract_strided_slice %338 {offsets = [2, 0], sizes = [16, 16], strides = [1, 1]} : vector<22x16xf32> to vector<16x16xf32>
    %348 = vector.broadcast %25 : f32 to vector<16x16xf32>
    %349 = arith.mulf %348, %347 : vector<16x16xf32>
    %350 = arith.addf %346, %349 : vector<16x16xf32>
    %351 = vector.extract_strided_slice %338 {offsets = [3, 0], sizes = [16, 16], strides = [1, 1]} : vector<22x16xf32> to vector<16x16xf32>
    %352 = vector.broadcast %32 : f32 to vector<16x16xf32>
    %353 = arith.mulf %352, %351 : vector<16x16xf32>
    %354 = arith.addf %350, %353 : vector<16x16xf32>
    %355 = vector.extract_strided_slice %338 {offsets = [4, 0], sizes = [16, 16], strides = [1, 1]} : vector<22x16xf32> to vector<16x16xf32>
    %356 = vector.broadcast %39 : f32 to vector<16x16xf32>
    %357 = arith.mulf %356, %355 : vector<16x16xf32>
    %358 = arith.addf %354, %357 : vector<16x16xf32>
    %359 = vector.extract_strided_slice %338 {offsets = [5, 0], sizes = [16, 16], strides = [1, 1]} : vector<22x16xf32> to vector<16x16xf32>
    %360 = vector.broadcast %46 : f32 to vector<16x16xf32>
    %361 = arith.mulf %360, %359 : vector<16x16xf32>
    %362 = arith.addf %358, %361 : vector<16x16xf32>
    %363 = vector.extract_strided_slice %338 {offsets = [6, 0], sizes = [16, 16], strides = [1, 1]} : vector<22x16xf32> to vector<16x16xf32>
    %364 = vector.broadcast %53 : f32 to vector<16x16xf32>
    %365 = arith.mulf %364, %363 : vector<16x16xf32>
    %366 = arith.addf %362, %365 : vector<16x16xf32>
    %367 = vector.extract_strided_slice %164 {offsets = [0, 0], sizes = [22, 16], strides = [1, 1]} : vector<22x22xf32> to vector<22x16xf32>
    %368 = vector.extract_strided_slice %367 {offsets = [0, 0], sizes = [16, 16], strides = [1, 1]} : vector<22x16xf32> to vector<16x16xf32>
    %369 = vector.broadcast %54 : f32 to vector<16x16xf32>
    %370 = arith.mulf %369, %368 : vector<16x16xf32>
    %371 = arith.addf %366, %370 : vector<16x16xf32>
    %372 = vector.extract_strided_slice %367 {offsets = [1, 0], sizes = [16, 16], strides = [1, 1]} : vector<22x16xf32> to vector<16x16xf32>
    %373 = vector.broadcast %61 : f32 to vector<16x16xf32>
    %374 = arith.mulf %373, %372 : vector<16x16xf32>
    %375 = arith.addf %371, %374 : vector<16x16xf32>
    %376 = vector.extract_strided_slice %367 {offsets = [2, 0], sizes = [16, 16], strides = [1, 1]} : vector<22x16xf32> to vector<16x16xf32>
    %377 = vector.broadcast %68 : f32 to vector<16x16xf32>
    %378 = arith.mulf %377, %376 : vector<16x16xf32>
    %379 = arith.addf %375, %378 : vector<16x16xf32>
    %380 = vector.extract_strided_slice %367 {offsets = [3, 0], sizes = [16, 16], strides = [1, 1]} : vector<22x16xf32> to vector<16x16xf32>
    %381 = vector.broadcast %75 : f32 to vector<16x16xf32>
    %382 = arith.mulf %381, %380 : vector<16x16xf32>
    %383 = arith.addf %379, %382 : vector<16x16xf32>
    %384 = vector.extract_strided_slice %367 {offsets = [4, 0], sizes = [16, 16], strides = [1, 1]} : vector<22x16xf32> to vector<16x16xf32>
    %385 = vector.broadcast %82 : f32 to vector<16x16xf32>
    %386 = arith.mulf %385, %384 : vector<16x16xf32>
    %387 = arith.addf %383, %386 : vector<16x16xf32>
    %388 = vector.extract_strided_slice %367 {offsets = [5, 0], sizes = [16, 16], strides = [1, 1]} : vector<22x16xf32> to vector<16x16xf32>
    %389 = vector.broadcast %89 : f32 to vector<16x16xf32>
    %390 = arith.mulf %389, %388 : vector<16x16xf32>
    %391 = arith.addf %387, %390 : vector<16x16xf32>
    %392 = vector.extract_strided_slice %367 {offsets = [6, 0], sizes = [16, 16], strides = [1, 1]} : vector<22x16xf32> to vector<16x16xf32>
    %393 = vector.broadcast %96 : f32 to vector<16x16xf32>
    %394 = arith.mulf %393, %392 : vector<16x16xf32>
    %395 = arith.addf %391, %394 : vector<16x16xf32>
    %396 = vector.extract_strided_slice %164 {offsets = [0, 1], sizes = [22, 16], strides = [1, 1]} : vector<22x22xf32> to vector<22x16xf32>
    %397 = vector.extract_strided_slice %396 {offsets = [0, 0], sizes = [16, 16], strides = [1, 1]} : vector<22x16xf32> to vector<16x16xf32>
    %398 = vector.broadcast %55 : f32 to vector<16x16xf32>
    %399 = arith.mulf %398, %397 : vector<16x16xf32>
    %400 = arith.addf %395, %399 : vector<16x16xf32>
    %401 = vector.extract_strided_slice %396 {offsets = [1, 0], sizes = [16, 16], strides = [1, 1]} : vector<22x16xf32> to vector<16x16xf32>
    %402 = vector.broadcast %62 : f32 to vector<16x16xf32>
    %403 = arith.mulf %402, %401 : vector<16x16xf32>
    %404 = arith.addf %400, %403 : vector<16x16xf32>
    %405 = vector.extract_strided_slice %396 {offsets = [2, 0], sizes = [16, 16], strides = [1, 1]} : vector<22x16xf32> to vector<16x16xf32>
    %406 = vector.broadcast %69 : f32 to vector<16x16xf32>
    %407 = arith.mulf %406, %405 : vector<16x16xf32>
    %408 = arith.addf %404, %407 : vector<16x16xf32>
    %409 = vector.extract_strided_slice %396 {offsets = [3, 0], sizes = [16, 16], strides = [1, 1]} : vector<22x16xf32> to vector<16x16xf32>
    %410 = vector.broadcast %76 : f32 to vector<16x16xf32>
    %411 = arith.mulf %410, %409 : vector<16x16xf32>
    %412 = arith.addf %408, %411 : vector<16x16xf32>
    %413 = vector.extract_strided_slice %396 {offsets = [4, 0], sizes = [16, 16], strides = [1, 1]} : vector<22x16xf32> to vector<16x16xf32>
    %414 = vector.broadcast %83 : f32 to vector<16x16xf32>
    %415 = arith.mulf %414, %413 : vector<16x16xf32>
    %416 = arith.addf %412, %415 : vector<16x16xf32>
    %417 = vector.extract_strided_slice %396 {offsets = [5, 0], sizes = [16, 16], strides = [1, 1]} : vector<22x16xf32> to vector<16x16xf32>
    %418 = vector.broadcast %90 : f32 to vector<16x16xf32>
    %419 = arith.mulf %418, %417 : vector<16x16xf32>
    %420 = arith.addf %416, %419 : vector<16x16xf32>
    %421 = vector.extract_strided_slice %396 {offsets = [6, 0], sizes = [16, 16], strides = [1, 1]} : vector<22x16xf32> to vector<16x16xf32>
    %422 = vector.broadcast %97 : f32 to vector<16x16xf32>
    %423 = arith.mulf %422, %421 : vector<16x16xf32>
    %424 = arith.addf %420, %423 : vector<16x16xf32>
    %425 = vector.extract_strided_slice %164 {offsets = [0, 2], sizes = [22, 16], strides = [1, 1]} : vector<22x22xf32> to vector<22x16xf32>
    %426 = vector.extract_strided_slice %425 {offsets = [0, 0], sizes = [16, 16], strides = [1, 1]} : vector<22x16xf32> to vector<16x16xf32>
    %427 = vector.broadcast %56 : f32 to vector<16x16xf32>
    %428 = arith.mulf %427, %426 : vector<16x16xf32>
    %429 = arith.addf %424, %428 : vector<16x16xf32>
    %430 = vector.extract_strided_slice %425 {offsets = [1, 0], sizes = [16, 16], strides = [1, 1]} : vector<22x16xf32> to vector<16x16xf32>
    %431 = vector.broadcast %63 : f32 to vector<16x16xf32>
    %432 = arith.mulf %431, %430 : vector<16x16xf32>
    %433 = arith.addf %429, %432 : vector<16x16xf32>
    %434 = vector.extract_strided_slice %425 {offsets = [2, 0], sizes = [16, 16], strides = [1, 1]} : vector<22x16xf32> to vector<16x16xf32>
    %435 = vector.broadcast %70 : f32 to vector<16x16xf32>
    %436 = arith.mulf %435, %434 : vector<16x16xf32>
    %437 = arith.addf %433, %436 : vector<16x16xf32>
    %438 = vector.extract_strided_slice %425 {offsets = [3, 0], sizes = [16, 16], strides = [1, 1]} : vector<22x16xf32> to vector<16x16xf32>
    %439 = vector.broadcast %77 : f32 to vector<16x16xf32>
    %440 = arith.mulf %439, %438 : vector<16x16xf32>
    %441 = arith.addf %437, %440 : vector<16x16xf32>
    %442 = vector.extract_strided_slice %425 {offsets = [4, 0], sizes = [16, 16], strides = [1, 1]} : vector<22x16xf32> to vector<16x16xf32>
    %443 = vector.broadcast %84 : f32 to vector<16x16xf32>
    %444 = arith.mulf %443, %442 : vector<16x16xf32>
    %445 = arith.addf %441, %444 : vector<16x16xf32>
    %446 = vector.extract_strided_slice %425 {offsets = [5, 0], sizes = [16, 16], strides = [1, 1]} : vector<22x16xf32> to vector<16x16xf32>
    %447 = vector.broadcast %91 : f32 to vector<16x16xf32>
    %448 = arith.mulf %447, %446 : vector<16x16xf32>
    %449 = arith.addf %445, %448 : vector<16x16xf32>
    %450 = vector.extract_strided_slice %425 {offsets = [6, 0], sizes = [16, 16], strides = [1, 1]} : vector<22x16xf32> to vector<16x16xf32>
    %451 = vector.broadcast %98 : f32 to vector<16x16xf32>
    %452 = arith.mulf %451, %450 : vector<16x16xf32>
    %453 = arith.addf %449, %452 : vector<16x16xf32>
    %454 = vector.extract_strided_slice %164 {offsets = [0, 3], sizes = [22, 16], strides = [1, 1]} : vector<22x22xf32> to vector<22x16xf32>
    %455 = vector.extract_strided_slice %454 {offsets = [0, 0], sizes = [16, 16], strides = [1, 1]} : vector<22x16xf32> to vector<16x16xf32>
    %456 = vector.broadcast %57 : f32 to vector<16x16xf32>
    %457 = arith.mulf %456, %455 : vector<16x16xf32>
    %458 = arith.addf %453, %457 : vector<16x16xf32>
    %459 = vector.extract_strided_slice %454 {offsets = [1, 0], sizes = [16, 16], strides = [1, 1]} : vector<22x16xf32> to vector<16x16xf32>
    %460 = vector.broadcast %64 : f32 to vector<16x16xf32>
    %461 = arith.mulf %460, %459 : vector<16x16xf32>
    %462 = arith.addf %458, %461 : vector<16x16xf32>
    %463 = vector.extract_strided_slice %454 {offsets = [2, 0], sizes = [16, 16], strides = [1, 1]} : vector<22x16xf32> to vector<16x16xf32>
    %464 = vector.broadcast %71 : f32 to vector<16x16xf32>
    %465 = arith.mulf %464, %463 : vector<16x16xf32>
    %466 = arith.addf %462, %465 : vector<16x16xf32>
    %467 = vector.extract_strided_slice %454 {offsets = [3, 0], sizes = [16, 16], strides = [1, 1]} : vector<22x16xf32> to vector<16x16xf32>
    %468 = vector.broadcast %78 : f32 to vector<16x16xf32>
    %469 = arith.mulf %468, %467 : vector<16x16xf32>
    %470 = arith.addf %466, %469 : vector<16x16xf32>
    %471 = vector.extract_strided_slice %454 {offsets = [4, 0], sizes = [16, 16], strides = [1, 1]} : vector<22x16xf32> to vector<16x16xf32>
    %472 = vector.broadcast %85 : f32 to vector<16x16xf32>
    %473 = arith.mulf %472, %471 : vector<16x16xf32>
    %474 = arith.addf %470, %473 : vector<16x16xf32>
    %475 = vector.extract_strided_slice %454 {offsets = [5, 0], sizes = [16, 16], strides = [1, 1]} : vector<22x16xf32> to vector<16x16xf32>
    %476 = vector.broadcast %92 : f32 to vector<16x16xf32>
    %477 = arith.mulf %476, %475 : vector<16x16xf32>
    %478 = arith.addf %474, %477 : vector<16x16xf32>
    %479 = vector.extract_strided_slice %454 {offsets = [6, 0], sizes = [16, 16], strides = [1, 1]} : vector<22x16xf32> to vector<16x16xf32>
    %480 = vector.broadcast %99 : f32 to vector<16x16xf32>
    %481 = arith.mulf %480, %479 : vector<16x16xf32>
    %482 = arith.addf %478, %481 : vector<16x16xf32>
    %483 = vector.extract_strided_slice %164 {offsets = [0, 4], sizes = [22, 16], strides = [1, 1]} : vector<22x22xf32> to vector<22x16xf32>
    %484 = vector.extract_strided_slice %483 {offsets = [0, 0], sizes = [16, 16], strides = [1, 1]} : vector<22x16xf32> to vector<16x16xf32>
    %485 = vector.broadcast %58 : f32 to vector<16x16xf32>
    %486 = arith.mulf %485, %484 : vector<16x16xf32>
    %487 = arith.addf %482, %486 : vector<16x16xf32>
    %488 = vector.extract_strided_slice %483 {offsets = [1, 0], sizes = [16, 16], strides = [1, 1]} : vector<22x16xf32> to vector<16x16xf32>
    %489 = vector.broadcast %65 : f32 to vector<16x16xf32>
    %490 = arith.mulf %489, %488 : vector<16x16xf32>
    %491 = arith.addf %487, %490 : vector<16x16xf32>
    %492 = vector.extract_strided_slice %483 {offsets = [2, 0], sizes = [16, 16], strides = [1, 1]} : vector<22x16xf32> to vector<16x16xf32>
    %493 = vector.broadcast %72 : f32 to vector<16x16xf32>
    %494 = arith.mulf %493, %492 : vector<16x16xf32>
    %495 = arith.addf %491, %494 : vector<16x16xf32>
    %496 = vector.extract_strided_slice %483 {offsets = [3, 0], sizes = [16, 16], strides = [1, 1]} : vector<22x16xf32> to vector<16x16xf32>
    %497 = vector.broadcast %79 : f32 to vector<16x16xf32>
    %498 = arith.mulf %497, %496 : vector<16x16xf32>
    %499 = arith.addf %495, %498 : vector<16x16xf32>
    %500 = vector.extract_strided_slice %483 {offsets = [4, 0], sizes = [16, 16], strides = [1, 1]} : vector<22x16xf32> to vector<16x16xf32>
    %501 = vector.broadcast %86 : f32 to vector<16x16xf32>
    %502 = arith.mulf %501, %500 : vector<16x16xf32>
    %503 = arith.addf %499, %502 : vector<16x16xf32>
    %504 = vector.extract_strided_slice %483 {offsets = [5, 0], sizes = [16, 16], strides = [1, 1]} : vector<22x16xf32> to vector<16x16xf32>
    %505 = vector.broadcast %93 : f32 to vector<16x16xf32>
    %506 = arith.mulf %505, %504 : vector<16x16xf32>
    %507 = arith.addf %503, %506 : vector<16x16xf32>
    %508 = vector.extract_strided_slice %483 {offsets = [6, 0], sizes = [16, 16], strides = [1, 1]} : vector<22x16xf32> to vector<16x16xf32>
    %509 = vector.broadcast %100 : f32 to vector<16x16xf32>
    %510 = arith.mulf %509, %508 : vector<16x16xf32>
    %511 = arith.addf %507, %510 : vector<16x16xf32>
    %512 = vector.extract_strided_slice %164 {offsets = [0, 5], sizes = [22, 16], strides = [1, 1]} : vector<22x22xf32> to vector<22x16xf32>
    %513 = vector.extract_strided_slice %512 {offsets = [0, 0], sizes = [16, 16], strides = [1, 1]} : vector<22x16xf32> to vector<16x16xf32>
    %514 = vector.broadcast %59 : f32 to vector<16x16xf32>
    %515 = arith.mulf %514, %513 : vector<16x16xf32>
    %516 = arith.addf %511, %515 : vector<16x16xf32>
    %517 = vector.extract_strided_slice %512 {offsets = [1, 0], sizes = [16, 16], strides = [1, 1]} : vector<22x16xf32> to vector<16x16xf32>
    %518 = vector.broadcast %66 : f32 to vector<16x16xf32>
    %519 = arith.mulf %518, %517 : vector<16x16xf32>
    %520 = arith.addf %516, %519 : vector<16x16xf32>
    %521 = vector.extract_strided_slice %512 {offsets = [2, 0], sizes = [16, 16], strides = [1, 1]} : vector<22x16xf32> to vector<16x16xf32>
    %522 = vector.broadcast %73 : f32 to vector<16x16xf32>
    %523 = arith.mulf %522, %521 : vector<16x16xf32>
    %524 = arith.addf %520, %523 : vector<16x16xf32>
    %525 = vector.extract_strided_slice %512 {offsets = [3, 0], sizes = [16, 16], strides = [1, 1]} : vector<22x16xf32> to vector<16x16xf32>
    %526 = vector.broadcast %80 : f32 to vector<16x16xf32>
    %527 = arith.mulf %526, %525 : vector<16x16xf32>
    %528 = arith.addf %524, %527 : vector<16x16xf32>
    %529 = vector.extract_strided_slice %512 {offsets = [4, 0], sizes = [16, 16], strides = [1, 1]} : vector<22x16xf32> to vector<16x16xf32>
    %530 = vector.broadcast %87 : f32 to vector<16x16xf32>
    %531 = arith.mulf %530, %529 : vector<16x16xf32>
    %532 = arith.addf %528, %531 : vector<16x16xf32>
    %533 = vector.extract_strided_slice %512 {offsets = [5, 0], sizes = [16, 16], strides = [1, 1]} : vector<22x16xf32> to vector<16x16xf32>
    %534 = vector.broadcast %94 : f32 to vector<16x16xf32>
    %535 = arith.mulf %534, %533 : vector<16x16xf32>
    %536 = arith.addf %532, %535 : vector<16x16xf32>
    %537 = vector.extract_strided_slice %512 {offsets = [6, 0], sizes = [16, 16], strides = [1, 1]} : vector<22x16xf32> to vector<16x16xf32>
    %538 = vector.broadcast %101 : f32 to vector<16x16xf32>
    %539 = arith.mulf %538, %537 : vector<16x16xf32>
    %540 = arith.addf %536, %539 : vector<16x16xf32>
    %541 = vector.extract_strided_slice %164 {offsets = [0, 6], sizes = [22, 16], strides = [1, 1]} : vector<22x22xf32> to vector<22x16xf32>
    %542 = vector.extract_strided_slice %541 {offsets = [0, 0], sizes = [16, 16], strides = [1, 1]} : vector<22x16xf32> to vector<16x16xf32>
    %543 = vector.broadcast %60 : f32 to vector<16x16xf32>
    %544 = arith.mulf %543, %542 : vector<16x16xf32>
    %545 = arith.addf %540, %544 : vector<16x16xf32>
    %546 = vector.extract_strided_slice %541 {offsets = [1, 0], sizes = [16, 16], strides = [1, 1]} : vector<22x16xf32> to vector<16x16xf32>
    %547 = vector.broadcast %67 : f32 to vector<16x16xf32>
    %548 = arith.mulf %547, %546 : vector<16x16xf32>
    %549 = arith.addf %545, %548 : vector<16x16xf32>
    %550 = vector.extract_strided_slice %541 {offsets = [2, 0], sizes = [16, 16], strides = [1, 1]} : vector<22x16xf32> to vector<16x16xf32>
    %551 = vector.broadcast %74 : f32 to vector<16x16xf32>
    %552 = arith.mulf %551, %550 : vector<16x16xf32>
    %553 = arith.addf %549, %552 : vector<16x16xf32>
    %554 = vector.extract_strided_slice %541 {offsets = [3, 0], sizes = [16, 16], strides = [1, 1]} : vector<22x16xf32> to vector<16x16xf32>
    %555 = vector.broadcast %81 : f32 to vector<16x16xf32>
    %556 = arith.mulf %555, %554 : vector<16x16xf32>
    %557 = arith.addf %553, %556 : vector<16x16xf32>
    %558 = vector.extract_strided_slice %541 {offsets = [4, 0], sizes = [16, 16], strides = [1, 1]} : vector<22x16xf32> to vector<16x16xf32>
    %559 = vector.broadcast %88 : f32 to vector<16x16xf32>
    %560 = arith.mulf %559, %558 : vector<16x16xf32>
    %561 = arith.addf %557, %560 : vector<16x16xf32>
    %562 = vector.extract_strided_slice %541 {offsets = [5, 0], sizes = [16, 16], strides = [1, 1]} : vector<22x16xf32> to vector<16x16xf32>
    %563 = vector.broadcast %95 : f32 to vector<16x16xf32>
    %564 = arith.mulf %563, %562 : vector<16x16xf32>
    %565 = arith.addf %561, %564 : vector<16x16xf32>
    %566 = vector.extract_strided_slice %541 {offsets = [6, 0], sizes = [16, 16], strides = [1, 1]} : vector<22x16xf32> to vector<16x16xf32>
    %567 = vector.broadcast %102 : f32 to vector<16x16xf32>
    %568 = arith.mulf %567, %566 : vector<16x16xf32>
    %569 = arith.addf %565, %568 : vector<16x16xf32>
    %570 = arith.negf %569 : vector<16x16xf32>
    %571 = math.exp %570 : vector<16x16xf32>
    %cst_5 = arith.constant 1.000000e+00 : f32
    %572 = vector.broadcast %cst_5 : f32 to vector<16x16xf32>
    %573 = arith.addf %572, %571 : vector<16x16xf32>
    %574 = arith.divf %572, %573 : vector<16x16xf32>
    %575 = vector.extract_strided_slice %574 {offsets = [0, 0], sizes = [1, 16], strides = [1, 1]} : vector<16x16xf32> to vector<1x16xf32>
    %576 = vector.extract_strided_slice %574 {offsets = [1, 0], sizes = [1, 16], strides = [1, 1]} : vector<16x16xf32> to vector<1x16xf32>
    %577 = vector.extract_strided_slice %574 {offsets = [2, 0], sizes = [1, 16], strides = [1, 1]} : vector<16x16xf32> to vector<1x16xf32>
    %578 = vector.extract_strided_slice %574 {offsets = [3, 0], sizes = [1, 16], strides = [1, 1]} : vector<16x16xf32> to vector<1x16xf32>
    %579 = vector.extract_strided_slice %574 {offsets = [4, 0], sizes = [1, 16], strides = [1, 1]} : vector<16x16xf32> to vector<1x16xf32>
    %580 = vector.extract_strided_slice %574 {offsets = [5, 0], sizes = [1, 16], strides = [1, 1]} : vector<16x16xf32> to vector<1x16xf32>
    %581 = vector.extract_strided_slice %574 {offsets = [6, 0], sizes = [1, 16], strides = [1, 1]} : vector<16x16xf32> to vector<1x16xf32>
    %582 = vector.extract_strided_slice %574 {offsets = [7, 0], sizes = [1, 16], strides = [1, 1]} : vector<16x16xf32> to vector<1x16xf32>
    %583 = vector.extract_strided_slice %574 {offsets = [8, 0], sizes = [1, 16], strides = [1, 1]} : vector<16x16xf32> to vector<1x16xf32>
    %584 = vector.extract_strided_slice %574 {offsets = [9, 0], sizes = [1, 16], strides = [1, 1]} : vector<16x16xf32> to vector<1x16xf32>
    %585 = vector.extract_strided_slice %574 {offsets = [10, 0], sizes = [1, 16], strides = [1, 1]} : vector<16x16xf32> to vector<1x16xf32>
    %586 = vector.extract_strided_slice %574 {offsets = [11, 0], sizes = [1, 16], strides = [1, 1]} : vector<16x16xf32> to vector<1x16xf32>
    %587 = vector.extract_strided_slice %574 {offsets = [12, 0], sizes = [1, 16], strides = [1, 1]} : vector<16x16xf32> to vector<1x16xf32>
    %588 = vector.extract_strided_slice %574 {offsets = [13, 0], sizes = [1, 16], strides = [1, 1]} : vector<16x16xf32> to vector<1x16xf32>
    %589 = vector.extract_strided_slice %574 {offsets = [14, 0], sizes = [1, 16], strides = [1, 1]} : vector<16x16xf32> to vector<1x16xf32>
    %590 = vector.extract_strided_slice %574 {offsets = [15, 0], sizes = [1, 16], strides = [1, 1]} : vector<16x16xf32> to vector<1x16xf32>
    %591 = tpu.concatenate %575, %576, %577, %578, %579, %580, %581, %582, %583, %584, %585, %586, %587, %588, %589, %590 in 1 : vector<1x16xf32>, vector<1x16xf32>, vector<1x16xf32>, vector<1x16xf32>, vector<1x16xf32>, vector<1x16xf32>, vector<1x16xf32>, vector<1x16xf32>, vector<1x16xf32>, vector<1x16xf32>, vector<1x16xf32>, vector<1x16xf32>, vector<1x16xf32>, vector<1x16xf32>, vector<1x16xf32>, vector<1x16xf32> -> vector<1x256xf32>
    %592 = vector.shape_cast %591 : vector<1x256xf32> to vector<1x1x256xf32>
    %c0_6 = arith.constant 0 : index
    %c0_7 = arith.constant 0 : index
    %c0_8 = arith.constant 0 : index
    %593 = vector.load %arg4[%c0_6, %c0_7, %c0_8] : memref<1x1x256xf32, #tpu.memory_space<vmem>>, vector<1x1x256xf32>
    tpu.vector_store %arg4[%c0_6, %c0_7, %c0_8], %592 {strides = array<i32>} : memref<1x1x256xf32, #tpu.memory_space<vmem>>, vector<1x1x256xf32>,
    %594 = vector.broadcast %592 : vector<1x1x256xf32> to vector<1x4x256xf32>
    %595 = arith.mulf %0, %594 : vector<1x4x256xf32>
    %c0_9 = arith.constant 0 : index
    %c0_10 = arith.constant 0 : index
    %c0_11 = arith.constant 0 : index
    %596 = vector.load %arg3[%c0_9, %c0_10, %c0_11] : memref<1x4x256xf32, #tpu.memory_space<vmem>>, vector<1x4x256xf32>
    tpu.vector_store %arg3[%c0_9, %c0_10, %c0_11], %595 {strides = array<i32>} : memref<1x4x256xf32, #tpu.memory_space<vmem>>, vector<1x4x256xf32>,
    return
  }
  func.func @transform_0(%arg0: i32, %arg1: memref<98xf32, #tpu.memory_space<smem>>) -> (i32, i32, i32) {
    %c0_i32 = arith.constant 0 : i32
    %c0_i32_0 = arith.constant 0 : i32
    %c0_i32_1 = arith.constant 0 : i32
    return %arg0, %c0_i32, %c0_i32_0 : i32, i32, i32
  }
  func.func @transform_1(%arg0: i32, %arg1: memref<98xf32, #tpu.memory_space<smem>>) -> (i32, i32, i32) {
    %c0_i32 = arith.constant 0 : i32
    %c0_i32_0 = arith.constant 0 : i32
    %c0_i32_1 = arith.constant 0 : i32
    return %arg0, %c0_i32, %c0_i32_0 : i32, i32, i32
  }
  func.func @transform_2(%arg0: i32, %arg1: memref<98xf32, #tpu.memory_space<smem>>) -> (i32, i32, i32) {
    %c0_i32 = arith.constant 0 : i32
    %c0_i32_0 = arith.constant 0 : i32
    %c0_i32_1 = arith.constant 0 : i32
    return %arg0, %c0_i32, %c0_i32_0 : i32, i32, i32
  }
}

</mosaic_0001>

<bundles_post_ra>
// kernel: tpu_custom_call.1
= control target key start
LH: loop header
LB: loop body
LE: loop exit
PB: predicated region body
PF: predicated region fallthrough
CT: control target
= control target key end

     0   :  { %s5026_s0 = inlined_call_operand.hbm [shape: f32[98], index: 0, kind: input, shape index: {}]   ;;  %s5027_s1 = inlined_call_operand.hbm [shape: f32[2,4,256], index: 1, kind: input, shape index: {}]   ;;  %s5028_s2 = inlined_call_operand.hbm [shape: f32[2,4,256], index: 2, kind: output, shape index: {0}]   ;;  %s5029_s3 = inlined_call_operand.hbm [shape: f32[2,1,256], index: 3, kind: output, shape index: {1}]  }
   0x1   :  { %s2914_s14 = scalar_lea.hbm %s5026_s0, 16 }
   0x2   :  { %p2915_p0 = scmp.ne.s32.totalorder %s5026_s0, %s2914_s14  ;;  %p2918_p1 = scmp.lt.u32.totalorder %s2914_s14, %s5026_s0 }
   0x4   :  { %p2920_p2 = pnand %p2918_p1, %p2915_p0 }
   0x6   :  { %2923 = shalt.err (!%p2920_p2)  }
   0x7   :  { %s3056_s19 = smov [#allocation3]  }
   0x8   :  { %10 = dma.hbm_to_smem %s5026_s0, 16, %s3056_s19, [#allocation2] }
   0x9   :  { %3026 = dma.done.wait [#allocation2], 16 }
   0xa   :  { %3027 = vsyncadd [#allocation2], 4294967280 }
   0xb   :  { %12 = sfence }
   0xc   :  { %13 = vsyncpa [#allocation5], 0 }
   0xd   :  { %15 = vsyncpa [#allocation5 + $0x1], 0 }
   0xe   :  { %16 = vsyncpa [#allocation6], 0 }
   0xf   :  { %18 = vsyncpa [#allocation6 + $0x1], 0 }
  0x10   :  { %19 = vsyncpa [#allocation9], 0 }
  0x11   :  { %21 = vsyncpa [#allocation9 + $0x1], 0  ;;  %s3111_s22 = smov 0   ;;  %s3113_s23 = smov 0  }
  0x12   :  { %s3115_s24 = smov 0   ;;  %s3117_s25 = smov 0  }
  0x13 LB: > { %s3132_s0 = sadd.s32 4294967295, %s3054_s25   ;;  %s2713_s26 = sadd.s32 4294967294, %s3054_s25   ;;  %s3054_s25 = sphi %s3117_s25, %s5090_s25   ;;  %s3050_s24 = sphi %s3115_s24, %s5089_s24   ;;  %s3046_s23 = sphi %s3113_s23, %s5088_s23   ;;  %s3042_s22 = sphi %s3111_s22, %s5087_s22  }
  0x14   : > { %s3136_s27 = sadd.s32 1, %s3054_s25   ;;  %s34_s28 = sadd.s32 1, %s3050_s24 }
  0x15   : > { %s31_s29 = ssub.s32 %s3054_s25, %s3136_s27  ;;  %p41_p3 = scmp.ne.s32.totalorder %s3050_s24, %s3046_s23 }
  0x16   : > { %p32_p4 = scmp.eq.s32.totalorder %s31_s29, 0  ;;  %p42_p5 = scmp.eq.s32.totalorder %s3054_s25, 0 }
  0x17   : > { %p47_p6 = scmp.ne.s32.totalorder %s3046_s23, %s3042_s22  ;;  %p48_p7 = scmp.eq.s32.totalorder %s3132_s0, 0 }
  0x18   : > { %s3148_s30 = scalar_select %p32_p4, %s3050_s24, %s34_s28  }
  0x19   : > { %p3150_p8 = por %p42_p5, %p41_p3  ;;  %p3154_p9 = por %p48_p7, %p47_p6 }
  0x1a   : > { %p71_p10 = scmp.eq.s32.totalorder %s3132_s0, 1  ;;  %p77_p11 = scmp.eq.s32.totalorder %s2713_s26, 1 }
  0x1b   : > { %p2850_p13 = scmp.lt.s32.totalorder %s3054_s25, 2  ;;  %s123_s8 = sand.u32 1, %s3050_s24  }
  0x1c   : > { %p3161_p0 = por %p71_p10, %p41_p3  ;;  %p3165_p1 = por %p77_p11, %p47_p6 }
  0x1d   : > { %s2830_s9 = sshll.u32 %s3054_s25, 7  ;;  %s2716_s10 = sshll.u32 %s123_s8, 3 }
  0x1e   : > { %s5054_s6 = scalar_select %p3161_p0, 1, 0 }
  0x1f   : > { %s5055_s7 = scalar_select %p3165_p1, 1, 0 }
  0x20   : > { %s3174_s13 = scalar_lea.hbm %s5027_s1, %s2830_s9  ;;  %s127_s14 = scalar_lea.vmem [#allocation4], %s2716_s10 }
  0x21   : > { %s135_s15 = sshll.u32 %s127_s14, 4  ;;  %p3178_p2 = pnand %p2850_p13, %p3150_p8  ;;  %s3182_s15 = int_to_ptr.vmem [resolvable:$true] %s135_s15 }
  0x22   : > { %s124_s17 = scalar_lea.sflag [#allocation5], %s123_s8  ;;  %s2924_s18 = scalar_lea.hbm %s3174_s13, 128 }
  0x23   : > { %p2925_p5 = scmp.ne.s32.totalorder %s3174_s13, %s2924_s18  ;;  %p2926_p6 = pneg %p3178_p2 }
  0x24   : > { %s2929_s21 = scalar_lea.hbm %s5027_s1, 256  ;;  %p2930_p8 = scmp.lt.u32.totalorder %s3174_s13, %s5027_s1 }
  0x25   : > { %p2927_p7 = pnand %p2926_p6, %p2925_p5  ;;  %p2931_p11 = scmp.lt.u32.totalorder %s2929_s21, %s2924_s18 }
  0x26   : > { %p2933_p12 = scmp.lt.u32.totalorder %s2924_s18, %s3174_s13 }
  0x27   : > { %p2928_p10 = pneg %p2927_p7  ;;  %p2932_p13 = por %p2931_p11, %p2930_p8 }
  0x29   : > { %p2934_p3 = por %p2933_p12, %p2932_p13 }
  0x2b   : > { %p2935_p4 = pnand %p2934_p3, %p2928_p10 }
  0x2d   : > { %2938 = shalt.err (!%p2935_p4)
}
  0x2e   : > { %s2939_s29 = scalar_lea.vmem %s3182_s15, 128  ;;  %s3057_s4 = smov [#allocation4]  }
  0x2f   : > { %p2940_p5 = scmp.ne.s32.totalorder %s3182_s15, %s2939_s29  ;;  %s2944_s8 = sshll.u32 %s3057_s4, 4  ;;  %s2945_s8 = int_to_ptr.vmem [resolvable:$false] %s2944_s8 }
  0x30   : > { %s2946_s9 = scalar_lea.vmem %s2945_s8, 256  ;;  %p2947_p0 = scmp.lt.s32.totalorder %s3182_s15, %s2945_s8 }
  0x31   : > { %p2942_p7 = pnand %p2940_p5, %p2926_p6  ;;  %p2948_p8 = scmp.lt.s32.totalorder %s2946_s9, %s2939_s29 }
  0x33   : > { %p2943_p1 = pneg %p2942_p7  ;;  %p2949_p11 = por %p2948_p8, %p2947_p0 }
  0x35   : > { %p2950_p12 = pnand %p2949_p11, %p2943_p1 }
  0x37   : > { %2953 = shalt.err (!%p2950_p12)
}
  0x38   : > { %2842 = dma.hbm_to_vmem [thread:$0]  (!%p3178_p2), %s3174_s13, 128, %s3182_s15, %s124_s17  }
  0x39   : > { %p5057_p3 = scmp.lt.s32.totalorder %s3054_s25, 3  ;;  %p5058_p4 = scmp.ge.s32.totalorder %s3054_s25, 1 }
  0x3b   : > { %p141_p6 = pnand %p5058_p4, %p5057_p3 }
  0x3d   : > { %144 = sbr.rel (%p141_p6) target bundleno = 1101 (0x44d), region = 24 }
  0x44   : > { %s3216_s10 = sand.u32 1, %s3046_s23  }
  0x45   : > { %s5031_s11 = sshll.u32 %s3216_s10, 3  ;;  %s147_s12 = scalar_lea.sflag [#allocation5], %s3216_s10 }
  0x46   : > { %s3222_s14 = scalar_lea.vmem [#allocation4], %s5031_s11 }
  0x47   : > { %3029 = dma.done.wait (%p3154_p9), %s147_s12, 128  }
  0x48   : > { %3031 = vsyncadd (%p3154_p9), %s147_s12, 4294967168  ;;  %vm180_vm0 = vcmask 1043456   ;;  %v176_v0 = vld [vmem:[%s3222_s14] sm:$0xff]  ;;  %s5036_s5 = smov 80   ;;  %s5032_s13 = smov 112   ;;  %vm353_vm1 = vcmask 1040384  }
  0x49   : > { %v181_v1 = vsel %vm180_vm0, %v176_v0, 0.0  ;;  %v178_v2 = vcombine.high %v176_v0, %v176_v0  ;;  %v197_v16 = vsel %vm180_vm0, %v176_v0, -inf  ;;  %s5038_s15 = smov 64   ;;  %s5034_s16 = smov 96   ;;  %vm355_vm2 = vcmask 1041408  }
  0x4a   : > { %v182_v3 = vrot.slane %v181_v1, 4  ;;  %v198_v18 = vrot.slane %v197_v16, 4  ;;  %s5042_s17 = smov 32   ;;  %s5040_s18 = smov 48   ;;  %vm357_vm3 = vcmask 1042432   ;;  %vm360_vm4 = vcmask 1044480  }
  0x4b   : > { %v188_v4 = vsel %vm180_vm0, %v178_v2, 0.0  ;;  %s3064_s19 = smov 16   ;;  %v204_v22 = vsel %vm180_vm0, %v178_v2, -inf  ;;  %vm362_vm5 = vcmask 1045504   ;;  %vm364_vm6 = vcmask 1046528   ;;  %s3065_s20 = smov 125  }
  0x4c   : > { %v183_v5 = vadd.f32 %v182_v3, %v181_v1  ;;  %v189_v6 = vrot.slane %v188_v4, 4  ;;  %v199_v20 = vmax.f32 %v197_v16, %v198_v18  ;;  %v205_v24 = vrot.slane %v204_v22, 4  ;;  %s3066_s21 = smov 127   ;;  %s3067_s26 = smov 1  }
  0x4d   : > { %s3068_s28 = smov 3   ;;  %s3069_s29 = smov 5   ;;  %vm463_vm7 = vcmask 7168   ;;  %vm467_vm8 = vcmask 15360   ;;  %vm475_vm9 = vcmask 154624   ;;  %vm471_vm10 = vcmask 23552  }
  0x4e   : > { %v184_v7 = vrot.slane %v183_v5, 2  ;;  %v190_v8 = vadd.f32 %v189_v6, %v188_v4  ;;  %v200_v21 = vrot.slane %v199_v20, 2  ;;  %v206_v26 = vmax.f32 %v204_v22, %v205_v24  ;;  %s3070_s4 = smov 7   ;;  %s3071_s8 = smov 9  }
  0x4f   : > { %vm479_vm11 = vcmask 162816   ;;  %vm483_vm12 = vcmask 171008   ;;  %s2723_s9 = sld [smem:[#allocation3 + $0x1]]  ;;  %s3420_s12 = sld [smem:[#allocation3 + $0x2]]  ;;  %vm2519_vm13 = vcmask 130048   ;;  %vm2521_vm14 = vcmask 261120  }
  0x50   : > { %v185_v9 = vadd.f32 %v184_v7, %v183_v5  ;;  %v191_v10 = vrot.slane %v190_v8, 2  ;;  %v201_v23 = vmax.f32 %v199_v20, %v200_v21  ;;  %v207_v28 = vrot.slane %v206_v26, 2  ;;  %s3714_s11 = sld [smem:[#allocation3 + $0x7]]  ;;  %p5084_p0 = scmp.ne.s32.totalorder %s5054_s6, 0 }
  0x51   : > { %vm2523_vm15 = vcmask 392192  }
  0x52   : > { %v186_v11 = vrot.slane %v185_v9, 1  ;;  %v192_v13 = vadd.f32 %v191_v10, %v190_v8  ;;  %v202_v25 = vrot.slane %v201_v23, 1  ;;  %v208_v29 = vmax.f32 %v206_v26, %v207_v28 }
  0x54   : > { %v187_v12 = vadd.f32 %v186_v11, %v185_v9  ;;  %v193_v15 = vrot.slane %v192_v13, 1  ;;  %v203_v27 = vmax.f32 %v201_v23, %v202_v25  ;;  %v209_v30 = vrot.slane %v208_v29, 1 }
  0x56   : > { %v3231_v14 = vmul.f32 0.25, %v187_v12  ;;  %v194_v17 = vadd.f32 %v193_v15, %v192_v13  ;;  %v210_v31 = vmax.f32 %v208_v29, %v209_v30 }
  0x58   : > { %316 = vrot.lane.b32.xlu1 %v3231_v14, %s5036_s5  ;;  %310 = vrot.lane.b32.xlu0 %v3231_v14, %s5032_s13  ;;  %v3246_v19 = vmul.f32 0.25, %v194_v17 }
  0x5c   : > { %319 = vrot.lane.b32.xlu1 %v3231_v14, %s5038_s15  ;;  %313 = vrot.lane.b32.xlu0 %v3231_v14, %s5034_s16 }
  0x60   : > { %325 = vrot.lane.b32.xlu1 %v3231_v14, %s5042_s17  ;;  %322 = vrot.lane.b32.xlu0 %v3231_v14, %s5040_s18 }
  0x64   : > { %328 = vrot.lane.b32.xlu0 %v3231_v14, %s3064_s19  ;;  %332 = vrot.lane.b32.xlu1 %v3246_v19, %s5032_s13 }
  0x68   : > { %335 = vrot.lane.b32.xlu0 %v3246_v19, %s5034_s16  ;;  %338 = vrot.lane.b32.xlu1 %v3246_v19, %s5036_s5 }
  0x6c   : > { %341 = vrot.lane.b32.xlu0 %v3246_v19, %s5038_s15  ;;  %344 = vrot.lane.b32.xlu1 %v3246_v19, %s5040_s18 }
  0x70   : > { %347 = vrot.lane.b32.xlu0 %v3246_v19, %s5042_s17  ;;  %350 = vrot.lane.b32.xlu1 %v3246_v19, %s3064_s19 }
  0x74   : > { %488 = vrot.lane.b32.xlu1 %v203_v27, %s5032_s13  ;;  %491 = vrot.lane.b32.xlu0 %v203_v27, %s5034_s16 }
  0x78   : > { %494 = vrot.lane.b32.xlu1 %v203_v27, %s5036_s5  ;;  %497 = vrot.lane.b32.xlu0 %v203_v27, %s5038_s15 }
  0x7c   : > { %500 = vrot.lane.b32.xlu1 %v203_v27, %s5040_s18  ;;  %503 = vrot.lane.b32.xlu0 %v203_v27, %s5042_s17 }
  0x80   : > { %506 = vrot.lane.b32.xlu1 %v203_v27, %s3064_s19  ;;  %510 = vrot.lane.b32.xlu0 %v210_v31, %s5032_s13  ;;  %s3737_s13 = sld [smem:[#allocation3 + $0x29]] }
  0x84   : > { %513 = vrot.lane.b32.xlu1 %v210_v31, %s5034_s16  ;;  %516 = vrot.lane.b32.xlu0 %v210_v31, %s5036_s5  ;;  %s3739_s16 = sld [smem:[#allocation3 + $0xe]]  ;;  %s3741_s5 = sld [smem:[#allocation3 + $0x15]] }
  0x88   : > { %519 = vrot.lane.b32.xlu1 %v210_v31, %s5038_s15  ;;  %522 = vrot.lane.b32.xlu0 %v210_v31, %s5040_s18  ;;  %s3748_s15 = sld [smem:[#allocation3 + $0x1c]]  ;;  %s3750_s18 = sld [smem:[#allocation3 + $0x23]] }
  0x8c   : > { %525 = vrot.lane.b32.xlu1 %v210_v31, %s5042_s17  ;;  %528 = vrot.lane.b32.xlu0 %v210_v31, %s3064_s19  ;;  %s3767_s17 = sld [smem:[#allocation3 + $0x2a]] }
  0xca   : > { %v3279_v32 = vpop.permute.xlu1 %316  ;;  %v311_v33 = vpop.permute.xlu0 %310 }
  0xcb   : > { %v354_v21 = vsel %vm353_vm1, %v3231_v14, %v311_v33 }
  0xce   : > { %v3281_v34 = vpop.permute.xlu1 %319  ;;  %v314_v35 = vpop.permute.xlu0 %313 }
  0xcf   : > { %v356_v22 = vsel %vm355_vm2, %v354_v21, %v314_v35 }
  0xd0   : > { %v358_v23 = vsel %vm357_vm3, %v356_v22, %v3279_v32 }
  0xd1   : > { %v359_v25 = vsel %vm180_vm0, %v358_v23, %v3281_v34 }
  0xd2   : > { %v3283_v36 = vpop.permute.xlu1 %325  ;;  %v3285_v37 = vpop.permute.xlu0 %322 }
  0xd6   : > { %v3287_v38 = vpop.permute.xlu0 %328  ;;  %v333_v39 = vpop.permute.xlu1 %332 }
  0xd7   : > { %v366_v24 = vsel %vm353_vm1, %v3246_v19, %v333_v39 }
  0xda   : > { %v336_v40 = vpop.permute.xlu0 %335  ;;  %v3289_v41 = vpop.permute.xlu1 %338 }
  0xdb   : > { %v367_v14 = vsel %vm355_vm2, %v366_v24, %v336_v40 }
  0xdc   : > { %v368_v26 = vsel %vm357_vm3, %v367_v14, %v3289_v41 }
  0xde   : > { %v3291_v42 = vpop.permute.xlu0 %341  ;;  %v3293_v43 = vpop.permute.xlu1 %344 }
  0xdf   : > { %v369_v19 = vsel %vm180_vm0, %v368_v26, %v3291_v42 }
  0xe0   : > { %v370_v28 = vsel %vm360_vm4, %v369_v19, %v3293_v43 }
  0xe2   : > { %v3295_v44 = vpop.permute.xlu0 %347  ;;  %v3297_v45 = vpop.permute.xlu1 %350 }
  0xe3   : > { %v371_v30 = vsel %vm362_vm5, %v370_v28, %v3295_v44 }
  0xe4   : > { %v372_v32 = vsel %vm364_vm6, %v371_v30, %v3297_v45 }
  0xe5   : > { %v382_v35 = vrot.slane %v372_v32, 5 }
  0xe6   : > { %v489_v46 = vpop.permute.xlu1 %488  ;;  %v492_v47 = vpop.permute.xlu0 %491 }
  0xe7   : > { %v531_v48 = vsel %vm353_vm1, %v203_v27, %v489_v46  ;;  %v361_v27 = vsel %vm360_vm4, %v359_v25, %v3285_v37 }
  0xe8   : > { %v532_v49 = vsel %vm355_vm2, %v531_v48, %v492_v47  ;;  %v363_v29 = vsel %vm362_vm5, %v361_v27, %v3283_v36  ;;  %v386_v48 = vrot.slane %v372_v32, 3 }
  0xea   : > { %v495_v50 = vpop.permute.xlu1 %494  ;;  %v498_v51 = vpop.permute.xlu0 %497 }
  0xeb   : > { %v533_v52 = vsel %vm357_vm3, %v532_v49, %v495_v50  ;;  %v388_v49 = vrot.slane %v372_v32, 1  ;;  %v395_v50 = vsel %vm357_vm3, %v382_v35, %v386_v48 }
  0xec   : > { %v534_v53 = vsel %vm180_vm0, %v533_v52, %v498_v51  ;;  %v390_v52 = vrot.slane %v372_v32, 7 }
  0xed   : > { %v396_v51 = vsel %vm180_vm0, %v395_v50, %v388_v49 }
  0xee   : > { %v501_v54 = vpop.permute.xlu1 %500  ;;  %v504_v55 = vpop.permute.xlu0 %503 }
  0xef   : > { %v535_v56 = vsel %vm360_vm4, %v534_v53, %v501_v54  ;;  %v397_v53 = vsel %vm360_vm4, %v396_v51, %v390_v52 }
  0xf0   : > { %v536_v57 = vsel %vm362_vm5, %v535_v56, %v504_v55 }
  0xf2   : > { %v507_v58 = vpop.permute.xlu1 %506  ;;  %v511_v59 = vpop.permute.xlu0 %510 }
  0xf3   : > { %v537_v60 = vsel %vm364_vm6, %v536_v57, %v507_v58  ;;  %v538_v2 = vsel %vm353_vm1, %v210_v31, %v511_v59  ;;  %v365_v31 = vsel %vm364_vm6, %v363_v29, %v3287_v38 }
  0xf4   : > { %v546_v61 = vrot.slane %v537_v60, 3  ;;  %v548_v62 = vrot.slane %v537_v60, 1  ;;  %v550_v63 = vrot.slane %v537_v60, 7  ;;  %v553_v0 = vrot.slane %v537_v60, 5 }
  0xf5   : > { %v374_v33 = vrot.slane %v365_v31, 3  ;;  %v376_v34 = vrot.slane %v365_v31, 1  ;;  %v378_v37 = vrot.slane %v365_v31, 7  ;;  %v381_v36 = vrot.slane %v365_v31, 5 }
  0xf6   : > { %v564_v1 = vsel %vm353_vm1, %v546_v61, %v548_v62  ;;  %v514_v3 = vpop.permute.xlu1 %513  ;;  %v517_v4 = vpop.permute.xlu0 %516 }
  0xf7   : > { %v565_v5 = vsel %vm355_vm2, %v564_v1, %v550_v63  ;;  %v539_v6 = vsel %vm355_vm2, %v538_v2, %v514_v3  ;;  %v392_v38 = vsel %vm353_vm1, %v374_v33, %v376_v34  ;;  %v383_v39 = vsel %vm357_vm3, %v381_v36, %v382_v35 }
  0xf8   : > { %v566_v7 = vsel %vm357_vm3, %v565_v5, %v553_v0  ;;  %v540_v8 = vsel %vm357_vm3, %v539_v6, %v517_v4  ;;  %v393_v40 = vsel %vm355_vm2, %v392_v38, %v378_v37  ;;  %v752_v37 = vstv %s2723_s9  ;;  %s2737_s9 = sld [smem:[#allocation3 + $0xf]] }
  0xf9   : > { %572 = vrot.lane.b32.xlu1 %v566_v7, %s3065_s20  ;;  %v394_v41 = vsel %vm357_vm3, %v393_v40, %v381_v36  ;;  %vm2527_vm1 = vcmask 654336  }
  0xfa   : > { %v520_v9 = vpop.permute.xlu1 %519  ;;  %v523_v10 = vpop.permute.xlu0 %522 }
  0xfb   : > { %v541_v11 = vsel %vm180_vm0, %v540_v8, %v520_v9 }
  0xfc   : > { %v542_v12 = vsel %vm360_vm4, %v541_v11, %v523_v10 }
  0xfe   : > { %v526_v13 = vpop.permute.xlu1 %525  ;;  %v529_v15 = vpop.permute.xlu0 %528 }
  0xff   : > { %v543_v16 = vsel %vm362_vm5, %v542_v12, %v526_v13 }
 0x100   : > { %v3317_v17 = vsel %vm364_vm6, %v543_v16, %v529_v15 }
 0x101   : > { %v554_v18 = vrot.slane %v3317_v17, 5  ;;  %v558_v42 = vrot.slane %v3317_v17, 3  ;;  %v560_v43 = vrot.slane %v3317_v17, 1  ;;  %v562_v46 = vrot.slane %v3317_v17, 7 }
 0x103   : > { %v555_v20 = vsel %vm357_vm3, %v553_v0, %v554_v18  ;;  %v567_v44 = vsel %vm357_vm3, %v554_v18, %v558_v42 }
 0x104   : > { %583 = vrot.lane.b32.xlu1 %v555_v20, %s3066_s21  ;;  %574 = vrot.lane.b32.xlu0 %v555_v20, %s3065_s20  ;;  %v568_v45 = vsel %vm180_vm0, %v567_v44, %v560_v43  ;;  %v885_v44 = vstv %s3420_s12  ;;  %s3073_s12 = smov 124  }
 0x105   : > { %v569_v47 = vsel %vm360_vm4, %v568_v45, %v562_v46 }
 0x108   : > { %590 = vrot.lane.b32.xlu1 %v566_v7, %s3067_s26  ;;  %581 = vrot.lane.b32.xlu0 %v566_v7, %s3066_s21 }
 0x10c   : > { %601 = vrot.lane.b32.xlu1 %v555_v20, %s3068_s28  ;;  %592 = vrot.lane.b32.xlu0 %v555_v20, %s3067_s26 }
 0x110   : > { %608 = vrot.lane.b32.xlu1 %v566_v7, %s3069_s29  ;;  %599 = vrot.lane.b32.xlu0 %v566_v7, %s3068_s28 }
 0x114   : > { %619 = vrot.lane.b32.xlu1 %v555_v20, %s3070_s4  ;;  %610 = vrot.lane.b32.xlu0 %v555_v20, %s3069_s29 }
 0x118   : > { %626 = vrot.lane.b32.xlu1 %v566_v7, %s3071_s8  ;;  %617 = vrot.lane.b32.xlu0 %v566_v7, %s3070_s4 }
 0x11c   : > { %402 = vrot.lane.b32.xlu1 %v383_v39, %s3065_s20  ;;  %628 = vrot.lane.b32.xlu0 %v555_v20, %s3071_s8 }
 0x120   : > { %409 = vrot.lane.b32.xlu1 %v394_v41, %s3066_s21  ;;  %400 = vrot.lane.b32.xlu0 %v394_v41, %s3065_s20 }
 0x124   : > { %420 = vrot.lane.b32.xlu1 %v383_v39, %s3067_s26  ;;  %411 = vrot.lane.b32.xlu0 %v383_v39, %s3066_s21 }
 0x128   : > { %427 = vrot.lane.b32.xlu1 %v394_v41, %s3068_s28  ;;  %418 = vrot.lane.b32.xlu0 %v394_v41, %s3067_s26 }
 0x12c   : > { %438 = vrot.lane.b32.xlu1 %v383_v39, %s3069_s29  ;;  %429 = vrot.lane.b32.xlu0 %v383_v39, %s3068_s28 }
 0x130   : > { %445 = vrot.lane.b32.xlu1 %v394_v41, %s3070_s4  ;;  %436 = vrot.lane.b32.xlu0 %v394_v41, %s3069_s29 }
 0x134   : > { %456 = vrot.lane.b32.xlu1 %v383_v39, %s3071_s8  ;;  %447 = vrot.lane.b32.xlu0 %v383_v39, %s3070_s4 }
 0x138   : > { %576 = vrot.lane.b32.xlu1 %v569_v47, %s3065_s20  ;;  %454 = vrot.lane.b32.xlu0 %v394_v41, %s3071_s8 }
 0x13c   : > { %594 = vrot.lane.b32.xlu1 %v569_v47, %s3067_s26  ;;  %585 = vrot.lane.b32.xlu0 %v569_v47, %s3066_s21 }
 0x140   : > { %612 = vrot.lane.b32.xlu1 %v569_v47, %s3069_s29  ;;  %603 = vrot.lane.b32.xlu0 %v569_v47, %s3068_s28 }
 0x144   : > { %630 = vrot.lane.b32.xlu1 %v569_v47, %s3071_s8  ;;  %621 = vrot.lane.b32.xlu0 %v569_v47, %s3070_s4 }
 0x148   : > { %413 = vrot.lane.b32.xlu1 %v397_v53, %s3066_s21  ;;  %404 = vrot.lane.b32.xlu0 %v397_v53, %s3065_s20 }
 0x14c   : > { %431 = vrot.lane.b32.xlu1 %v397_v53, %s3068_s28  ;;  %422 = vrot.lane.b32.xlu0 %v397_v53, %s3067_s26  ;;  %s3426_s26 = sld [smem:[#allocation3 + $0x3]]  ;;  %s3436_s28 = sld [smem:[#allocation3 + $0x4]] }
 0x150   : > { %449 = vrot.lane.b32.xlu1 %v397_v53, %s3070_s4  ;;  %440 = vrot.lane.b32.xlu0 %v397_v53, %s3069_s29  ;;  %s3446_s29 = sld [smem:[#allocation3 + $0x5]]  ;;  %s3072_s4 = smov 126  }
 0x152   : > { %v1018_v50 = vstv %s3426_s26  ;;  %s2744_s26 = sld [smem:[#allocation3 + $0x16]] }
 0x154   : > { %458 = vrot.lane.b32.xlu0 %v397_v53, %s3071_s8  ;;  %s2730_s8 = sld [smem:[#allocation3 + $0x8]] }
 0x16b   : > { %v573_v54 = vpop.permute.xlu1 %572 }
 0x176   : > { %v575_v55 = vpop.permute.xlu0 %574  ;;  %v584_v56 = vpop.permute.xlu1 %583 }
 0x177   : > { %v636_v62 = vsel %vm463_vm7, %v575_v55, %v584_v56 }
 0x17a   : > { %v582_v57 = vpop.permute.xlu0 %581  ;;  %v591_v58 = vpop.permute.xlu1 %590 }
 0x17b   : > { %v635_v61 = vsel %vm463_vm7, %v573_v54, %v582_v57  ;;  %v1151_v57 = vstv %s3436_s28  ;;  %s3074_s28 = smov 123  }
 0x17c   : > { %v638_v63 = vsel %vm467_vm8, %v635_v61, %v591_v58 }
 0x17e   : > { %v593_v59 = vpop.permute.xlu0 %592  ;;  %v602_v60 = vpop.permute.xlu1 %601 }
 0x17f   : > { %v639_v2 = vsel %vm467_vm8, %v636_v62, %v593_v59 }
 0x180   : > { %v642_v5 = vsel %vm471_vm10, %v639_v2, %v602_v60 }
 0x182   : > { %v600_v0 = vpop.permute.xlu0 %599  ;;  %v609_v1 = vpop.permute.xlu1 %608 }
 0x183   : > { %v641_v3 = vsel %vm471_vm10, %v638_v63, %v600_v0  ;;  %v1284_v0 = vstv %s3446_s29  ;;  %s2751_s29 = sld [smem:[#allocation3 + $0x1d]] }
 0x184   : > { %v644_v4 = vsel %vm475_vm9, %v641_v3, %v609_v1 }
 0x186   : > { %v611_v6 = vpop.permute.xlu0 %610  ;;  %v620_v7 = vpop.permute.xlu1 %619 }
 0x187   : > { %v645_v8 = vsel %vm475_vm9, %v642_v5, %v611_v6 }
 0x188   : > { %v648_v9 = vsel %vm479_vm11, %v645_v8, %v620_v7 }
 0x18a   : > { %v618_v10 = vpop.permute.xlu0 %617  ;;  %v627_v11 = vpop.permute.xlu1 %626 }
 0x18b   : > { %v647_v12 = vsel %vm479_vm11, %v644_v4, %v618_v10  ;;  %v765_v4 = vstv %s2730_s8  ;;  %s2758_s8 = sld [smem:[#allocation3 + $0x24]] }
 0x18c   : > { %v3412_v13 = vsel %vm483_vm12, %v647_v12, %v627_v11  ;;  %v785_v11 = vstv %s2737_s9  ;;  %s2765_s9 = sld [smem:[#allocation3 + $0x2b]] }
 0x18e   : > { %v629_v15 = vpop.permute.xlu0 %628  ;;  %v403_v16 = vpop.permute.xlu1 %402 }
 0x18f   : > { %v3415_v17 = vsel %vm483_vm12, %v648_v9, %v629_v15 }
 0x192   : > { %v401_v18 = vpop.permute.xlu0 %400  ;;  %v410_v20 = vpop.permute.xlu1 %409 }
 0x193   : > { %v464_v19 = vsel %vm463_vm7, %v401_v18, %v410_v20 }
 0x196   : > { %v412_v21 = vpop.permute.xlu0 %411  ;;  %v421_v22 = vpop.permute.xlu1 %420 }
 0x197   : > { %v465_v26 = vsel %vm463_vm7, %v403_v16, %v412_v21 }
 0x198   : > { %v469_v27 = vsel %vm467_vm8, %v465_v26, %v421_v22 }
 0x19a   : > { %v419_v23 = vpop.permute.xlu0 %418  ;;  %v428_v24 = vpop.permute.xlu1 %427 }
 0x19b   : > { %v468_v30 = vsel %vm467_vm8, %v464_v19, %v419_v23 }
 0x19c   : > { %v472_v32 = vsel %vm471_vm10, %v468_v30, %v428_v24  ;;  %v805_v24 = vstv %s2744_s26  ;;  %s2731_s26 = sld [smem:[#allocation3 + $0x9]] }
 0x19e   : > { %v430_v14 = vpop.permute.xlu0 %429  ;;  %v439_v25 = vpop.permute.xlu1 %438 }
 0x19f   : > { %v473_v31 = vsel %vm471_vm10, %v469_v27, %v430_v14 }
 0x1a0   : > { %v477_v33 = vsel %vm475_vm9, %v473_v31, %v439_v25 }
 0x1a2   : > { %v437_v28 = vpop.permute.xlu0 %436  ;;  %v446_v29 = vpop.permute.xlu1 %445 }
 0x1a3   : > { %v476_v36 = vsel %vm475_vm9, %v472_v32, %v437_v28  ;;  %v825_v32 = vstv %s2751_s29  ;;  %s2738_s29 = sld [smem:[#allocation3 + $0x10]] }
 0x1a4   : > { %v480_v41 = vsel %vm479_vm11, %v476_v36, %v446_v29 }
 0x1a6   : > { %v448_v34 = vpop.permute.xlu0 %447  ;;  %v457_v35 = vpop.permute.xlu1 %456 }
 0x1a7   : > { %v481_v38 = vsel %vm479_vm11, %v477_v33, %v448_v34 }
 0x1a8   : > { %v3431_v39 = vsel %vm483_vm12, %v481_v38, %v457_v35 }
 0x1a9   : > { %v754_v40 = vmul.f32 %v752_v37, %v3431_v39  ;;  %v887_v47 = vmul.f32 %v885_v44, %v3431_v39  ;;  %v1020_v53 = vmul.f32 %v1018_v50, %v3431_v39  ;;  %v1153_v61 = vmul.f32 %v1151_v57, %v3431_v39 }
 0x1aa   : > { %v455_v42 = vpop.permute.xlu0 %454  ;;  %v577_v43 = vpop.permute.xlu1 %576  ;;  %v1286_v5 = vmul.f32 %v1284_v0, %v3431_v39  ;;  %v767_v9 = vmul.f32 %v765_v4, %v3431_v39  ;;  %v787_v23 = vmul.f32 %v785_v11, %v3431_v39  ;;  %v807_v31 = vmul.f32 %v805_v24, %v3431_v39 }
 0x1ab   : > { %v3439_v45 = vsel %vm483_vm12, %v480_v41, %v455_v42  ;;  %759 = vrot.lane.b32.xlu1 %v754_v40, %s3066_s21  ;;  %v827_v41 = vmul.f32 %v825_v32, %v3431_v39 }
 0x1ac   : > { %v753_v46 = vmul.f32 %v752_v37, %v3439_v45  ;;  %v886_v52 = vmul.f32 %v885_v44, %v3439_v45  ;;  %v1019_v60 = vmul.f32 %v1018_v50, %v3439_v45  ;;  %v1152_v3 = vmul.f32 %v1151_v57, %v3439_v45 }
 0x1ad   : > { %v766_v6 = vmul.f32 %v765_v4, %v3439_v45  ;;  %v1285_v10 = vmul.f32 %v1284_v0, %v3439_v45  ;;  %v786_v15 = vmul.f32 %v785_v11, %v3439_v45  ;;  %v773_v22 = vrot.slane %v767_v9, 1 }
 0x1ae   : > { %v586_v48 = vpop.permute.xlu0 %585  ;;  %757 = vrot.lane.b32.xlu0 %v753_v46, %s3066_s21  ;;  %v595_v49 = vpop.permute.xlu1 %594  ;;  %v806_v26 = vmul.f32 %v805_v24, %v3439_v45  ;;  %v793_v30 = vrot.slane %v787_v23, 2  ;;  %v826_v35 = vmul.f32 %v825_v32, %v3439_v45  ;;  %v813_v40 = vrot.slane %v807_v31, 3 }
 0x1af   : > { %v637_v51 = vsel %vm463_vm7, %v577_v43, %v586_v48  ;;  %892 = vrot.lane.b32.xlu1 %v887_v47, %s3072_s4  ;;  %v772_v12 = vrot.slane %v766_v6, 1  ;;  %v792_v25 = vrot.slane %v786_v15, 2  ;;  %v845_v44 = vstv %s2758_s8  ;;  %s2745_s8 = sld [smem:[#allocation3 + $0x17]] }
 0x1b0   : > { %v640_v54 = vsel %vm467_vm8, %v637_v51, %v595_v49  ;;  %v812_v34 = vrot.slane %v806_v26, 3  ;;  %v832_v47 = vrot.slane %v826_v35, 4  ;;  %v846_v48 = vmul.f32 %v845_v44, %v3439_v45 }
 0x1b1   : > { %v774_v14 = vsel %vm364_vm6, %v772_v12, %v773_v22  ;;  %v794_v33 = vsel %vm362_vm5, %v792_v25, %v793_v30  ;;  %v833_v50 = vrot.slane %v827_v41, 4  ;;  %v847_v51 = vmul.f32 %v845_v44, %v3431_v39 }
 0x1b2   : > { %v604_v55 = vpop.permute.xlu0 %603  ;;  %890 = vrot.lane.b32.xlu0 %v886_v52, %s3072_s4  ;;  %v613_v56 = vpop.permute.xlu1 %612  ;;  %v814_v46 = vsel %vm360_vm4, %v812_v34, %v813_v40  ;;  %v852_v57 = vrot.slane %v846_v48, 5  ;;  %v898_v0 = vstv %s2731_s26  ;;  %s2759_s26 = sld [smem:[#allocation3 + $0x25]] }
 0x1b3   : > { %v643_v58 = vsel %vm471_vm10, %v640_v54, %v604_v55  ;;  %1025 = vrot.lane.b32.xlu1 %v1020_v53, %s3065_s20  ;;  %v865_v55 = vstv %s2765_s9  ;;  %v900_v6 = vmul.f32 %v898_v0, %v3431_v39  ;;  %s2752_s9 = sld [smem:[#allocation3 + $0x1e]] }
 0x1b4   : > { %v646_v59 = vsel %vm475_vm9, %v643_v58, %v613_v56  ;;  %v834_v56 = vsel %vm180_vm0, %v832_v47, %v833_v50  ;;  %v866_v58 = vmul.f32 %v865_v55, %v3439_v45 }
 0x1b5   : > { %v938_v23 = vstv %s2745_s8  ;;  %s2732_s8 = sld [smem:[#allocation3 + $0xa]] }
 0x1b6   : > { %v622_v62 = vpop.permute.xlu0 %621  ;;  %1023 = vrot.lane.b32.xlu0 %v1019_v60, %s3065_s20  ;;  %v631_v63 = vpop.permute.xlu1 %630  ;;  %v867_v60 = vmul.f32 %v865_v55, %v3431_v39  ;;  %v939_v25 = vmul.f32 %v938_v23, %v3439_v45 }
 0x1b7   : > { %v649_v1 = vsel %vm479_vm11, %v646_v59, %v622_v62  ;;  %1158 = vrot.lane.b32.xlu1 %v1153_v61, %s3073_s12  ;;  %v853_v59 = vrot.slane %v847_v51, 5 }
 0x1b8   : > { %v3465_v2 = vsel %vm483_vm12, %v649_v1, %v631_v63  ;;  %v978_v41 = vstv %s2759_s26  ;;  %s2746_s26 = sld [smem:[#allocation3 + $0x18]] }
 0x1b9   : > { %v854_v1 = vsel %vm357_vm3, %v852_v57, %v853_v59  ;;  %v980_v47 = vmul.f32 %v978_v41, %v3431_v39 }
 0x1ba   : > { %v405_v7 = vpop.permute.xlu0 %404  ;;  %1156 = vrot.lane.b32.xlu0 %v1152_v3, %s3073_s12  ;;  %v414_v8 = vpop.permute.xlu1 %413  ;;  %v872_v3 = vrot.slane %v866_v58, 6 }
 0x1bb   : > { %1291 = vrot.lane.b32.xlu1 %v1286_v5, %s3074_s28  ;;  %v466_v16 = vsel %vm463_vm7, %v405_v7, %v414_v8  ;;  %v873_v5 = vrot.slane %v867_v60, 6  ;;  %v1031_v60 = vstv %s2732_s8  ;;  %s2760_s8 = sld [smem:[#allocation3 + $0x26]] }
 0x1be   : > { %v423_v18 = vpop.permute.xlu0 %422  ;;  %1289 = vrot.lane.b32.xlu0 %v1285_v10, %s3074_s28  ;;  %v432_v20 = vpop.permute.xlu1 %431  ;;  %v918_v10 = vstv %s2738_s29  ;;  %s2766_s29 = sld [smem:[#allocation3 + $0x2c]] }
 0x1bf   : > { %v470_v21 = vsel %vm467_vm8, %v466_v16, %v423_v18  ;;  %v919_v15 = vmul.f32 %v918_v10, %v3439_v45  ;;  %v906_v16 = vrot.slane %v900_v6, 1  ;;  %v920_v18 = vmul.f32 %v918_v10, %v3431_v39 }
 0x1c0   : > { %v474_v19 = vsel %vm471_vm10, %v470_v21, %v432_v20 }
 0x1c1   : > { %v926_v26 = vrot.slane %v920_v18, 2  ;;  %v1071_v18 = vstv %s2746_s26  ;;  %s2733_s26 = sld [smem:[#allocation3 + $0xb]] }
 0x1c2   : > { %v441_v27 = vpop.permute.xlu0 %440  ;;  %777 = vrot.lane.b32.xlu0 %v774_v14, %s3066_s21  ;;  %v450_v29 = vpop.permute.xlu1 %449  ;;  %v925_v14 = vrot.slane %v919_v15, 2 }
 0x1c3   : > { %v478_v28 = vsel %vm475_vm9, %v474_v19, %v441_v27  ;;  %v940_v19 = vmul.f32 %v938_v23, %v3431_v39 }
 0x1c4   : > { %v482_v37 = vsel %vm479_vm11, %v478_v28, %v450_v29  ;;  %v927_v31 = vsel %vm362_vm5, %v925_v14, %v926_v26  ;;  %v998_v51 = vstv %s2766_s29  ;;  %s2753_s29 = sld [smem:[#allocation3 + $0x1f]] }
 0x1c5   : > { %v946_v34 = vrot.slane %v940_v19, 3 }
 0x1c6   : > { %v459_v36 = vpop.permute.xlu0 %458  ;;  %797 = vrot.lane.b32.xlu0 %v794_v33, %s3066_s21 }
 0x1c7   : > { %v3490_v38 = vsel %vm483_vm12, %v482_v37, %v459_v36 }
 0x1c8   : > { %v768_v42 = vmul.f32 %v765_v4, %v3490_v38  ;;  %v788_v43 = vmul.f32 %v785_v11, %v3490_v38  ;;  %v808_v54 = vmul.f32 %v805_v24, %v3490_v38  ;;  %v828_v63 = vmul.f32 %v825_v32, %v3490_v38 }
 0x1c9   : > { %v899_v4 = vmul.f32 %v898_v0, %v3439_v45  ;;  %v848_v9 = vmul.f32 %v845_v44, %v3490_v38  ;;  %v874_v11 = vsel %vm355_vm2, %v872_v3, %v873_v5  ;;  %v901_v29 = vmul.f32 %v898_v0, %v3490_v38 }
 0x1ca   : > { %817 = vrot.lane.b32.xlu0 %v814_v46, %s3066_s21  ;;  %v775_v49 = vrot.slane %v768_v42, 1  ;;  %v795_v53 = vrot.slane %v788_v43, 2  ;;  %v815_v62 = vrot.slane %v808_v54, 3  ;;  %v835_v8 = vrot.slane %v828_v63, 4 }
 0x1cb   : > { %v905_v12 = vrot.slane %v899_v4, 1  ;;  %v855_v21 = vrot.slane %v848_v9, 5  ;;  %v945_v32 = vrot.slane %v939_v25, 3  ;;  %v908_v36 = vrot.slane %v901_v29, 1 }
 0x1cc   : > { %v776_v52 = vsel %vm364_vm6, %v773_v22, %v775_v49  ;;  %v796_v61 = vsel %vm362_vm5, %v793_v30, %v795_v53  ;;  %v816_v7 = vsel %vm360_vm4, %v813_v40, %v815_v62  ;;  %v836_v20 = vsel %vm180_vm0, %v833_v50, %v835_v8 }
 0x1cd   : > { %779 = vrot.lane.b32.xlu1 %v776_v52, %s3066_s21  ;;  %v868_v22 = vmul.f32 %v865_v55, %v3490_v38  ;;  %v907_v24 = vsel %vm364_vm6, %v905_v12, %v906_v16  ;;  %v856_v27 = vsel %vm357_vm3, %v853_v59, %v855_v21  ;;  %v958_v30 = vstv %s2752_s9  ;;  %s2739_s9 = sld [smem:[#allocation3 + $0x11]] }
 0x1ce   : > { %837 = vrot.lane.b32.xlu0 %v834_v56, %s3066_s21  ;;  %v959_v33 = vmul.f32 %v958_v30, %v3439_v45  ;;  %v960_v35 = vmul.f32 %v958_v30, %v3431_v39  ;;  %v921_v40 = vmul.f32 %v918_v10, %v3490_v38  ;;  %v947_v42 = vsel %vm360_vm4, %v945_v32, %v946_v34 }
 0x1cf   : > { %v875_v28 = vrot.slane %v868_v22, 6  ;;  %v979_v44 = vmul.f32 %v978_v41, %v3439_v45  ;;  %v909_v48 = vsel %vm364_vm6, %v906_v16, %v908_v36  ;;  %v941_v50 = vmul.f32 %v938_v23, %v3490_v38 }
 0x1d0   : > { %v965_v43 = vrot.slane %v959_v33, 4  ;;  %v966_v46 = vrot.slane %v960_v35, 4  ;;  %v928_v49 = vrot.slane %v921_v40, 2  ;;  %v999_v54 = vmul.f32 %v998_v51, %v3439_v45 }
 0x1d1   : > { %799 = vrot.lane.b32.xlu1 %v796_v61, %s3066_s21  ;;  %v876_v37 = vsel %vm355_vm2, %v873_v5, %v875_v28  ;;  %v985_v53 = vrot.slane %v979_v44, 5  ;;  %v986_v55 = vrot.slane %v980_v47, 5  ;;  %v1000_v56 = vmul.f32 %v998_v51, %v3431_v39 }
 0x1d2   : > { %857 = vrot.lane.b32.xlu0 %v854_v1, %s3066_s21  ;;  %v967_v52 = vsel %vm180_vm0, %v965_v43, %v966_v46  ;;  %v929_v57 = vsel %vm362_vm5, %v926_v26, %v928_v49  ;;  %v948_v58 = vrot.slane %v941_v50, 3  ;;  %v961_v59 = vmul.f32 %v958_v30, %v3490_v38 }
 0x1d3   : > { %v987_v61 = vsel %vm357_vm3, %v985_v53, %v986_v55  ;;  %v1005_v62 = vrot.slane %v999_v54, 6  ;;  %v1032_v63 = vmul.f32 %v1031_v60, %v3439_v45  ;;  %v1006_v0 = vrot.slane %v1000_v56, 6 }
 0x1d4   : > { %v1033_v1 = vmul.f32 %v1031_v60, %v3431_v39  ;;  %v949_v3 = vsel %vm360_vm4, %v946_v34, %v948_v58  ;;  %v968_v4 = vrot.slane %v961_v59, 4  ;;  %v981_v5 = vmul.f32 %v978_v41, %v3490_v38 }
 0x1d5   : > { %819 = vrot.lane.b32.xlu1 %v816_v7, %s3066_s21  ;;  %v1051_v6 = vstv %s2739_s9  ;;  %v1007_v7 = vsel %vm355_vm2, %v1005_v62, %v1006_v0  ;;  %v1038_v8 = vrot.slane %v1032_v63, 1  ;;  %v1001_v16 = vmul.f32 %v998_v51, %v3490_v38  ;;  %s2767_s9 = sld [smem:[#allocation3 + $0x2d]] }
 0x1d6   : > { %877 = vrot.lane.b32.xlu0 %v874_v11, %s3066_s21  ;;  %v1052_v9 = vmul.f32 %v1051_v6, %v3439_v45  ;;  %v1039_v10 = vrot.slane %v1033_v1, 1  ;;  %v1053_v11 = vmul.f32 %v1051_v6, %v3431_v39  ;;  %v969_v12 = vsel %vm180_vm0, %v966_v46, %v968_v4 }
 0x1d7   : > { %v988_v15 = vrot.slane %v981_v5, 5  ;;  %v1072_v22 = vmul.f32 %v1071_v18, %v3439_v45  ;;  %v1008_v25 = vrot.slane %v1001_v16, 6  ;;  %v1034_v26 = vmul.f32 %v1031_v60, %v3490_v38 }
 0x1d8   : > { %v1058_v21 = vrot.slane %v1052_v9, 2  ;;  %v1059_v23 = vrot.slane %v1053_v11, 2  ;;  %v1091_v19 = vstv %s2753_s29  ;;  %v1054_v34 = vmul.f32 %v1051_v6, %v3490_v38  ;;  %s2740_s29 = sld [smem:[#allocation3 + $0x12]] }
 0x1d9   : > { %839 = vrot.lane.b32.xlu1 %v836_v20, %s3066_s21  ;;  %v1040_v20 = vsel %vm364_vm6, %v1038_v8, %v1039_v10  ;;  %v989_v14 = vsel %vm357_vm3, %v986_v55, %v988_v15  ;;  %v1078_v28 = vrot.slane %v1072_v22, 3  ;;  %v1092_v29 = vmul.f32 %v1091_v19, %v3439_v45 }
 0x1da   : > { %910 = vrot.lane.b32.xlu0 %v907_v24, %s3072_s4  ;;  %v1073_v24 = vmul.f32 %v1071_v18, %v3431_v39  ;;  %v1009_v32 = vsel %vm355_vm2, %v1006_v0, %v1008_v25  ;;  %v1041_v33 = vrot.slane %v1034_v26, 1  ;;  %v1111_v35 = vstv %s2760_s8  ;;  %s2747_s8 = sld [smem:[#allocation3 + $0x19]] }
 0x1db   : > { %v1098_v36 = vrot.slane %v1092_v29, 4  ;;  %v1112_v40 = vmul.f32 %v1111_v35, %v3439_v45  ;;  %v1061_v44 = vrot.slane %v1054_v34, 2  ;;  %v1074_v46 = vmul.f32 %v1071_v18, %v3490_v38 }
 0x1dc   : > { %v1079_v30 = vrot.slane %v1073_v24, 3  ;;  %v1042_v43 = vsel %vm364_vm6, %v1039_v10, %v1041_v33  ;;  %v1131_v47 = vstv %s2767_s9  ;;  %v1094_v55 = vmul.f32 %v1091_v19, %v3490_v38  ;;  %s2754_s9 = sld [smem:[#allocation3 + $0x20]] }
 0x1dd   : > { %859 = vrot.lane.b32.xlu1 %v856_v27, %s3066_s21  ;;  %v1060_v27 = vsel %vm362_vm5, %v1058_v21, %v1059_v23  ;;  %v1118_v49 = vrot.slane %v1112_v40, 5  ;;  %v1132_v50 = vmul.f32 %v1131_v47, %v3439_v45  ;;  %v1062_v53 = vsel %vm362_vm5, %v1059_v23, %v1061_v44 }
 0x1de   : > { %930 = vrot.lane.b32.xlu0 %v927_v31, %s3072_s4  ;;  %v1093_v31 = vmul.f32 %v1091_v19, %v3431_v39  ;;  %v1081_v54 = vrot.slane %v1074_v46, 3  ;;  %v1164_v56 = vstv %s2733_s26  ;;  %v1101_v63 = vrot.slane %v1094_v55, 4  ;;  %s2761_s26 = sld [smem:[#allocation3 + $0x27]] }
 0x1df   : > { %v1138_v58 = vrot.slane %v1132_v50, 6  ;;  %v1165_v59 = vmul.f32 %v1164_v56, %v3439_v45  ;;  %v1114_v0 = vmul.f32 %v1111_v35, %v3490_v38  ;;  %v1184_v1 = vstv %s2740_s29  ;;  %s2768_s29 = sld [smem:[#allocation3 + $0x2e]] }
 0x1e0   : > { %v1099_v41 = vrot.slane %v1093_v31, 4  ;;  %v1082_v62 = vsel %vm360_vm4, %v1079_v30, %v1081_v54  ;;  %v1185_v5 = vmul.f32 %v1184_v1, %v3439_v45  ;;  %v1134_v10 = vmul.f32 %v1131_v47, %v3490_v38 }
 0x1e1   : > { %879 = vrot.lane.b32.xlu1 %v876_v37, %s3066_s21  ;;  %v1080_v37 = vsel %vm360_vm4, %v1078_v28, %v1079_v30  ;;  %v1171_v4 = vrot.slane %v1165_v59, 1  ;;  %v1121_v9 = vrot.slane %v1114_v0, 5  ;;  %v1204_v11 = vstv %s2747_s8  ;;  %s2734_s8 = sld [smem:[#allocation3 + $0xc]] }
 0x1e2   : > { %950 = vrot.lane.b32.xlu0 %v947_v42, %s3072_s4  ;;  %v1113_v42 = vmul.f32 %v1111_v35, %v3431_v39  ;;  %v1102_v8 = vsel %vm180_vm0, %v1099_v41, %v1101_v63  ;;  %v1191_v15 = vrot.slane %v1185_v5, 2  ;;  %v1205_v16 = vmul.f32 %v1204_v11, %v3439_v45 }
 0x1e3   : > { %v1141_v22 = vrot.slane %v1134_v10, 6  ;;  %v1167_v23 = vmul.f32 %v1164_v56, %v3490_v38  ;;  %v1224_v24 = vstv %s2754_s9  ;;  %v1187_v30 = vmul.f32 %v1184_v1, %v3490_v38  ;;  %s2741_s9 = sld [smem:[#allocation3 + $0x13]] }
 0x1e4   : > { %v1119_v51 = vrot.slane %v1113_v42, 5  ;;  %v1211_v25 = vrot.slane %v1205_v16, 3  ;;  %v1225_v26 = vmul.f32 %v1224_v24, %v3439_v45  ;;  %v1244_v31 = vstv %s2761_s26  ;;  %s2748_s26 = sld [smem:[#allocation3 + $0x1a]] }
 0x1e5   : > { %912 = vrot.lane.b32.xlu1 %v909_v48, %s3072_s4  ;;  %v1100_v48 = vsel %vm180_vm0, %v1098_v36, %v1099_v41  ;;  %v1174_v29 = vrot.slane %v1167_v23, 1  ;;  %v1245_v34 = vmul.f32 %v1244_v31, %v3439_v45  ;;  %v1194_v40 = vrot.slane %v1187_v30, 2 }
 0x1e6   : > { %970 = vrot.lane.b32.xlu0 %v967_v52, %s3072_s4  ;;  %v1133_v52 = vmul.f32 %v1131_v47, %v3431_v39  ;;  %v1122_v21 = vsel %vm357_vm3, %v1119_v51, %v1121_v9  ;;  %v1231_v33 = vrot.slane %v1225_v26, 4  ;;  %v1207_v41 = vmul.f32 %v1204_v11, %v3490_v38 }
 0x1e7   : > { %v1264_v42 = vstv %s2768_s29  ;;  %v1251_v44 = vrot.slane %v1245_v34, 5  ;;  %s2755_s29 = sld [smem:[#allocation3 + $0x21]] }
 0x1e8   : > { %v1139_v60 = vrot.slane %v1133_v52, 6  ;;  %v1265_v46 = vmul.f32 %v1264_v42, %v3439_v45  ;;  %v1214_v50 = vrot.slane %v1207_v41, 3  ;;  %v1297_v52 = vstv %s2734_s8  ;;  %s2762_s8 = sld [smem:[#allocation3 + $0x28]] }
 0x1e9   : > { %932 = vrot.lane.b32.xlu1 %v929_v57, %s3072_s4  ;;  %v1120_v57 = vsel %vm357_vm3, %v1118_v49, %v1119_v51  ;;  %v1227_v51 = vmul.f32 %v1224_v24, %v3490_v38  ;;  %v1298_v55 = vmul.f32 %v1297_v52, %v3439_v45 }
 0x1ea   : > { %990 = vrot.lane.b32.xlu0 %v987_v61, %s3072_s4  ;;  %v1166_v61 = vmul.f32 %v1164_v56, %v3431_v39  ;;  %v1142_v28 = vsel %vm355_vm2, %v1139_v60, %v1141_v22  ;;  %v1271_v54 = vrot.slane %v1265_v46, 6  ;;  %v1300_v22 = vmul.f32 %v1297_v52, %v3490_v38 }
 0x1eb   : > { %v1234_v59 = vrot.slane %v1227_v51, 4  ;;  %v1304_v63 = vrot.slane %v1298_v55, 1 }
 0x1ec   : > { %v1172_v6 = vrot.slane %v1166_v61, 1  ;;  %v1317_v61 = vstv %s2741_s9  ;;  %s2769_s9 = sld [smem:[#allocation3 + $0x2f]] }
 0x1ed   : > { %952 = vrot.lane.b32.xlu1 %v949_v3, %s3072_s4  ;;  %v1140_v3 = vsel %vm355_vm2, %v1138_v58, %v1139_v60  ;;  %v1247_v60 = vmul.f32 %v1244_v31, %v3490_v38  ;;  %v1318_v0 = vmul.f32 %v1317_v61, %v3439_v45  ;;  %v1357_v23 = vstv %s2755_s29  ;;  %s3690_s29 = sld [smem:[#allocation3 + $0x6]] }
 0x1ee   : > { %1010 = vrot.lane.b32.xlu0 %v1007_v7, %s3072_s4  ;;  %v1186_v7 = vmul.f32 %v1184_v1, %v3431_v39  ;;  %v1175_v36 = vsel %vm364_vm6, %v1172_v6, %v1174_v29  ;;  %v1307_v29 = vrot.slane %v1300_v22, 1  ;;  %v1320_v30 = vmul.f32 %v1317_v61, %v3490_v38 }
 0x1ef   : > { %v1324_v10 = vrot.slane %v1318_v0, 2  ;;  %v1360_v55 = vmul.f32 %v1357_v23, %v3490_v38 }
 0x1f0   : > { %v1192_v18 = vrot.slane %v1186_v7, 2  ;;  %v1267_v7 = vmul.f32 %v1264_v42, %v3490_v38 }
 0x1f1   : > { %972 = vrot.lane.b32.xlu1 %v969_v12, %s3072_s4  ;;  %v1173_v12 = vsel %vm364_vm6, %v1171_v4, %v1172_v6  ;;  %v1254_v6 = vrot.slane %v1247_v60, 5 }
 0x1f2   : > { %1043 = vrot.lane.b32.xlu0 %v1040_v20, %s3065_s20  ;;  %v1206_v20 = vmul.f32 %v1204_v11, %v3431_v39  ;;  %v1195_v49 = vsel %vm362_vm5, %v1192_v18, %v1194_v40 }
 0x1f4   : > { %v1212_v19 = vrot.slane %v1206_v20, 3 }
 0x1f5   : > { %992 = vrot.lane.b32.xlu1 %v989_v14, %s3072_s4  ;;  %v1193_v14 = vsel %vm362_vm5, %v1191_v15, %v1192_v18 }
 0x1f6   : > { %1063 = vrot.lane.b32.xlu0 %v1060_v27, %s3065_s20  ;;  %v1226_v27 = vmul.f32 %v1224_v24, %v3431_v39  ;;  %v1215_v58 = vsel %vm360_vm4, %v1212_v19, %v1214_v50 }
 0x1f8   : > { %v1232_v35 = vrot.slane %v1226_v27, 4 }
 0x1f9   : > { %1012 = vrot.lane.b32.xlu1 %v1009_v32, %s3072_s4  ;;  %v1213_v32 = vsel %vm360_vm4, %v1211_v25, %v1212_v19  ;;  %v1358_v25 = vmul.f32 %v1357_v23, %v3439_v45  ;;  %v1359_v19 = vmul.f32 %v1357_v23, %v3431_v39 }
 0x1fa   : > { %1083 = vrot.lane.b32.xlu0 %v1080_v37, %s3065_s20  ;;  %v1246_v37 = vmul.f32 %v1244_v31, %v3431_v39  ;;  %v1235_v5 = vsel %vm180_vm0, %v1232_v35, %v1234_v59  ;;  %v1377_v31 = vstv %s2762_s8  ;;  %s2742_s8 = sld [smem:[#allocation3 + $0x14]] }
 0x1fb   : > { %v1364_v34 = vrot.slane %v1358_v25, 4 }
 0x1fc   : > { %v1252_v47 = vrot.slane %v1246_v37, 5  ;;  %v1365_v37 = vrot.slane %v1359_v19, 4 }
 0x1fd   : > { %1045 = vrot.lane.b32.xlu1 %v1042_v43, %s3065_s20  ;;  %v1233_v43 = vsel %vm180_vm0, %v1231_v33, %v1232_v35  ;;  %v1378_v35 = vmul.f32 %v1377_v31, %v3439_v45 }
 0x1fe   : > { %1103 = vrot.lane.b32.xlu0 %v1100_v48, %s3065_s20  ;;  %v1266_v48 = vmul.f32 %v1264_v42, %v3431_v39  ;;  %v1255_v20 = vsel %vm357_vm3, %v1252_v47, %v1254_v6  ;;  %v1327_v42 = vrot.slane %v1320_v30, 2  ;;  %v1366_v46 = vsel %vm180_vm0, %v1364_v34, %v1365_v37 }
 0x1ff   : > { %v656_v34 = vstv %s3714_s11  ;;  %s3776_s11 = sld [smem:[#allocation3 + $0x32]] }
 0x200   : > { %v1272_v56 = vrot.slane %v1266_v48, 6 }
 0x201   : > { %1065 = vrot.lane.b32.xlu1 %v1062_v53, %s3065_s20  ;;  %v1253_v53 = vsel %vm357_vm3, %v1251_v44, %v1252_v47  ;;  %v1397_v44 = vstv %s2769_s9  ;;  %v1384_v47 = vrot.slane %v1378_v35, 5  ;;  %s2749_s9 = sld [smem:[#allocation3 + $0x1b]] }
 0x202   : > { %1123 = vrot.lane.b32.xlu0 %v1120_v57, %s3065_s20  ;;  %v1299_v57 = vmul.f32 %v1297_v52, %v3431_v39  ;;  %v1398_v48 = vmul.f32 %v1397_v44, %v3439_v45  ;;  %v3688_v51 = vmul.f32 %v1397_v44, %v3431_v39 }
 0x204   : > { %v1305_v1 = vrot.slane %v1299_v57, 1  ;;  %v1404_v57 = vrot.slane %v1398_v48, 6 }
 0x205   : > { %1085 = vrot.lane.b32.xlu1 %v1082_v62, %s3065_s20  ;;  %v1273_v62 = vsel %vm355_vm2, %v1271_v54, %v1272_v56 }
 0x206   : > { %1143 = vrot.lane.b32.xlu0 %v1140_v3, %s3065_s20  ;;  %v1319_v3 = vmul.f32 %v1317_v61, %v3431_v39  ;;  %v1306_v9 = vsel %vm364_vm6, %v1304_v63, %v1305_v1  ;;  %v1308_v41 = vsel %vm364_vm6, %v1305_v1, %v1307_v29  ;;  %v1367_v61 = vrot.slane %v1360_v55, 4 }
 0x208   : > { %v1325_v15 = vrot.slane %v1319_v3, 2 }
 0x209   : > { %1105 = vrot.lane.b32.xlu1 %v1102_v8, %s3065_s20  ;;  %v1337_v8 = vstv %s2748_s26  ;;  %s2735_s26 = sld [smem:[#allocation3 + $0xd]] }
 0x20a   : > { %1176 = vrot.lane.b32.xlu0 %v1173_v12, %s3073_s12  ;;  %v1338_v11 = vmul.f32 %v1337_v8, %v3439_v45  ;;  %v1339_v16 = vmul.f32 %v1337_v8, %v3431_v39  ;;  %v1326_v24 = vsel %vm362_vm5, %v1324_v10, %v1325_v15 }
 0x20c   : > { %v1345_v26 = vrot.slane %v1339_v16, 3 }
 0x20d   : > { %1125 = vrot.lane.b32.xlu1 %v1122_v21, %s3065_s20  ;;  %v1274_v21 = vrot.slane %v1267_v7, 6  ;;  %v1450_v7 = vstv %s2742_s8  ;;  %s3732_s8 = sld [smem:[#allocation3]] }
 0x20e   : > { %1196 = vrot.lane.b32.xlu0 %v1193_v14, %s3073_s12  ;;  %v1344_v14 = vrot.slane %v1338_v11, 3  ;;  %v3730_v23 = vmul.f32 %v1450_v7, %v3431_v39 }
 0x20f   : > { %v1430_v63 = vstv %s2735_s26  ;;  %s3721_s26 = sld [smem:[#allocation3 + $0x22]] }
 0x210   : > { %v1346_v33 = vsel %vm360_vm4, %v1344_v14, %v1345_v26  ;;  %v1431_v3 = vmul.f32 %v1430_v63, %v3439_v45  ;;  %v3712_v6 = vmul.f32 %v1430_v63, %v3431_v39 }
 0x211   : > { %1145 = vrot.lane.b32.xlu1 %v1142_v28, %s3065_s20  ;;  %v1275_v28 = vsel %vm355_vm2, %v1272_v56, %v1274_v21 }
 0x212   : > { %1216 = vrot.lane.b32.xlu0 %v1213_v32, %s3073_s12  ;;  %v1437_v16 = vrot.slane %v1431_v3, 1  ;;  %v1438_v22 = vrot.slane %v3712_v6, 1  ;;  %v3810_v3 = vstv %s3748_s15  ;;  %v659_v6 = vmul.f32 %v656_v34, %v3490_v38  ;;  %s3964_s15 = sld [smem:[#allocation3 + $0x55]] }
 0x214   : > { %v1439_v19 = vsel %vm364_vm6, %v1437_v16, %v1438_v22 }
 0x215   : > { %1178 = vrot.lane.b32.xlu1 %v1175_v36, %s3073_s12  ;;  %v1379_v36 = vmul.f32 %v1377_v31, %v3431_v39 }
 0x216   : > { %1236 = vrot.lane.b32.xlu0 %v1233_v43, %s3073_s12  ;;  %v1340_v43 = vmul.f32 %v1337_v8, %v3490_v38 }
 0x217   : > { %v1385_v50 = vrot.slane %v1379_v36, 5  ;;  %v1433_v36 = vmul.f32 %v1430_v63, %v3490_v38 }
 0x218   : > { %v1347_v54 = vrot.slane %v1340_v43, 3 }
 0x219   : > { %1198 = vrot.lane.b32.xlu1 %v1195_v49, %s3073_s12  ;;  %v1386_v56 = vsel %vm357_vm3, %v1384_v47, %v1385_v50  ;;  %v3779_v47 = vmul.f32 %v656_v34, %v3431_v39 }
 0x21a   : > { %1256 = vrot.lane.b32.xlu0 %v1253_v53, %s3073_s12  ;;  %v1328_v53 = vsel %vm362_vm5, %v1325_v15, %v1327_v42  ;;  %v1348_v60 = vsel %vm360_vm4, %v1345_v26, %v1347_v54  ;;  %v1400_v15 = vmul.f32 %v1397_v44, %v3490_v38  ;;  %v1470_v26 = vstv %s2749_s9  ;;  %s3759_s9 = sld [smem:[#allocation3 + $0x30]] }
 0x21b   : > { %v1471_v29 = vmul.f32 %v1470_v26, %v3439_v45  ;;  %v5044_v54 = vstv %s3732_s8 }
 0x21c   : > { %v1407_v25 = vrot.slane %v1400_v15, 6 }
 0x21d   : > { %1218 = vrot.lane.b32.xlu1 %v1215_v58, %s3073_s12  ;;  %v3654_v12 = vpop.permute.xlu1 %759  ;;  %v1405_v58 = vrot.slane %v3688_v51, 6  ;;  %v1477_v43 = vrot.slane %v1471_v29, 3  ;;  %v3840_v29 = vstv %s3767_s17  ;;  %s3998_s17 = sld [smem:[#allocation3 + $0x5c]] }
 0x21e   : > { %1276 = vrot.lane.b32.xlu0 %v1273_v62, %s3073_s12  ;;  %v1380_v62 = vmul.f32 %v1377_v31, %v3490_v38  ;;  %v1458_v31 = vrot.slane %v3730_v23, 2 }
 0x21f   : > { %v1406_v1 = vsel %vm355_vm2, %v1404_v57, %v1405_v58  ;;  %v1453_v57 = vmul.f32 %v1450_v7, %v3490_v38 }
 0x220   : > { %v3646_v4 = vpop.permute.xlu0 %757  ;;  %v1387_v11 = vrot.slane %v1380_v62, 5  ;;  %v3829_v16 = vstv %s3759_s9  ;;  %s4098_s9 = sld [smem:[#allocation3 + $0x41]] }
 0x221   : > { %1238 = vrot.lane.b32.xlu1 %v1235_v5, %s3073_s12  ;;  %v3670_v32 = vpop.permute.xlu1 %892  ;;  %v1417_v5 = vstv %s3690_s29  ;;  %s3075_s29 = smov 122  }
 0x222   : > { %1309 = vrot.lane.b32.xlu0 %v1306_v9, %s3074_s28  ;;  %v1368_v9 = vsel %vm180_vm0, %v1365_v37, %v1367_v61  ;;  %v1418_v10 = vmul.f32 %v1417_v5, %v3439_v45  ;;  %v1388_v14 = vsel %vm357_vm3, %v1385_v50, %v1387_v11  ;;  %v1408_v37 = vsel %vm355_vm2, %v1405_v58, %v1407_v25 }
 0x223   : > { %v1419_v50 = vmul.f32 %v1417_v5, %v3431_v39  ;;  %v3793_v58 = vstv %s3737_s13  ;;  %v3813_v5 = vstv %s3750_s18  ;;  %s3816_s13 = sld [smem:[#allocation3 + $0x40]]  ;;  %s4060_s18 = sld [smem:[#allocation3 + $0x33]] }
 0x224   : > { %v3657_v18 = vpop.permute.xlu0 %890  ;;  %v1511_v63 = vmul.f32 %v3793_v58, %v3439_v45  ;;  %v3826_v15 = vmul.f32 %v3793_v58, %v3431_v39 }
 0x225   : > { %1258 = vrot.lane.b32.xlu1 %v1255_v20, %s3073_s12  ;;  %v3685_v49 = vpop.permute.xlu1 %1025  ;;  %v1451_v20 = vmul.f32 %v1450_v7, %v3439_v45 }
 0x226   : > { %1329 = vrot.lane.b32.xlu0 %v1326_v24, %s3074_s28 }
 0x228   : > { %v3666_v27 = vpop.permute.xlu0 %1023 }
 0x229   : > { %1278 = vrot.lane.b32.xlu1 %v1275_v28, %s3073_s12  ;;  %v3704_v0 = vpop.permute.xlu1 %1158  ;;  %v1457_v28 = vrot.slane %v1451_v20, 2 }
 0x22a   : > { %1349 = vrot.lane.b32.xlu0 %v1346_v33, %s3074_s28  ;;  %5061 = vst [vmem:[#allocation16_spill] sm:$0xff] %v3704_v0  ;;  %v3757_v33 = vmul.f32 %v1470_v26, %v3431_v39  ;;  %v5065_v0 = vrot.slane %v3826_v15, 5 }
 0x22b   : > { %v1459_v42 = vsel %vm362_vm5, %v1457_v28, %v1458_v31  ;;  %v1473_v28 = vmul.f32 %v1470_v26, %v3490_v38 }
 0x22c   : > { %v3677_v40 = vpop.permute.xlu0 %1156  ;;  %v1478_v51 = vrot.slane %v3757_v33, 3 }
 0x22d   : > { %5059 = vst [vmem:[#allocation14_spill] sm:$0xff] %v3677_v40  ;;  %1311 = vrot.lane.b32.xlu1 %v1308_v41, %s3074_s28  ;;  %v3726_v21 = vpop.permute.xlu1 %1291  ;;  %v1490_v41 = vstv %s3721_s26  ;;  %s3804_s26 = sld [smem:[#allocation3 + $0x39]] }
 0x22e   : > { %1369 = vrot.lane.b32.xlu0 %v1366_v46, %s3074_s28  ;;  %5062 = vst [vmem:[#allocation17_spill] sm:$0xff] %v3726_v21  ;;  %v1491_v44 = vmul.f32 %v1490_v41, %v3439_v45  ;;  %v657_v46 = vmul.f32 %v656_v34, %v3439_v45  ;;  %v1479_v61 = vsel %vm360_vm4, %v1477_v43, %v1478_v51  ;;  %v5048_v43 = vstv %s3776_s11 }
 0x22f   : > { %v5045_v34 = vrot.slane %v3826_v15, 5 }
 0x230   : > { %v3692_v52 = vpop.permute.xlu0 %1289  ;;  %v1497_v62 = vrot.slane %v1491_v44, 4  ;;  %v663_v7 = vrot.slane %v657_v46, 1  ;;  %v654_v44 = vmul.f32 %v5044_v54, %v3439_v45 }
 0x231   : > { %5060 = vst [vmem:[#allocation15_spill] sm:$0xff] %v3692_v52  ;;  %1331 = vrot.lane.b32.xlu1 %v1328_v53, %s3074_s28  ;;  %v3786_v53 = vmul.f32 %v1490_v41, %v3431_v39 }
 0x232   : > { %1389 = vrot.lane.b32.xlu0 %v1386_v56, %s3074_s28  ;;  %v1440_v56 = vrot.slane %v1433_v36, 1  ;;  %v1517_v36 = vrot.slane %v1511_v63, 5  ;;  %v1493_v63 = vmul.f32 %v1490_v41, %v3490_v38 }
 0x233   : > { %v5046_v11 = vrot.slane %v3786_v53, 4  ;;  %v3881_v54 = vstv %s3804_s26  ;;  %s2801_s26 = sld [smem:[#allocation3 + $0x4f]] }
 0x234   : > { %v3700_v59 = vpop.permute.xlu0 %777  ;;  %v1441_v25 = vsel %vm364_vm6, %v1438_v22, %v1440_v56 }
 0x235   : > { %1351 = vrot.lane.b32.xlu1 %v1348_v60, %s3074_s28  ;;  %v3796_v60 = vstv %s3739_s16  ;;  %s3818_s16 = sld [smem:[#allocation3 + $0x47]] }
 0x236   : > { %1409 = vrot.lane.b32.xlu0 %v1406_v1, %s3074_s28  ;;  %v3807_v1 = vstv %s3741_s5  ;;  %v673_v20 = vmul.f32 %v3796_v60, %v3439_v45  ;;  %s3848_s5 = sld [smem:[#allocation3 + $0x4e]]  ;;  %v3853_v22 = vmul.f32 %v3796_v60, %v3431_v39  ;;  %v675_v33 = vmul.f32 %v3796_v60, %v3490_v38 }
 0x237   : > { %v689_v46 = vmul.f32 %v3807_v1, %v3439_v45  ;;  %v3886_v23 = vmul.f32 %v3807_v1, %v3431_v39  ;;  %v1665_v60 = vmul.f32 %v3881_v54, %v3412_v13 }
 0x238   : > { %v3716_v8 = vpop.permute.xlu0 %797  ;;  %v679_v56 = vrot.slane %v673_v20, 2  ;;  %v680_v20 = vrot.slane %v3853_v22, 2 }
 0x239   : > { %1371 = vrot.lane.b32.xlu1 %v1368_v9, %s3074_s28  ;;  %v664_v9 = vrot.slane %v3779_v47, 1 }
 0x23a   : > { %1422 = vrot.lane.b32.xlu0 %v1418_v10, %s3075_s29 }
 0x23b   : > { %v665_v26 = vsel %vm364_vm6, %v663_v7, %v664_v9  ;;  %v3893_v41 = vstv %s3818_s16  ;;  %s4186_s16 = sld [smem:[#allocation3 + $0x5d]] }
 0x23c   : > { %v3734_v24 = vpop.permute.xlu0 %817  ;;  %v670_v7 = vadd.f32 %v665_v26, %v654_v44  ;;  %v681_v26 = vsel %vm362_vm5, %v679_v56, %v680_v20  ;;  %v3914_v56 = vmul.f32 %v3881_v54, %v3415_v17 }
 0x23d   : > { %1391 = vrot.lane.b32.xlu1 %v1388_v14, %s3074_s28 }
 0x23e   : > { %1442 = vrot.lane.b32.xlu0 %v1439_v19, %s3075_s29  ;;  %v1460_v19 = vrot.slane %v1453_v57, 2 }
 0x23f   : > { %v3753_v30 = vpop.permute.xlu1 %779 }
 0x240   : > { %v3762_v35 = vpop.permute.xlu0 %837 }
 0x241   : > { %1411 = vrot.lane.b32.xlu1 %v1408_v37, %s3074_s28  ;;  %v1499_v37 = vsel %vm180_vm0, %v1497_v62, %v5046_v11  ;;  %v1480_v62 = vrot.slane %v1473_v28, 3  ;;  %v695_v28 = vrot.slane %v689_v46, 3  ;;  %v686_v46 = vadd.f32 %v681_v26, %v670_v7 }
 0x242   : > { %1462 = vrot.lane.b32.xlu0 %v1459_v42, %s3075_s29  ;;  %v1531_v42 = vmul.f32 %v3829_v16, %v3439_v45  ;;  %v3917_v11 = vstv %s3848_s5  ;;  %s4223_s5 = sld [smem:[#allocation3 + $0x3b]] }
 0x243   : > { %v3781_v48 = vpop.permute.xlu1 %799 }
 0x244   : > { %v3789_v55 = vpop.permute.xlu0 %857 }
 0x245   : > { %1424 = vrot.lane.b32.xlu1 %v1419_v50, %s3075_s29  ;;  %v3868_v50 = vmul.f32 %v3829_v16, %v3431_v39 }
 0x246   : > { %1482 = vrot.lane.b32.xlu0 %v1479_v61, %s3075_s29  ;;  %v1461_v61 = vsel %vm362_vm5, %v1458_v31, %v1460_v19  ;;  %v3890_v31 = vstv %s3816_s13  ;;  %v666_v19 = vrot.slane %v659_v6, 1  ;;  %v1513_v6 = vmul.f32 %v3793_v58, %v3490_v38  ;;  %s4167_s13 = sld [smem:[#allocation3 + $0x56]] }
 0x247   : > { %v3821_v10 = vpop.permute.xlu1 %819  ;;  %v5047_v22 = vrot.slane %v3868_v50, 6  ;;  %v3924_v58 = vmul.f32 %v3810_v3, %v3431_v39 }
 0x248   : > { %v3833_v14 = vpop.permute.xlu0 %877 }
 0x249   : > { %1444 = vrot.lane.b32.xlu1 %v1441_v25, %s3075_s29  ;;  %v1519_v25 = vsel %vm357_vm3, %v1517_v36, %v5045_v34  ;;  %v705_v36 = vmul.f32 %v3810_v3, %v3439_v45 }
 0x24a   : > { %1502 = vrot.lane.b32.xlu0 %v1499_v37, %s3075_s29  ;;  %v1537_v37 = vrot.slane %v1531_v42, 6 }
 0x24b   : > { %v3863_v47 = vpop.permute.xlu1 %839  ;;  %v711_v7 = vrot.slane %v705_v36, 4  ;;  %v5064_v36 = vstv %s3732_s8  ;;  %s4070_s8 = sld [smem:[#allocation3 + $0x3a]] }
 0x24c   : > { %v3870_v57 = vpop.permute.xlu0 %910  ;;  %v1539_v34 = vsel %vm355_vm2, %v1537_v37, %v5047_v22  ;;  %v721_v37 = vmul.f32 %v3813_v5, %v3439_v45  ;;  %v655_v21 = vmul.f32 %v5064_v36, %v3431_v39 }
 0x24d   : > { %1464 = vrot.lane.b32.xlu1 %v1461_v61, %s3075_s29  ;;  %v1481_v61 = vsel %vm360_vm4, %v1478_v51, %v1480_v62  ;;  %v5049_v51 = vrot.slane %v3886_v23, 3  ;;  %v1652_v62 = vmul.f32 %v5048_v43, %v3412_v13 }
 0x24e   : > { %1522 = vrot.lane.b32.xlu0 %v1519_v25, %s3075_s29  ;;  %v1500_v25 = vrot.slane %v1493_v63, 4  ;;  %v667_v63 = vsel %vm364_vm6, %v664_v9, %v666_v19  ;;  %v1520_v9 = vrot.slane %v1513_v6, 5  ;;  %v1533_v19 = vmul.f32 %v3829_v16, %v3490_v38 }
 0x24f   : > { %v3897_v42 = vpop.permute.xlu1 %859  ;;  %v1685_v16 = vmul.f32 %v3890_v31, %v3412_v13  ;;  %v691_v6 = vmul.f32 %v3807_v1, %v3490_v38 }
 0x250   : > { %v3901_v44 = vpop.permute.xlu0 %930 }
 0x251   : > { %1484 = vrot.lane.b32.xlu1 %v1481_v61, %s3075_s29  ;;  %v697_v61 = vsel %vm360_vm4, %v695_v28, %v5049_v51  ;;  %v3954_v28 = vmul.f32 %v3890_v31, %v3415_v17  ;;  %v682_v51 = vrot.slane %v675_v33, 2 }
 0x252   : > { %1542 = vrot.lane.b32.xlu0 %v1539_v34, %s3075_s29  ;;  %v5063_v34 = vrot.slane %v3786_v53, 4  ;;  %v702_v52 = vadd.f32 %v697_v61, %v686_v46  ;;  %v712_v53 = vrot.slane %v3924_v58, 4  ;;  %v737_v46 = vmul.f32 %v3840_v29, %v3439_v45 }
 0x253   : > { %v3933_v26 = vpop.permute.xlu1 %879  ;;  %v1671_v61 = vrot.slane %v1665_v60, 1  ;;  %v5066_v45 = vrot.slane %v3914_v56, 1  ;;  %v5050_v60 = vrot.slane %v3954_v28, 2 }
 0x254   : > { %v3940_v22 = vpop.permute.xlu0 %950  ;;  %v1501_v43 = vsel %vm180_vm0, %v5063_v34, %v1500_v25  ;;  %v3959_v25 = vmul.f32 %v3813_v5, %v3431_v39  ;;  %v713_v34 = vsel %vm180_vm0, %v711_v7, %v712_v53  ;;  %v3987_v7 = vmul.f32 %v3893_v41, %v3415_v17 }
 0x255   : > { %1504 = vrot.lane.b32.xlu1 %v1501_v43, %s3075_s29  ;;  %v671_v43 = vadd.f32 %v667_v63, %v655_v21  ;;  %v1521_v21 = vsel %vm357_vm3, %v5065_v0, %v1520_v9  ;;  %v1540_v63 = vrot.slane %v1533_v19, 6  ;;  %v718_v40 = vadd.f32 %v713_v34, %v702_v52 }
 0x256   : > { %1656 = vrot.lane.b32.xlu0 %v1652_v62, %s3066_s21  ;;  %v727_v62 = vrot.slane %v721_v37, 5  ;;  %v1673_v1 = vsel %vm364_vm6, %v1671_v61, %v5066_v45  ;;  %v683_v37 = vsel %vm362_vm5, %v680_v20, %v682_v51  ;;  %v5051_v15 = vrot.slane %v3959_v25, 5 }
 0x257   : > { %v3970_v33 = vpop.permute.xlu1 %912  ;;  %v3993_v0 = vmul.f32 %v3840_v29, %v3431_v39  ;;  %v1705_v52 = vmul.f32 %v3893_v41, %v3412_v13  ;;  %v687_v9 = vadd.f32 %v683_v37, %v671_v43  ;;  %v698_v19 = vrot.slane %v691_v6, 3 }
 0x258   : > { %v3975_v36 = vpop.permute.xlu0 %970  ;;  %v707_v61 = vmul.f32 %v3810_v3, %v3490_v38  ;;  %v1691_v20 = vrot.slane %v1685_v16, 2  ;;  %v729_v39 = vsel %vm357_vm3, %v727_v62, %v5051_v15  ;;  %v743_v51 = vrot.slane %v737_v46, 6 }
 0x259   : > { %1524 = vrot.lane.b32.xlu1 %v1521_v21, %s3075_s29  ;;  %v5067_v45 = vrot.slane %v3868_v50, 6  ;;  %v1667_v43 = vmul.f32 %v3881_v54, %v3465_v2  ;;  %v734_v3 = vadd.f32 %v729_v39, %v718_v40  ;;  %v1712_v6 = vrot.slane %v3987_v7, 3 }
 0x25a   : > { %1676 = vrot.lane.b32.xlu0 %v1673_v1, %s3066_s21  ;;  %v1693_v16 = vsel %vm362_vm5, %v1691_v20, %v5050_v60  ;;  %v4021_v46 = vmul.f32 %v3917_v11, %v3415_v17  ;;  %v744_v50 = vrot.slane %v3993_v0, 6  ;;  %v1711_v62 = vrot.slane %v1705_v52, 3 }
 0x25b   : > { %v4002_v34 = vpop.permute.xlu1 %932  ;;  %v1541_v1 = vsel %vm355_vm2, %v5067_v45, %v1540_v63  ;;  %v1725_v40 = vmul.f32 %v3917_v11, %v3412_v13  ;;  %v4028_v54 = vstv %s3964_s15  ;;  %v5068_v63 = vrot.slane %v3886_v23, 3  ;;  %s4242_s15 = sld [smem:[#allocation3 + $0x42]] }
 0x25c   : > { %v4007_v21 = vpop.permute.xlu0 %990  ;;  %v714_v20 = vrot.slane %v707_v61, 4  ;;  %v723_v39 = vmul.f32 %v3813_v5, %v3490_v38  ;;  %v5069_v0 = vstv %s3776_s11  ;;  %v1674_v15 = vrot.slane %v1667_v43, 1  ;;  %s4125_s11 = sld [smem:[#allocation3 + $0x48]] }
 0x25d   : > { %1544 = vrot.lane.b32.xlu1 %v1541_v1, %s3075_s29  ;;  %v699_v37 = vsel %vm360_vm4, %v5068_v63, %v698_v19  ;;  %v1653_v1 = vmul.f32 %v5069_v0, %v3415_v17  ;;  %v1687_v23 = vmul.f32 %v3890_v31, %v3465_v2  ;;  %v1713_v5 = vsel %vm360_vm4, %v1711_v62, %v1712_v6 }
 0x25e   : > { %1696 = vrot.lane.b32.xlu0 %v1693_v16, %s3066_s21  ;;  %v703_v52 = vadd.f32 %v699_v37, %v687_v9  ;;  %v745_v16 = vsel %vm355_vm2, %v743_v51, %v744_v50  ;;  %v1732_v61 = vrot.slane %v4021_v46, 4  ;;  %v4052_v9 = vmul.f32 %v4028_v54, %v3415_v17 }
 0x25f   : > { %v4035_v45 = vpop.permute.xlu1 %952  ;;  %v750_v19 = vadd.f32 %v745_v16, %v734_v3  ;;  %v1731_v51 = vrot.slane %v1725_v40, 4  ;;  %v1745_v43 = vmul.f32 %v4028_v54, %v3412_v13  ;;  %v4058_v31 = vstv %s3998_s17  ;;  %s4264_s17 = sld [smem:[#allocation3 + $0x49]] }
 0x260   : > { %v4041_v60 = vpop.permute.xlu0 %1010  ;;  %v715_v3 = vsel %vm180_vm0, %v712_v53, %v714_v20  ;;  %v730_v62 = vrot.slane %v723_v39, 5  ;;  %v739_v63 = vmul.f32 %v3840_v29, %v3490_v38  ;;  %v5070_v16 = vrot.slane %v3914_v56, 1 }
 0x261   : > { %1658 = vrot.lane.b32.xlu1 %v1653_v1, %s3066_s21  ;;  %v763_v37 = vadd.f32 %v3646_v4, %v750_v19  ;;  %v719_v40 = vadd.f32 %v715_v3, %v703_v52  ;;  %v1694_v58 = vrot.slane %v1687_v23, 2  ;;  %v1707_v53 = vmul.f32 %v3893_v41, %v3465_v2 }
 0x262   : > { %1716 = vrot.lane.b32.xlu0 %v1713_v5, %s3066_s21  ;;  %v1675_v5 = vsel %vm364_vm6, %v5070_v16, %v1674_v15  ;;  %v1733_v38 = vsel %vm180_vm0, %v1731_v51, %v1732_v61  ;;  %v1752_v4 = vrot.slane %v4052_v9, 5  ;;  %v4087_v29 = vmul.f32 %v4058_v31, %v3415_v17 }
 0x263   : > { %v4068_v0 = vpop.permute.xlu1 %972  ;;  %v783_v20 = vadd.f32 %v3700_v59, %v763_v37  ;;  %v1765_v56 = vmul.f32 %v4058_v31, %v3412_v13  ;;  %v5071_v41 = vrot.slane %v3959_v25, 5  ;;  %v746_v15 = vrot.slane %v739_v63, 6 }
 0x264   : > { %v4072_v1 = vpop.permute.xlu0 %1043  ;;  %v1751_v23 = vrot.slane %v1745_v43, 5  ;;  %v5072_v51 = vrot.slane %v3954_v28, 2  ;;  %v1714_v25 = vrot.slane %v1707_v53, 3  ;;  %v1772_v43 = vrot.slane %v4087_v29, 6 }
 0x265   : > { %1678 = vrot.lane.b32.xlu1 %v1675_v5, %s3066_s21  ;;  %v731_v59 = vsel %vm357_vm3, %v5071_v41, %v730_v62  ;;  %v803_v39 = vadd.f32 %v3716_v8, %v783_v20  ;;  %v1727_v62 = vmul.f32 %v3917_v11, %v3465_v2  ;;  %v1784_v37 = vstv %s4060_s18  ;;  %s4287_s18 = sld [smem:[#allocation3 + $0x50]] }
 0x266   : > { %1736 = vrot.lane.b32.xlu0 %v1733_v38, %s3066_s21  ;;  %v735_v19 = vadd.f32 %v731_v59, %v719_v40  ;;  %v1695_v3 = vsel %vm362_vm5, %v5072_v51, %v1694_v58  ;;  %v1753_v8 = vsel %vm357_vm3, %v1751_v23, %v1752_v4  ;;  %v747_v40 = vsel %vm355_vm2, %v744_v50, %v746_v15 }
 0x267   : > { %v4096_v52 = vpop.permute.xlu1 %992  ;;  %v823_v63 = vadd.f32 %v3734_v24, %v803_v39  ;;  %v1771_v5 = vrot.slane %v1765_v56, 6  ;;  %v1797_v11 = vstv %s4070_s8  ;;  %v1715_v53 = vsel %vm360_vm4, %v1712_v6, %v1714_v25  ;;  %s4305_s8 = sld [smem:[#allocation3 + $0x57]] }
 0x268   : > { %v4100_v9 = vpop.permute.xlu0 %1063  ;;  %v751_v58 = vadd.f32 %v747_v40, %v735_v19  ;;  %v1734_v20 = vrot.slane %v1727_v62, 4  ;;  %v1747_v38 = vmul.f32 %v4028_v54, %v3465_v2  ;;  %v4131_v29 = vmul.f32 %v1797_v11, %v3415_v17 }
 0x269   : > { %1698 = vrot.lane.b32.xlu1 %v1695_v3, %s3066_s21  ;;  %v843_v28 = vadd.f32 %v3762_v35, %v823_v63  ;;  %v1773_v50 = vsel %vm355_vm2, %v1771_v5, %v1772_v43  ;;  %v1785_v54 = vmul.f32 %v1784_v37, %v3412_v13  ;;  %v1817_v41 = vstv %s4098_s9  ;;  %s4319_s9 = sld [smem:[#allocation3 + $0x5e]] }
 0x26a   : > { %1756 = vrot.lane.b32.xlu0 %v1753_v8, %s3066_s21  ;;  %v764_v56 = vadd.f32 %v3654_v12, %v751_v58  ;;  %v1735_v12 = vsel %vm180_vm0, %v1732_v61, %v1734_v20  ;;  %v1754_v39 = vrot.slane %v1747_v38, 5  ;;  %v1805_v23 = vrot.slane %v4131_v29, 1 }
 0x26b   : > { %v4115_v16 = vpop.permute.xlu1 %1012  ;;  %v863_v35 = vadd.f32 %v3789_v55, %v843_v28  ;;  %v1798_v55 = vmul.f32 %v1797_v11, %v3412_v13  ;;  %v4154_v19 = vmul.f32 %v1817_v41, %v3415_v17  ;;  %v1818_v3 = vmul.f32 %v1817_v41, %v3412_v13 }
 0x26c   : > { %v4118_v24 = vpop.permute.xlu0 %1083  ;;  %v784_v59 = vadd.f32 %v3753_v30, %v764_v56  ;;  %v1755_v62 = vsel %vm357_vm3, %v1752_v4, %v1754_v39  ;;  %v1837_v8 = vstv %s4125_s11  ;;  %v1877_v39 = vstv %s4167_s13  ;;  %s4359_s11 = sld [smem:[#allocation3 + $0x43]]  ;;  %s4384_s13 = sld [smem:[#allocation3 + $0x4a]] }
 0x26d   : > { %1718 = vrot.lane.b32.xlu1 %v1715_v53, %s3066_s21  ;;  %v883_v7 = vadd.f32 %v3833_v14, %v863_v35  ;;  %v1767_v14 = vmul.f32 %v4058_v31, %v3465_v2  ;;  %v1804_v51 = vrot.slane %v1798_v55, 1  ;;  %v4173_v40 = vmul.f32 %v1837_v8, %v3415_v17 }
 0x26e   : > { %1776 = vrot.lane.b32.xlu0 %v1773_v50, %s3066_s21  ;;  %v804_v30 = vadd.f32 %v3781_v48, %v784_v59  ;;  %v1824_v5 = vrot.slane %v1818_v3, 2  ;;  %v1838_v58 = vmul.f32 %v1837_v8, %v3412_v13  ;;  %v1800_v35 = vmul.f32 %v1797_v11, %v3465_v2 }
 0x26f   : > { %v4136_v6 = vpop.permute.xlu1 %1045  ;;  %v896_v46 = vadd.f32 %v3657_v18, %v883_v7  ;;  %v1774_v63 = vrot.slane %v1767_v14, 6  ;;  %v1806_v48 = vsel %vm364_vm6, %v1804_v51, %v1805_v23  ;;  %v1825_v18 = vrot.slane %v4154_v19, 2 }
 0x270   : > { %v4144_v15 = vpop.permute.xlu0 %1103  ;;  %v824_v31 = vadd.f32 %v3821_v10, %v804_v30  ;;  %v1857_v50 = vstv %s2801_s26  ;;  %v1845_v29 = vrot.slane %v4173_v40, 3  ;;  %v1844_v7 = vrot.slane %v1838_v58, 3  ;;  %s4380_s26 = sld [smem:[#allocation3 + $0x35]] }
 0x271   : > { %1738 = vrot.lane.b32.xlu1 %v1735_v12, %s3066_s21  ;;  %v916_v10 = vadd.f32 %v3870_v57, %v896_v46  ;;  %v1775_v38 = vsel %vm355_vm2, %v1772_v43, %v1774_v63  ;;  %v1826_v57 = vsel %vm362_vm5, %v1824_v5, %v1825_v18  ;;  %v1807_v59 = vrot.slane %v1800_v35, 1 }
 0x272   : > { %1789 = vrot.lane.b32.xlu0 %v1785_v54, %s3072_s4  ;;  %v844_v28 = vadd.f32 %v3863_v47, %v824_v31  ;;  %v1858_v54 = vmul.f32 %v1857_v50, %v3412_v13  ;;  %v1820_v12 = vmul.f32 %v1817_v41, %v3465_v2 }
 0x273   : > { %v4159_v61 = vpop.permute.xlu1 %1065  ;;  %v936_v47 = vadd.f32 %v3901_v44, %v916_v10  ;;  %v1786_v44 = vmul.f32 %v1784_v37, %v3415_v17  ;;  %v4213_v37 = vmul.f32 %v1877_v39, %v3415_v17  ;;  %v1808_v3 = vsel %vm364_vm6, %v1805_v23, %v1807_v59 }
 0x274   : > { %v4163_v25 = vpop.permute.xlu0 %1123  ;;  %v864_v53 = vadd.f32 %v3897_v42, %v844_v28  ;;  %v4193_v42 = vmul.f32 %v1857_v50, %v3415_v17  ;;  %v1864_v46 = vrot.slane %v1858_v54, 4  ;;  %v1827_v31 = vrot.slane %v1820_v12, 2 }
 0x275   : > { %1758 = vrot.lane.b32.xlu1 %v1755_v62, %s3066_s21  ;;  %v956_v43 = vadd.f32 %v3940_v22, %v936_v47  ;;  %v1846_v22 = vsel %vm360_vm4, %v1844_v7, %v1845_v29  ;;  %v1897_v62 = vstv %s4186_s16  ;;  %v1880_v7 = vmul.f32 %v1877_v39, %v3465_v2  ;;  %s4412_s16 = sld [smem:[#allocation3 + $0x51]] }
 0x276   : > { %1809 = vrot.lane.b32.xlu0 %v1806_v48, %s3072_s4  ;;  %v884_v56 = vadd.f32 %v3933_v26, %v864_v53  ;;  %v1865_v14 = vrot.slane %v4193_v42, 4  ;;  %v1885_v48 = vrot.slane %v4213_v37, 5  ;;  %v4235_v40 = vmul.f32 %v1897_v62, %v3415_v17 }
 0x277   : > { %v4178_v4 = vpop.permute.xlu1 %1085  ;;  %v976_v26 = vadd.f32 %v3975_v36, %v956_v43  ;;  %v1878_v36 = vmul.f32 %v1877_v39, %v3412_v13  ;;  %v1828_v58 = vsel %vm362_vm5, %v1825_v18, %v1827_v31  ;;  %v1930_v18 = vstv %s4223_s5  ;;  %s4446_s5 = sld [smem:[#allocation3 + $0x5f]] }
 0x278   : > { %v4182_v20 = vpop.permute.xlu0 %1143  ;;  %v897_v19 = vadd.f32 %v3670_v32, %v884_v56  ;;  %v1840_v32 = vmul.f32 %v1837_v8, %v3465_v2  ;;  %v1898_v8 = vmul.f32 %v1897_v62, %v3412_v13  ;;  %v1905_v47 = vrot.slane %v4235_v40, 6 }
 0x279   : > { %1778 = vrot.lane.b32.xlu1 %v1775_v38, %s3066_s21  ;;  %v996_v30 = vadd.f32 %v4007_v21, %v976_v26  ;;  %s4221_s21 = sld [smem:[#allocation3 + $0x34]]  ;;  %v1866_v21 = vsel %vm180_vm0, %v1864_v46, %v1865_v14  ;;  %v1884_v10 = vrot.slane %v1878_v36, 5  ;;  %v4270_v59 = vmul.f32 %v1930_v18, %v3415_v17 }
 0x27a   : > { %1829 = vrot.lane.b32.xlu0 %v1826_v57, %s3072_s4  ;;  %v917_v28 = vadd.f32 %v3970_v33, %v897_v19  ;;  %v1847_v53 = vrot.slane %v1840_v32, 3  ;;  %v1860_v33 = vmul.f32 %v1857_v50, %v3465_v2  ;;  %v1904_v42 = vrot.slane %v1898_v8, 6 }
 0x27b   : > { %v4198_v11 = vpop.permute.xlu1 %1105  ;;  %v1016_v63 = vadd.f32 %v4041_v60, %v996_v30  ;;  %v1886_v35 = vsel %vm357_vm3, %v1884_v10, %v1885_v48  ;;  %v1950_v26 = vstv %s4242_s15  ;;  %v1887_v30 = vrot.slane %v1880_v7, 5  ;;  %s4458_s15 = sld [smem:[#allocation3 + $0x38]] }
 0x27c   : > { %v4204_v55 = vpop.permute.xlu0 %1176  ;;  %v937_v60 = vadd.f32 %v4002_v34, %v917_v28  ;;  %v1848_v43 = vsel %vm360_vm4, %v1845_v29, %v1847_v53  ;;  %v1906_v54 = vsel %vm355_vm2, %v1904_v42, %v1905_v47  ;;  %v1938_v46 = vrot.slane %v4270_v59, 1 }
 0x27d   : > { %1791 = vrot.lane.b32.xlu1 %v1786_v44, %s3072_s4  ;;  %v1029_v38 = vadd.f32 %v3666_v27, %v1016_v63  ;;  %v1867_v44 = vrot.slane %v1860_v33, 4  ;;  %v4293_v36 = vmul.f32 %v1950_v26, %v3415_v17  ;;  %v1951_v31 = vmul.f32 %v1950_v26, %v3412_v13 }
 0x27e   : > { %1849 = vrot.lane.b32.xlu0 %v1846_v22, %s3072_s4  ;;  %v957_v57 = vadd.f32 %v4035_v45, %v937_v60  ;;  %v1933_v33 = vmul.f32 %v1930_v18, %v3465_v2  ;;  %v2010_v59 = vstv %s4305_s8  ;;  %s4496_s8 = sld [smem:[#allocation3 + $0x46]] }
 0x27f   : > { %v4218_v41 = vpop.permute.xlu1 %1125  ;;  %v1917_v56 = vstv %s4221_s21  ;;  %v1049_v45 = vadd.f32 %v4072_v1, %v1029_v38  ;;  %v1931_v1 = vmul.f32 %v1930_v18, %v3412_v13  ;;  %v1868_v19 = vsel %vm180_vm0, %v1865_v14, %v1867_v44  ;;  %s4414_s21 = sld [smem:[#allocation3 + $0x58]] }
 0x280   : > { %v4225_v51 = vpop.permute.xlu0 %1196  ;;  %v977_v50 = vadd.f32 %v4068_v0, %v957_v57  ;;  %v1918_v39 = vmul.f32 %v1917_v56, %v3412_v13  ;;  %v1958_v28 = vrot.slane %v4293_v36, 2  ;;  %v1957_v8 = vrot.slane %v1951_v31, 2 }
 0x281   : > { %1811 = vrot.lane.b32.xlu1 %v1808_v3, %s3072_s4  ;;  %v1069_v29 = vadd.f32 %v4100_v9, %v1049_v45  ;;  %v1937_v3 = vrot.slane %v1931_v1, 1  ;;  %v1990_v38 = vstv %s4287_s18  ;;  %v1919_v18 = vmul.f32 %v1917_v56, %v3415_v17  ;;  %s4473_s18 = sld [smem:[#allocation3 + $0x3f]] }
 0x282   : > { %1869 = vrot.lane.b32.xlu0 %v1866_v21, %s3072_s4  ;;  %v997_v0 = vadd.f32 %v4096_v52, %v977_v50  ;;  %v1900_v52 = vmul.f32 %v1897_v62, %v3465_v2  ;;  %v1970_v21 = vstv %s4264_s17  ;;  %v4331_v57 = vmul.f32 %v1990_v38, %v3415_v17  ;;  %s4471_s17 = sld [smem:[#allocation3 + $0x31]] }
 0x283   : > { %v4239_v23 = vpop.permute.xlu1 %1145  ;;  %v1089_v9 = vadd.f32 %v4118_v24, %v1069_v29  ;;  %v1888_v24 = vsel %vm357_vm3, %v1885_v48, %v1887_v30  ;;  %v4312_v10 = vmul.f32 %v1970_v21, %v3415_v17  ;;  %v1971_v60 = vmul.f32 %v1970_v21, %v3412_v13 }
 0x284   : > { %v4245_v5 = vpop.permute.xlu0 %1216  ;;  %v1017_v22 = vadd.f32 %v4115_v16, %v997_v0  ;;  %v1907_v63 = vrot.slane %v1900_v52, 6  ;;  %v1991_v44 = vmul.f32 %v1990_v38, %v3412_v13  ;;  %v1998_v0 = vrot.slane %v4331_v57, 4 }
 0x285   : > { %1831 = vrot.lane.b32.xlu1 %v1828_v58, %s3072_s4  ;;  %v1109_v16 = vadd.f32 %v4144_v15, %v1089_v9  ;;  %v1939_v15 = vsel %vm364_vm6, %v1937_v3, %v1938_v46  ;;  %v4355_v29 = vmul.f32 %v2010_v59, %v3415_v17 }
 0x286   : > { %1889 = vrot.lane.b32.xlu0 %v1886_v35, %s3072_s4  ;;  %v1030_v32 = vadd.f32 %v3685_v49, %v1017_v22  ;;  %v1908_v53 = vsel %vm355_vm2, %v1905_v47, %v1907_v63  ;;  %v1978_v35 = vrot.slane %v4312_v10, 3  ;;  %v2011_v22 = vmul.f32 %v2010_v59, %v3412_v13 }
 0x287   : > { %v4255_v34 = vpop.permute.xlu1 %1178  ;;  %v1129_v40 = vadd.f32 %v4163_v25, %v1109_v16  ;;  %v2018_v3 = vrot.slane %v4355_v29, 5 }
 0x288   : > { %v4260_v27 = vpop.permute.xlu0 %1236  ;;  %v1050_v25 = vadd.f32 %v4136_v6, %v1030_v32  ;;  %v5073_v6 = vld [vmem:[#allocation14_spill] sm:$0xff]  ;;  %v2017_v32 = vrot.slane %v2011_v22, 5 }
 0x289   : > { %1851 = vrot.lane.b32.xlu1 %v1848_v43, %s3072_s4  ;;  %v1149_v49 = vadd.f32 %v4182_v20, %v1129_v40  ;;  %v1959_v20 = vsel %vm362_vm5, %v1957_v8, %v1958_v28  ;;  %v1977_v43 = vrot.slane %v1971_v60, 3 }
 0x28a   : > { %1909 = vrot.lane.b32.xlu0 %v1906_v54, %s3072_s4  ;;  %v1070_v42 = vadd.f32 %v4159_v61, %v1050_v25  ;;  %v1940_v54 = vrot.slane %v1933_v33, 1  ;;  %v1953_v61 = vmul.f32 %v1950_v26, %v3465_v2  ;;  %v1997_v26 = vrot.slane %v1991_v44, 4  ;;  %v5074_v25 = vld [vmem:[#allocation16_spill] sm:$0xff] }
 0x28b   : > { %v4275_v12 = vpop.permute.xlu1 %1198  ;;  %v1162_v50 = vadd.f32 %v5073_v6, %v1149_v49  ;;  %v1979_v56 = vsel %vm360_vm4, %v1977_v43, %v1978_v35  ;;  %v2050_v44 = vstv %s4380_s26  ;;  %s4598_s26 = sld [smem:[#allocation3 + $0x36]] }
 0x28c   : > { %v4283_v37 = vpop.permute.xlu0 %1256  ;;  %v1090_v7 = vadd.f32 %v4178_v4, %v1070_v42  ;;  %v1941_v9 = vsel %vm364_vm6, %v1938_v46, %v1940_v54  ;;  %v1960_v36 = vrot.slane %v1953_v61, 2  ;;  %v2103_v61 = vstv %s4384_s13  ;;  %s4611_s13 = sld [smem:[#allocation3 + $0x44]] }
 0x28d   : > { %1871 = vrot.lane.b32.xlu1 %v1868_v19, %s3072_s4  ;;  %v2030_v19 = vstv %s4319_s9  ;;  %v2051_v22 = vmul.f32 %v2050_v44, %v3412_v13  ;;  %v2104_v57 = vmul.f32 %v2103_v61, %v3412_v13  ;;  %s4498_s9 = sld [smem:[#allocation3 + $0x4d]] }
 0x28e   : > { %1922 = vrot.lane.b32.xlu0 %v1918_v39, %s3065_s20  ;;  %v1110_v4 = vadd.f32 %v4198_v11, %v1090_v7  ;;  %v1182_v39 = vadd.f32 %v4204_v55, %v1162_v50  ;;  %v1973_v11 = vmul.f32 %v1970_v21, %v3465_v2  ;;  %v1999_v55 = vsel %vm180_vm0, %v1997_v26, %v1998_v0 }
 0x28f   : > { %v4297_v14 = vpop.permute.xlu1 %1218  ;;  %v1961_v21 = vsel %vm362_vm5, %v1958_v28, %v1960_v36  ;;  %v2083_v28 = vstv %s4359_s11  ;;  %v2033_v10 = vmul.f32 %v2030_v19, %v3465_v2  ;;  %s4590_s11 = sld [smem:[#allocation3 + $0x3d]] }
 0x290   : > { %v4301_v62 = vpop.permute.xlu0 %1276  ;;  %v1130_v30 = vadd.f32 %v4218_v41, %v1110_v4  ;;  %v1202_v16 = vadd.f32 %v4225_v51, %v1182_v39  ;;  %v4378_v41 = vmul.f32 %v2030_v19, %v3415_v17  ;;  %v1980_v40 = vrot.slane %v1973_v11, 3 }
 0x291   : > { %1891 = vrot.lane.b32.xlu1 %v1888_v24, %s3072_s4  ;;  %v2031_v24 = vmul.f32 %v2030_v19, %v3412_v13  ;;  %v2085_v4 = vmul.f32 %v2083_v28, %v3415_v17  ;;  %v4444_v19 = vmul.f32 %v2103_v61, %v3415_v17  ;;  %v2040_v11 = vrot.slane %v2033_v10, 6 }
 0x292   : > { %1942 = vrot.lane.b32.xlu0 %v1939_v15, %s3065_s20  ;;  %v1150_v46 = vadd.f32 %v4239_v23, %v1130_v30  ;;  %v1222_v51 = vadd.f32 %v4245_v5, %v1202_v16  ;;  %v1993_v15 = vmul.f32 %v1990_v38, %v3465_v2  ;;  %v2019_v5 = vsel %vm357_vm3, %v2017_v32, %v2018_v3  ;;  %v5075_v30 = vld [vmem:[#allocation15_spill] sm:$0xff] }
 0x293   : > { %v4316_v48 = vpop.permute.xlu1 %1238  ;;  %v2038_v8 = vrot.slane %v4378_v41, 6  ;;  %v2037_v38 = vrot.slane %v2031_v24, 6  ;;  %v1981_v50 = vsel %vm360_vm4, %v1978_v35, %v1980_v40  ;;  %v2084_v35 = vmul.f32 %v2083_v28, %v3412_v13 }
 0x294   : > { %v4322_v58 = vpop.permute.xlu0 %1309  ;;  %v1242_v49 = vadd.f32 %v4260_v27, %v1222_v51  ;;  %v2091_v32 = vrot.slane %v2085_v4, 2  ;;  %v4466_v24 = vstv %s4412_s16  ;;  %v5076_v4 = vld [vmem:[#allocation17_spill] sm:$0xff]  ;;  %s4658_s16 = sld [smem:[#allocation3 + $0x4b]] }
 0x295   : > { %1911 = vrot.lane.b32.xlu1 %v1908_v53, %s3072_s4  ;;  %s4347_s4 = sld [smem:[#allocation3 + $0x3c]]  ;;  %v1163_v53 = vadd.f32 %v5074_v25, %v1150_v46  ;;  %v2039_v43 = vsel %vm355_vm2, %v2037_v38, %v2038_v8  ;;  %v2090_v16 = vrot.slane %v2084_v35, 2  ;;  %v4482_v29 = vmul.f32 %v4466_v24, %v3415_v17 }
 0x296   : > { %1962 = vrot.lane.b32.xlu0 %v1959_v20, %s3065_s20  ;;  %v1262_v33 = vadd.f32 %v4283_v37, %v1242_v49  ;;  %v2013_v20 = vmul.f32 %v2010_v59, %v3465_v2  ;;  %v2110_v49 = vrot.slane %v2104_v57, 3 }
 0x297   : > { %v4336_v47 = vpop.permute.xlu1 %1258  ;;  %v1183_v54 = vadd.f32 %v4255_v34, %v1163_v53  ;;  %v2124_v53 = vmul.f32 %v4466_v24, %v3412_v13 }
 0x298   : > { %v4343_v45 = vpop.permute.xlu0 %1329  ;;  %v1282_v37 = vadd.f32 %v4301_v62, %v1262_v33  ;;  %v2020_v62 = vrot.slane %v2013_v20, 5  ;;  %v2092_v20 = vsel %vm362_vm5, %v2090_v16, %v2091_v32 }
 0x299   : > { %1924 = vrot.lane.b32.xlu1 %v1919_v18, %s3065_s20  ;;  %v2000_v18 = vrot.slane %v1993_v15, 4  ;;  %v1203_v39 = vadd.f32 %v4275_v12, %v1183_v54  ;;  %v2052_v15 = vmul.f32 %v2050_v44, %v3415_v17  ;;  %v2130_v54 = vrot.slane %v2124_v53, 4 }
 0x29a   : > { %1982 = vrot.lane.b32.xlu0 %v1979_v56, %s3065_s20  ;;  %v2021_v51 = vsel %vm357_vm3, %v2018_v3, %v2020_v62 }
 0x29b   : > { %v4362_v1 = vpop.permute.xlu1 %1278  ;;  %v2063_v23 = vstv %s4347_s4  ;;  %v2001_v34 = vsel %vm180_vm0, %v1998_v0, %v2000_v18  ;;  %v1223_v36 = vadd.f32 %v4297_v14, %v1203_v39  ;;  %s4544_s4 = sld [smem:[#allocation3 + $0x5b]] }
 0x29c   : > { %v4367_v52 = vpop.permute.xlu0 %1349  ;;  %v4402_v60 = vmul.f32 %v2063_v23, %v3415_v17  ;;  %v2064_v42 = vmul.f32 %v2063_v23, %v3412_v13  ;;  %v2066_v0 = vmul.f32 %v2063_v23, %v3465_v2  ;;  %v2111_v23 = vrot.slane %v4444_v19, 3 }
 0x29d   : > { %1944 = vrot.lane.b32.xlu1 %v1941_v9, %s3065_s20  ;;  %v1295_v9 = vadd.f32 %v5075_v30, %v1282_v37  ;;  %v1243_v14 = vadd.f32 %v4316_v48, %v1223_v36  ;;  %v4566_v36 = vstv %s4496_s8  ;;  %s4832_s8 = sld [smem:[#allocation3 + $0x4c]] }
 0x29e   : > { %2002 = vrot.lane.b32.xlu0 %v1999_v55, %s3065_s20  ;;  %v2071_v7 = vrot.slane %v4402_v60, 1  ;;  %v2070_v56 = vrot.slane %v2064_v42, 1  ;;  %v2086_v55 = vmul.f32 %v2083_v28, %v3465_v2  ;;  %v2106_v42 = vmul.f32 %v2103_v61, %v3465_v2 }
 0x29f   : > { %v4387_v31 = vpop.permute.xlu1 %1311  ;;  %v1315_v3 = vadd.f32 %v4322_v58, %v1295_v9  ;;  %v1263_v48 = vadd.f32 %v4336_v47, %v1243_v14  ;;  %v2041_v47 = vsel %vm355_vm2, %v2038_v8, %v2040_v11  ;;  %v2112_v37 = vsel %vm360_vm4, %v2110_v49, %v2111_v23 }
 0x2a0   : > { %v4390_v63 = vpop.permute.xlu0 %1369  ;;  %v2072_v12 = vsel %vm364_vm6, %v2070_v56, %v2071_v7  ;;  %v2093_v28 = vrot.slane %v2086_v55, 2  ;;  %v4527_v61 = vstv %s4458_s15  ;;  %v2113_v60 = vrot.slane %v2106_v42, 3  ;;  %s4740_s15 = sld [smem:[#allocation3 + $0x60]] }
 0x2a1   : > { %1964 = vrot.lane.b32.xlu1 %v1961_v21, %s3065_s20  ;;  %v4469_v21 = vstv %s4414_s21  ;;  %v1335_v33 = vadd.f32 %v4343_v45, %v1315_v3  ;;  %v4512_v45 = vstv %s4446_s5  ;;  %v4536_v56 = vstv %s4473_s18  ;;  %s4682_s21 = sld [smem:[#allocation3 + $0x52]]  ;;  %s4715_s5 = sld [smem:[#allocation3 + $0x59]] }
 0x2a2   : > { %2022 = vrot.lane.b32.xlu0 %v2019_v5, %s3065_s20  ;;  %v2073_v5 = vrot.slane %v2066_v0, 1  ;;  %v4488_v25 = vmul.f32 %v4469_v21, %v3415_v17  ;;  %v2144_v58 = vmul.f32 %v4469_v21, %v3412_v13  ;;  %v2094_v10 = vsel %vm362_vm5, %v2091_v32, %v2093_v28  ;;  %s4812_s18 = sld [smem:[#allocation3 + $0x45]] }
 0x2a3   : > { %v4408_v27 = vpop.permute.xlu1 %1331  ;;  %v1355_v41 = vadd.f32 %v4367_v52, %v1335_v33  ;;  %v4548_v19 = vmul.f32 %v4527_v61, %v3415_v17  ;;  %v1556_v57 = vmul.f32 %v4527_v61, %v3412_v13  ;;  %v1572_v0 = vmul.f32 %v4536_v56, %v3412_v13 }
 0x2a4   : > { %v4416_v6 = vpop.permute.xlu0 %1389  ;;  %v2074_v8 = vsel %vm364_vm6, %v2071_v7, %v2073_v5  ;;  %v2151_v44 = vrot.slane %v4488_v25, 5  ;;  %v2150_v35 = vrot.slane %v2144_v58, 5  ;;  %v1550_v7 = vstv %s4471_s17  ;;  %s4791_s17 = sld [smem:[#allocation3 + $0x3e]] }
 0x2a5   : > { %1984 = vrot.lane.b32.xlu1 %v1981_v50, %s3065_s20  ;;  %v1283_v50 = vadd.f32 %v4362_v1, %v1263_v48  ;;  %v4522_v1 = vmul.f32 %v4512_v45, %v3415_v17  ;;  %v1375_v52 = vadd.f32 %v4390_v63, %v1355_v41  ;;  %v2164_v63 = vmul.f32 %v4512_v45, %v3412_v13 }
 0x2a6   : > { %2042 = vrot.lane.b32.xlu0 %v2039_v43, %s3065_s20  ;;  %v2131_v43 = vrot.slane %v4482_v29, 4  ;;  %v2152_v9 = vsel %vm357_vm3, %v2150_v35, %v2151_v44  ;;  %v4569_v11 = vstv %s4498_s9  ;;  %v4577_v32 = vmul.f32 %v4566_v36, %v3415_v17  ;;  %s2805_s9 = sld [smem:[#allocation3 + $0x53]] }
 0x2a7   : > { %v4433_v59 = vpop.permute.xlu1 %1351  ;;  %v1296_v39 = vadd.f32 %v5076_v4, %v1283_v50  ;;  %v1395_v30 = vadd.f32 %v4416_v6, %v1375_v52  ;;  %v4563_v6 = vmul.f32 %v4536_v56, %v3415_v17  ;;  %v4581_v14 = vmul.f32 %v4569_v11, %v3415_v17 }
 0x2a8   : > { %v4437_v26 = vpop.permute.xlu0 %1409  ;;  %v2170_v49 = vrot.slane %v2164_v63, 6  ;;  %v4587_v5 = vmul.f32 %v1550_v7, %v3412_v13  ;;  %v1562_v48 = vrot.slane %v1556_v57, 1  ;;  %v1588_v53 = vmul.f32 %v4566_v36, %v3412_v13 }
 0x2a9   : > { %2004 = vrot.lane.b32.xlu1 %v2001_v34, %s3065_s20  ;;  %v1415_v16 = vadd.f32 %v4437_v26, %v1395_v30  ;;  %v1563_v26 = vrot.slane %v4548_v19, 1  ;;  %v1578_v58 = vrot.slane %v1572_v0, 2  ;;  %v1579_v33 = vrot.slane %v4563_v6, 2 }
 0x2aa   : > { %2055 = vrot.lane.b32.xlu0 %v2051_v22, %s3073_s12  ;;  %v2132_v22 = vsel %vm180_vm0, %v2130_v54, %v2131_v43  ;;  %v1595_v42 = vrot.slane %v4577_v32, 3  ;;  %v1611_v50 = vrot.slane %v4581_v14, 4  ;;  %v4620_v54 = vstv %s4544_s4  ;;  %s4875_s4 = sld [smem:[#allocation3 + $0x61]] }
 0x2ab   : > { %v4460_v46 = vpop.permute.xlu1 %1371  ;;  %v1594_v52 = vrot.slane %v1588_v53, 3  ;;  %v1636_v30 = vmul.f32 %v4620_v54, %v3412_v13 }
 0x2ac   : > { %v4476_v40 = vpop.permute.xlu0 %1422 }
 0x2ad   : > { %2024 = vrot.lane.b32.xlu1 %v2021_v51, %s3065_s20  ;;  %v2114_v51 = vsel %vm360_vm4, %v2111_v23, %v2113_v60  ;;  %v1428_v23 = vadd.f32 %v4476_v40, %v1415_v16  ;;  %v2146_v16 = vmul.f32 %v4469_v21, %v3465_v2 }
 0x2ae   : > { %2075 = vrot.lane.b32.xlu0 %v2072_v12, %s3073_s12  ;;  %v2171_v12 = vrot.slane %v4522_v1, 6  ;;  %v4737_v1 = vmul.f32 %v4569_v11, %v3465_v2 }
 0x2af   : > { %v4501_v38 = vpop.permute.xlu1 %1391 }
 0x2b0   : > { %v1443_v18 = vpop.permute.xlu0 %1442  ;;  %v2172_v40 = vsel %vm355_vm2, %v2170_v49, %v2171_v12 }
 0x2b1   : > { %2044 = vrot.lane.b32.xlu1 %v2041_v47, %s3065_s20  ;;  %s4532_s20 = sld [smem:[#allocation3 + $0x54]]  ;;  %v1448_v47 = vadd.f32 %v1443_v18, %v1428_v23  ;;  %v2126_v18 = vmul.f32 %v4466_v24, %v3465_v2  ;;  %v2183_v23 = vstv %s4598_s26  ;;  %s5080_s26 = smov 80  }
 0x2b2   : > { %2095 = vrot.lane.b32.xlu0 %v2092_v20, %s3073_s12 }
 0x2b3   : > { %v4530_v62 = vpop.permute.xlu1 %1411  ;;  %v2133_v0 = vrot.slane %v2126_v18, 4 }
 0x2b4   : > { %v1463_v34 = vpop.permute.xlu0 %1462 }
 0x2b5   : > { %2057 = vrot.lane.b32.xlu1 %v2052_v15, %s3073_s12  ;;  %v1316_v15 = vadd.f32 %v4387_v31, %v1296_v39  ;;  %v1604_v31 = vmul.f32 %v4569_v11, %v3412_v13  ;;  %v1468_v35 = vadd.f32 %v1463_v34, %v1448_v47  ;;  %v4634_v39 = vsel %vm362_vm5, %v1578_v58, %v1579_v33 }
 0x2b6   : > { %2115 = vrot.lane.b32.xlu0 %v2112_v37, %s3073_s12 }
 0x2b7   : > { %v4572_v55 = vpop.permute.xlu1 %1424  ;;  %v1336_v28 = vadd.f32 %v4408_v27, %v1316_v15  ;;  %v4609_v37 = vstv %s4532_s20  ;;  %v1610_v60 = vrot.slane %v1604_v31, 4  ;;  %v2196_v15 = vstv %s4590_s11  ;;  %s4863_s20 = sld [smem:[#allocation3 + $0x5a]]  ;;  %s5079_s11 = smov 64  }
 0x2b8   : > { %v1483_v3 = vpop.permute.xlu0 %1482  ;;  %v1620_v24 = vmul.f32 %v4609_v37, %v3412_v13  ;;  %v2166_v31 = vmul.f32 %v4512_v45, %v3465_v2  ;;  %v2197_v47 = vmul.f32 %v2196_v15, %v3412_v13 }
 0x2b9   : > { %2077 = vrot.lane.b32.xlu1 %v2074_v8, %s3073_s12  ;;  %v1356_v27 = vadd.f32 %v4433_v59, %v1336_v28  ;;  %v4617_v8 = vsel %vm364_vm6, %v1562_v48, %v1563_v26  ;;  %v4627_v59 = vmul.f32 %v4609_v37, %v3415_v17  ;;  %v1488_v34 = vadd.f32 %v1483_v3, %v1468_v35 }
 0x2ba   : > { %2135 = vrot.lane.b32.xlu0 %v2132_v22, %s3073_s12  ;;  %v4650_v63 = vsel %vm180_vm0, %v1610_v60, %v1611_v50  ;;  %v4664_v48 = vmul.f32 %v2196_v15, %v3415_v17  ;;  %v1626_v53 = vrot.slane %v1620_v24, 5  ;;  %v2153_v35 = vrot.slane %v2146_v16, 5 }
 0x2bb   : > { %v1445_v20 = vpop.permute.xlu1 %1444  ;;  %v1376_v4 = vadd.f32 %v4460_v46, %v1356_v27  ;;  %v4645_v46 = vsel %vm360_vm4, %v1594_v52, %v1595_v42  ;;  %v1627_v49 = vrot.slane %v4627_v59, 5  ;;  %v4673_v27 = vstv %s4611_s13  ;;  %s5081_s13 = smov 96  }
 0x2bc   : > { %v1503_v41 = vpop.permute.xlu0 %1502  ;;  %v4691_v29 = vmul.f32 %v4673_v27, %v3415_v17  ;;  %v2217_v24 = vmul.f32 %v4673_v27, %v3412_v13  ;;  %v2329_v59 = vstv %s4791_s17  ;;  %s2832_s17 = sshll.u32 %s3132_s0, 5 }
 0x2bd   : > { %2097 = vrot.lane.b32.xlu1 %v2094_v10, %s3073_s12  ;;  %v4640_v10 = vmul.f32 %v4620_v54, %v3415_v17  ;;  %v1508_v3 = vadd.f32 %v1503_v41, %v1488_v34  ;;  %v1628_v45 = vsel %vm357_vm3, %v1626_v53, %v1627_v49  ;;  %v2236_v53 = vstv %s4658_s16  ;;  %s5082_s16 = smov 112  }
 0x2be   : > { %2155 = vrot.lane.b32.xlu0 %v2152_v9, %s3073_s12  ;;  %v1396_v9 = vadd.f32 %v4501_v38, %v1376_v4  ;;  %v2173_v4 = vrot.slane %v2166_v31, 6  ;;  %v4724_v25 = vmul.f32 %v2236_v53, %v3415_v17 }
 0x2bf   : > { %v1465_v22 = vpop.permute.xlu1 %1464  ;;  %v1643_v21 = vrot.slane %v4640_v10, 6 }
 0x2c0   : > { %v1523_v57 = vpop.permute.xlu0 %1522  ;;  %v1416_v38 = vadd.f32 %v4530_v62, %v1396_v9  ;;  %v2134_v62 = vsel %vm180_vm0, %v2131_v43, %v2133_v0  ;;  %v2203_v9 = vrot.slane %v2197_v47, 1  ;;  %v2237_v47 = vmul.f32 %v2236_v53, %v3412_v13 }
 0x2c1   : > { %2117 = vrot.lane.b32.xlu1 %v2114_v51, %s3073_s12  ;;  %v1528_v28 = vadd.f32 %v1523_v57, %v1508_v3  ;;  %v1642_v51 = vrot.slane %v1636_v30, 6  ;;  %v1552_v57 = vmul.f32 %v1550_v7, %v3415_v17  ;;  %v2154_v3 = vsel %vm357_vm3, %v2151_v44, %v2153_v35 }
 0x2c2   : > { %2175 = vrot.lane.b32.xlu0 %v2172_v40, %s3073_s12  ;;  %v1429_v41 = vadd.f32 %v4572_v55, %v1416_v38  ;;  %v2184_v40 = vmul.f32 %v2183_v23, %v3412_v13  ;;  %v2204_v55 = vrot.slane %v4664_v48, 1  ;;  %v1574_v38 = vmul.f32 %v4536_v56, %v3465_v2 }
 0x2c3   : > { %v1485_v58 = vpop.permute.xlu1 %1484  ;;  %v4696_v60 = vsel %vm355_vm2, %v1642_v51, %v1643_v21  ;;  %v2224_v7 = vrot.slane %v4691_v29, 2  ;;  %v2174_v56 = vsel %vm355_vm2, %v2171_v12, %v2173_v4  ;;  %v2256_v12 = vstv %s4682_s21  ;;  %s2831_s21 = sshll.u32 %s3132_s0, 7  ;;  %s4960_s0 = scalar_lea.hbm %s5029_s3, %s2832_s17 }
 0x2c4   : > { %v1543_v18 = vpop.permute.xlu0 %1542  ;;  %v1449_v43 = vadd.f32 %v1445_v20, %v1429_v41  ;;  %v1558_v20 = vmul.f32 %v4527_v61, %v3465_v2  ;;  %v2205_v61 = vsel %vm364_vm6, %v2203_v9, %v2204_v55  ;;  %v2199_v41 = vmul.f32 %v2196_v15, %v3465_v2 }
 0x2c5   : > { %v1548_v52 = vadd.f32 %v1543_v18, %v1528_v28  ;;  %2137 = vrot.lane.b32.xlu1 %v2134_v62, %s3073_s12  ;;  %v1581_v62 = vrot.slane %v1574_v38, 2  ;;  %v2244_v15 = vrot.slane %v4724_v25, 3  ;;  %v4761_v9 = vmul.f32 %v4620_v54, %v3465_v2 }
 0x2c6   : > { %2188 = vrot.lane.b32.xlu0 %v2184_v40, %s3074_s28  ;;  %v1469_v0 = vadd.f32 %v1465_v22, %v1449_v43  ;;  %v1590_v22 = vmul.f32 %v4566_v36, %v3465_v2  ;;  %v1565_v51 = vrot.slane %v1558_v20, 1  ;;  %v4749_v40 = vmul.f32 %v2256_v12, %v3415_v17 }
 0x2c7   : > { %v1553_v34 = vadd.f32 %v4587_v5, %v1548_v52  ;;  %v1505_v30 = vpop.permute.xlu1 %1504  ;;  %v1622_v52 = vmul.f32 %v4609_v37, %v3465_v2  ;;  %v2276_v37 = vstv %s4715_s5  ;;  %s5083_s5 = sshll.u32 %s3216_s10, 3 }
 0x2c8   : > { %v4707_v16 = vpop.permute.xlu0 %1656  ;;  %v1489_v44 = vadd.f32 %v1485_v58, %v1469_v0  ;;  %v1597_v11 = vrot.slane %v1590_v22, 3  ;;  %v1566_v54 = vsel %vm364_vm6, %v1563_v26, %v1565_v51  ;;  %v2277_v22 = vmul.f32 %v2276_v37, %v3412_v13 }
 0x2c9   : > { %v1569_v5 = vadd.f32 %v4617_v8, %v1553_v34  ;;  %2157 = vrot.lane.b32.xlu1 %v2154_v3, %s3073_s12  ;;  %v2223_v8 = vrot.slane %v2217_v24, 2  ;;  %v2243_v24 = vrot.slane %v2237_v47, 3  ;;  %v2206_v34 = vrot.slane %v2199_v41, 1 }
 0x2ca   : > { %2208 = vrot.lane.b32.xlu0 %v2205_v61, %s3074_s28  ;;  %v1509_v58 = vadd.f32 %v1505_v30, %v1489_v44  ;;  %v2257_v30 = vmul.f32 %v2256_v12, %v3412_v13  ;;  %v2219_v3 = vmul.f32 %v4673_v27, %v3465_v2  ;;  %v1582_v27 = vsel %vm362_vm5, %v1579_v33, %v1581_v62 }
 0x2cb   : > { %v1585_v31 = vadd.f32 %v4634_v39, %v1569_v5  ;;  %v1525_v28 = vpop.permute.xlu1 %1524  ;;  %v2225_v39 = vsel %vm362_vm5, %v2223_v8, %v2224_v7  ;;  %v4772_v5 = vmul.f32 %v2276_v37, %v3415_v17  ;;  %v2207_v8 = vsel %vm364_vm6, %v2204_v55, %v2206_v34 }
 0x2cc   : > { %v1677_v18 = vpop.permute.xlu0 %1676  ;;  %v1529_v35 = vadd.f32 %v1525_v28, %v1509_v58  ;;  %v2263_v19 = vrot.slane %v2257_v30, 4  ;;  %v2226_v33 = vrot.slane %v2219_v3, 2  ;;  %v1629_v51 = vrot.slane %v1622_v52, 5 }
 0x2cd   : > { %v1601_v36 = vadd.f32 %v4645_v46, %v1585_v31  ;;  %2177 = vrot.lane.b32.xlu1 %v2174_v56, %s3073_s12  ;;  %v2185_v46 = vmul.f32 %v2183_v23, %v3415_v17  ;;  %v2264_v23 = vrot.slane %v4749_v40, 4  ;;  %s4787_s12 = sld [smem:[#allocation3 + $0x37]]  ;;  %v2239_v31 = vmul.f32 %v2236_v53, %v3465_v2 }
 0x2ce   : > { %2228 = vrot.lane.b32.xlu0 %v2225_v39, %s3074_s28  ;;  %v2284_v55 = vrot.slane %v4772_v5, 5  ;;  %v1598_v53 = vsel %vm360_vm4, %v1595_v42, %v1597_v11  ;;  %v1645_v41 = vrot.slane %v4761_v9, 6  ;;  %v2283_v62 = vrot.slane %v2277_v22, 5 }
 0x2cf   : > { %v1617_v43 = vadd.f32 %v4650_v63, %v1601_v36  ;;  %v1545_v4 = vpop.permute.xlu1 %1544  ;;  %v2245_v63 = vsel %vm360_vm4, %v2243_v24, %v2244_v15  ;;  %v2265_v48 = vsel %vm180_vm0, %v2263_v19, %v2264_v23  ;;  %v2227_v32 = vsel %vm362_vm5, %v2224_v7, %v2226_v33 }
 0x2d0   : > { %v1549_v20 = vadd.f32 %v1545_v4, %v1529_v35  ;;  %v1697_v0 = vpop.permute.xlu0 %1696  ;;  %v2246_v35 = vrot.slane %v2239_v31, 3  ;;  %v2259_v42 = vmul.f32 %v2256_v12, %v3465_v2  ;;  %v2285_v29 = vsel %vm357_vm3, %v2283_v62, %v2284_v55 }
 0x2d1   : > { %v1633_v38 = vadd.f32 %v1628_v45, %v1617_v43  ;;  %2190 = vrot.lane.b32.xlu1 %v2185_v46, %s3074_s28  ;;  %v1613_v45 = vrot.slane %v4737_v1, 4  ;;  %v1630_v7 = vsel %vm357_vm3, %v1627_v49, %v1629_v51  ;;  %v2279_v4 = vmul.f32 %v2276_v37, %v3465_v2 }
 0x2d2   : > { %v1554_v61 = vadd.f32 %v1552_v57, %v1549_v20  ;;  %2248 = vrot.lane.b32.xlu0 %v2245_v63, %s3074_s28  ;;  %v2296_v57 = vstv %s4740_s15  ;;  %v2247_v30 = vsel %vm360_vm4, %v2244_v15, %v2246_v35  ;;  %v2266_v9 = vrot.slane %v2259_v42, 4  ;;  %s168_s15 = scalar_lea.vmem [#allocation7], %s5083_s5 }
 0x2d3   : > { %v1649_v44 = vadd.f32 %v4696_v60, %v1633_v38  ;;  %v1659_v56 = vpop.permute.xlu1 %1658  ;;  %v4800_v28 = vmul.f32 %v2296_v57, %v3415_v17  ;;  %v2297_v1 = vmul.f32 %v2296_v57, %v3412_v13  ;;  %v2316_v43 = vstv %s4787_s12  ;;  %s2597_s12 = sshll.u32 %s168_s15, 4  ;;  %s4955_s12 = int_to_ptr.vmem [resolvable:$true] %s2597_s12 }
 0x2d4   : > { %v1570_v6 = vadd.f32 %v1566_v54, %v1554_v61  ;;  %v1717_v26 = vpop.permute.xlu0 %1716  ;;  %v1646_v49 = vsel %vm355_vm2, %v1643_v21, %v1645_v41  ;;  %v4840_v3 = vmul.f32 %v2329_v59, %v3415_v17  ;;  %v2317_v38 = vmul.f32 %v2316_v43, %v3412_v13 }
 0x2d5   : > { %v1662_v60 = vadd.f32 %v4707_v16, %v1649_v44  ;;  %2210 = vrot.lane.b32.xlu1 %v2207_v8, %s3074_s28  ;;  %v2304_v52 = vrot.slane %v4800_v28, 6  ;;  %v2286_v10 = vrot.slane %v2279_v4, 5  ;;  %v2330_v21 = vmul.f32 %v2329_v59, %v3412_v13 }
 0x2d6   : > { %v1586_v47 = vadd.f32 %v1582_v27, %v1570_v6  ;;  %2268 = vrot.lane.b32.xlu0 %v2265_v48, %s3074_s28  ;;  %v2267_v27 = vsel %vm180_vm0, %v2264_v23, %v2266_v9  ;;  %v2349_v61 = vstv %s4812_s18  ;;  %v2337_v8 = vrot.slane %v4840_v3, 1 }
 0x2d7   : > { %v1682_v16 = vadd.f32 %v1677_v18, %v1662_v60  ;;  %v1679_v58 = vpop.permute.xlu1 %1678  ;;  %v1614_v18 = vsel %vm180_vm0, %v1611_v50, %v1613_v45  ;;  %v2303_v50 = vrot.slane %v2297_v1, 6  ;;  %v2299_v45 = vmul.f32 %v2296_v57, %v3465_v2 }
 0x2d8   : > { %v1602_v36 = vadd.f32 %v1598_v53, %v1586_v47  ;;  %v1737_v39 = vpop.permute.xlu0 %1736  ;;  %v4855_v19 = vmul.f32 %v2349_v61, %v3415_v17  ;;  %v2336_v40 = vrot.slane %v2330_v21, 1  ;;  %v2350_v23 = vmul.f32 %v2349_v61, %v3412_v13 }
 0x2d9   : > { %v1702_v11 = vadd.f32 %v1697_v0, %v1682_v16  ;;  %2230 = vrot.lane.b32.xlu1 %v2227_v32, %s3074_s28  ;;  %v2305_v0 = vsel %vm355_vm2, %v2303_v50, %v2304_v52  ;;  %v2287_v33 = vsel %vm357_vm3, %v2284_v55, %v2286_v10  ;;  %v2306_v31 = vrot.slane %v2299_v45, 6 }
 0x2da   : > { %v1618_v12 = vadd.f32 %v1614_v18, %v1602_v36  ;;  %2288 = vrot.lane.b32.xlu0 %v2285_v29, %s3074_s28  ;;  %v2369_v57 = vstv %s4832_s8  ;;  %v2338_v48 = vsel %vm364_vm6, %v2336_v40, %v2337_v8  ;;  %v2357_v28 = vrot.slane %v4855_v19, 2 }
 0x2db   : > { %v1722_v14 = vadd.f32 %v1717_v26, %v1702_v11  ;;  %v1699_v46 = vpop.permute.xlu1 %1698  ;;  %v4869_v53 = vmul.f32 %v2369_v57, %v3415_v17  ;;  %v2356_v47 = vrot.slane %v2350_v23, 2  ;;  %v2370_v55 = vmul.f32 %v2369_v57, %v3412_v13 }
 0x2dc   : > { %v1634_v24 = vadd.f32 %v1630_v7, %v1618_v12  ;;  %v1757_v34 = vpop.permute.xlu0 %1756  ;;  %v2332_v62 = vmul.f32 %v2329_v59, %v3465_v2  ;;  %v2389_v1 = vstv %s2805_s9  ;;  %v2318_v11 = vmul.f32 %v2316_v43, %v3415_v17 }
 0x2dd   : > { %v1742_v20 = vadd.f32 %v1737_v39, %v1722_v14  ;;  %2250 = vrot.lane.b32.xlu1 %v2247_v30, %s3074_s28  ;;  %v2358_v39 = vsel %vm362_vm5, %v2356_v47, %v2357_v28  ;;  %v2377_v32 = vrot.slane %v4869_v53, 3  ;;  %v2391_v35 = vmul.f32 %v2389_v1, %v3415_v17 }
 0x2de   : > { %v1650_v25 = vadd.f32 %v1646_v49, %v1634_v24  ;;  %2308 = vrot.lane.b32.xlu0 %v2305_v0, %s3074_s28  ;;  %v2376_v29 = vrot.slane %v2370_v55, 3  ;;  %v2352_v7 = vmul.f32 %v2349_v61, %v3465_v2  ;;  %v2409_v50 = vstv %s4863_s20 }
 0x2df   : > { %v1762_v15 = vadd.f32 %v1757_v34, %v1742_v20  ;;  %v1719_v37 = vpop.permute.xlu1 %1718  ;;  %v2397_v34 = vrot.slane %v2391_v35, 4  ;;  %v2411_v30 = vmul.f32 %v2409_v50, %v3415_v17  ;;  %v2410_v49 = vmul.f32 %v2409_v50, %v3412_v13 }
 0x2e0   : > { %v1663_v63 = vadd.f32 %v1659_v56, %v1650_v25  ;;  %v1777_v54 = vpop.permute.xlu0 %1776  ;;  %v2378_v24 = vsel %vm360_vm4, %v2376_v29, %v2377_v32  ;;  %v2359_v59 = vrot.slane %v2352_v7, 2  ;;  %v2372_v25 = vmul.f32 %v2369_v57, %v3465_v2 }
 0x2e1   : > { %v1782_v44 = vadd.f32 %v1777_v54, %v1762_v15  ;;  %2270 = vrot.lane.b32.xlu1 %v2267_v27, %s3074_s28  ;;  %v2429_v15 = vstv %s4875_s4  ;;  %s4952_s4 = scalar_lea.hbm %s5028_s2, %s2831_s21 }
 0x2e2   : > { %v1683_v22 = vadd.f32 %v1679_v58, %v1663_v63  ;;  %2321 = vrot.lane.b32.xlu0 %v2317_v38, %s3075_s29  ;;  %v2307_v58 = vsel %vm355_vm2, %v2304_v52, %v2306_v31  ;;  %v2390_v52 = vmul.f32 %v2389_v1, %v3412_v13  ;;  %v2417_v38 = vrot.slane %v2411_v30, 5 }
 0x2e3   : > { %v1739_v56 = vpop.permute.xlu1 %1738  ;;  %v2431_v10 = vmul.f32 %v2429_v15, %v3415_v17  ;;  %v2416_v63 = vrot.slane %v2410_v49, 5  ;;  %v2430_v54 = vmul.f32 %v2429_v15, %v3412_v13  ;;  %v2360_v61 = vsel %vm362_vm5, %v2357_v28, %v2359_v59 }
 0x2e4   : > { %v1703_v6 = vadd.f32 %v1699_v46, %v1683_v22  ;;  %v1790_v26 = vpop.permute.xlu0 %1789  ;;  %v2339_v46 = vrot.slane %v2332_v62, 1  ;;  %v2396_v9 = vrot.slane %v2390_v52, 4  ;;  %v2432_v28 = vmul.f32 %v2429_v15, %v3465_v2 }
 0x2e5   : > { %v1795_v60 = vadd.f32 %v1790_v26, %v1782_v44  ;;  %2290 = vrot.lane.b32.xlu1 %v2287_v33, %s3074_s28  ;;  %v2379_v44 = vrot.slane %v2372_v25, 3  ;;  %v2418_v19 = vsel %vm357_vm3, %v2416_v63, %v2417_v38  ;;  %v2437_v22 = vrot.slane %v2431_v10, 6 }
 0x2e6   : > { %v1723_v51 = vadd.f32 %v1719_v37, %v1703_v6  ;;  %2341 = vrot.lane.b32.xlu0 %v2338_v48, %s3075_s29  ;;  %v2340_v3 = vsel %vm364_vm6, %v2337_v8, %v2339_v46  ;;  %v2398_v37 = vsel %vm180_vm0, %v2396_v9, %v2397_v34  ;;  %v2392_v8 = vmul.f32 %v2389_v1, %v3465_v2 }
 0x2e7   : > { %v1759_v5 = vpop.permute.xlu1 %1758  ;;  %v2380_v13 = vsel %vm360_vm4, %v2377_v32, %v2379_v44  ;;  %v2412_v26 = vmul.f32 %v2409_v50, %v3465_v2  ;;  %v2439_v47 = vrot.slane %v2432_v28, 6 }
 0x2e8   : > { %v1743_v16 = vadd.f32 %v1739_v56, %v1723_v51  ;;  %v1810_v41 = vpop.permute.xlu0 %1809  ;;  %v2436_v56 = vrot.slane %v2430_v54, 6  ;;  %v2399_v6 = vrot.slane %v2392_v8, 4 }
 0x2e9   : > { %v1815_v36 = vadd.f32 %v1810_v41, %v1795_v60  ;;  %2310 = vrot.lane.b32.xlu1 %v2307_v58, %s3074_s28  ;;  %v2419_v48 = vrot.slane %v2412_v26, 5  ;;  %v2440_v41 = vsel %vm355_vm2, %v2437_v22, %v2439_v47  ;;  %s5077_s28 = smov 32  }
 0x2ea   : > { %v1763_v42 = vadd.f32 %v1759_v5, %v1743_v16  ;;  %2361 = vrot.lane.b32.xlu0 %v2358_v39, %s3075_s29  ;;  %v2438_v33 = vsel %vm355_vm2, %v2436_v56, %v2437_v22  ;;  %v2400_v60 = vsel %vm180_vm0, %v2397_v34, %v2399_v6  ;;  %vm2525_vm0 = vcmask 523264  }
 0x2eb   : > { %v1779_v18 = vpop.permute.xlu1 %1778  ;;  %v2420_v5 = vsel %vm357_vm3, %v2417_v38, %v2419_v48  ;;  %vm2529_vm2 = vcmask 785408   ;;  %vm2531_vm3 = vcmask 916480  }
 0x2ec   : > { %v1783_v12 = vadd.f32 %v1779_v18, %v1763_v42  ;;  %v1830_v14 = vpop.permute.xlu0 %1829 }
 0x2ed   : > { %v4888_v4 = vadd.f32 %v1830_v14, %v1815_v36  ;;  %2323 = vrot.lane.b32.xlu1 %v2318_v11, %s3075_s29 }
 0x2ee   : > { %2381 = vrot.lane.b32.xlu0 %v2378_v24, %s3075_s29 }
 0x2ef   : > { %v1792_v43 = vpop.permute.xlu1 %1791 }
 0x2f0   : > { %v1796_v20 = vadd.f32 %v1792_v43, %v1783_v12  ;;  %v4895_v0 = vpop.permute.xlu0 %1849 }
 0x2f1   : > { %2343 = vrot.lane.b32.xlu1 %v2340_v3, %s3075_s29  ;;  %v1855_v30 = vadd.f32 %v4895_v0, %v4888_v4 }
 0x2f2   : > { %2401 = vrot.lane.b32.xlu0 %v2398_v37, %s3075_s29 }
 0x2f3   : > { %v1812_v21 = vpop.permute.xlu1 %1811 }
 0x2f4   : > { %v1816_v27 = vadd.f32 %v1812_v21, %v1796_v20  ;;  %v1870_v45 = vpop.permute.xlu0 %1869 }
 0x2f5   : > { %2363 = vrot.lane.b32.xlu1 %v2360_v61, %s3075_s29  ;;  %v1875_v59 = vadd.f32 %v1870_v45, %v1855_v30 }
 0x2f6   : > { %2421 = vrot.lane.b32.xlu0 %v2418_v19, %s3075_s29 }
 0x2f7   : > { %v1832_v17 = vpop.permute.xlu1 %1831 }
 0x2f8   : > { %v1836_v40 = vadd.f32 %v1832_v17, %v1816_v27  ;;  %v1890_v23 = vpop.permute.xlu0 %1889 }
 0x2f9   : > { %2383 = vrot.lane.b32.xlu1 %v2380_v13, %s3075_s29  ;;  %v1895_v49 = vadd.f32 %v1890_v23, %v1875_v59 }
 0x2fa   : > { %2441 = vrot.lane.b32.xlu0 %v2438_v33, %s3075_s29 }
 0x2fb   : > { %v1852_v31 = vpop.permute.xlu1 %1851 }
 0x2fc   : > { %v1910_v57 = vpop.permute.xlu0 %1909  ;;  %v1856_v21 = vadd.f32 %v1852_v31, %v1836_v40 }
 0x2fd   : > { %2403 = vrot.lane.b32.xlu1 %v2400_v60, %s3075_s29  ;;  %v1915_v25 = vadd.f32 %v1910_v57, %v1895_v49 }
 0x2ff   : > { %v1872_v53 = vpop.permute.xlu1 %1871 }
 0x300   : > { %v1923_v51 = vpop.permute.xlu0 %1922  ;;  %v1876_v27 = vadd.f32 %v1872_v53, %v1856_v21 }
 0x301   : > { %2423 = vrot.lane.b32.xlu1 %v2420_v5, %s3075_s29  ;;  %v1928_v15 = vadd.f32 %v1923_v51, %v1915_v25 }
 0x303   : > { %v1892_v55 = vpop.permute.xlu1 %1891 }
 0x304   : > { %v1943_v16 = vpop.permute.xlu0 %1942  ;;  %v1896_v8 = vadd.f32 %v1892_v55, %v1876_v27 }
 0x305   : > { %2443 = vrot.lane.b32.xlu1 %v2440_v41, %s3075_s29  ;;  %v1948_v10 = vadd.f32 %v1943_v16, %v1928_v15  ;;  %s5078_s29 = smov 48  }
 0x307   : > { %v1912_v58 = vpop.permute.xlu1 %1911 }
 0x308   : > { %v1963_v62 = vpop.permute.xlu0 %1962  ;;  %v1916_v0 = vadd.f32 %v1912_v58, %v1896_v8 }
 0x309   : > { %v1968_v63 = vadd.f32 %v1963_v62, %v1948_v10 }
 0x30b   : > { %v1925_v1 = vpop.permute.xlu1 %1924 }
 0x30c   : > { %v1983_v36 = vpop.permute.xlu0 %1982  ;;  %v1929_v17 = vadd.f32 %v1925_v1, %v1916_v0 }
 0x30d   : > { %v1988_v44 = vadd.f32 %v1983_v36, %v1968_v63 }
 0x30f   : > { %v1945_v2 = vpop.permute.xlu1 %1944 }
 0x310   : > { %v2003_v39 = vpop.permute.xlu0 %2002  ;;  %v1949_v13 = vadd.f32 %v1945_v2, %v1929_v17 }
 0x311   : > { %v2008_v19 = vadd.f32 %v2003_v39, %v1988_v44 }
 0x313   : > { %v1965_v32 = vpop.permute.xlu1 %1964 }
 0x314   : > { %v2023_v35 = vpop.permute.xlu0 %2022  ;;  %v1969_v33 = vadd.f32 %v1965_v32, %v1949_v13 }
 0x315   : > { %v2028_v45 = vadd.f32 %v2023_v35, %v2008_v19 }
 0x317   : > { %v1985_v42 = vpop.permute.xlu1 %1984 }
 0x318   : > { %v2043_v18 = vpop.permute.xlu0 %2042  ;;  %v1989_v31 = vadd.f32 %v1985_v42, %v1969_v33 }
 0x319   : > { %v2048_v56 = vadd.f32 %v2043_v18, %v2028_v45 }
 0x31b   : > { %v2005_v11 = vpop.permute.xlu1 %2004 }
 0x31c   : > { %v2056_v29 = vpop.permute.xlu0 %2055  ;;  %v2009_v28 = vadd.f32 %v2005_v11, %v1989_v31 }
 0x31d   : > { %v2061_v26 = vadd.f32 %v2056_v29, %v2048_v56 }
 0x31f   : > { %v2025_v52 = vpop.permute.xlu1 %2024 }
 0x320   : > { %v2076_v7 = vpop.permute.xlu0 %2075  ;;  %v2029_v5 = vadd.f32 %v2025_v52, %v2009_v28 }
 0x321   : > { %v2081_v57 = vadd.f32 %v2076_v7, %v2061_v26 }
 0x323   : > { %v2045_v12 = vpop.permute.xlu1 %2044 }
 0x324   : > { %v2096_v14 = vpop.permute.xlu0 %2095  ;;  %v2049_v16 = vadd.f32 %v2045_v12, %v2029_v5 }
 0x325   : > { %v2101_v48 = vadd.f32 %v2096_v14, %v2081_v57 }
 0x327   : > { %v2058_v46 = vpop.permute.xlu1 %2057 }
 0x328   : > { %v2116_v50 = vpop.permute.xlu0 %2115  ;;  %v2062_v62 = vadd.f32 %v2058_v46, %v2049_v16 }
 0x329   : > { %v2121_v53 = vadd.f32 %v2116_v50, %v2101_v48 }
 0x32b   : > { %v2078_v24 = vpop.permute.xlu1 %2077 }
 0x32c   : > { %v2136_v34 = vpop.permute.xlu0 %2135  ;;  %v2082_v2 = vadd.f32 %v2078_v24, %v2062_v62 }
 0x32d   : > { %v2141_v55 = vadd.f32 %v2136_v34, %v2121_v53 }
 0x32f   : > { %v2098_v43 = vpop.permute.xlu1 %2097 }
 0x330   : > { %v2156_v9 = vpop.permute.xlu0 %2155  ;;  %v2102_v35 = vadd.f32 %v2098_v43, %v2082_v2 }
 0x331   : > { %v2161_v41 = vadd.f32 %v2156_v9, %v2141_v55 }
 0x333   : > { %v2118_v20 = vpop.permute.xlu1 %2117 }
 0x334   : > { %v2176_v3 = vpop.permute.xlu0 %2175  ;;  %v2122_v29 = vadd.f32 %v2118_v20, %v2102_v35 }
 0x335   : > { %v2181_v36 = vadd.f32 %v2176_v3, %v2161_v41 }
 0x337   : > { %v2138_v37 = vpop.permute.xlu1 %2137 }
 0x338   : > { %v2189_v38 = vpop.permute.xlu0 %2188  ;;  %v2142_v14 = vadd.f32 %v2138_v37, %v2122_v29 }
 0x339   : > { %v2194_v39 = vadd.f32 %v2189_v38, %v2181_v36 }
 0x33b   : > { %v2158_v54 = vpop.permute.xlu1 %2157 }
 0x33c   : > { %v2209_v61 = vpop.permute.xlu0 %2208  ;;  %v2162_v30 = vadd.f32 %v2158_v54, %v2142_v14 }
 0x33d   : > { %v2214_v42 = vadd.f32 %v2209_v61, %v2194_v39 }
 0x33f   : > { %v2178_v4 = vpop.permute.xlu1 %2177 }
 0x340   : > { %v2229_v22 = vpop.permute.xlu0 %2228  ;;  %v2182_v9 = vadd.f32 %v2178_v4, %v2162_v30 }
 0x341   : > { %v2234_v7 = vadd.f32 %v2229_v22, %v2214_v42 }
 0x343   : > { %v2191_v23 = vpop.permute.xlu1 %2190 }
 0x344   : > { %v2249_v6 = vpop.permute.xlu0 %2248  ;;  %v2195_v49 = vadd.f32 %v2191_v23, %v2182_v9 }
 0x345   : > { %v2254_v52 = vadd.f32 %v2249_v6, %v2234_v7 }
 0x347   : > { %v2211_v40 = vpop.permute.xlu1 %2210 }
 0x348   : > { %v2269_v60 = vpop.permute.xlu0 %2268  ;;  %v2215_v25 = vadd.f32 %v2211_v40, %v2195_v49 }
 0x349   : > { %v2274_v34 = vadd.f32 %v2269_v60, %v2254_v52 }
 0x34b   : > { %v2231_v51 = vpop.permute.xlu1 %2230 }
 0x34c   : > { %v2289_v47 = vpop.permute.xlu0 %2288  ;;  %v2235_v38 = vadd.f32 %v2231_v51, %v2215_v25  ;;  %v3076_v25 = vmov 1966171168  }
 0x34d   : > { %v2294_v46 = vadd.f32 %v2289_v47, %v2274_v34 }
 0x34f   : > { %v2251_v58 = vpop.permute.xlu1 %2250 }
 0x350   : > { %v2309_v1 = vpop.permute.xlu0 %2308  ;;  %v2255_v21 = vadd.f32 %v2251_v58, %v2235_v38 }
 0x351   : > { %v2314_v3 = vadd.f32 %v2309_v1, %v2294_v46 }
 0x353   : > { %v2271_v32 = vpop.permute.xlu1 %2270 }
 0x354   : > { %v2322_v18 = vpop.permute.xlu0 %2321  ;;  %v2275_v27 = vadd.f32 %v2271_v32, %v2255_v21 }
 0x355   : > { %v2327_v43 = vadd.f32 %v2322_v18, %v2314_v3  ;;  %v2546_v3 = vlaneseq }
 0x357   : > { %v2291_v11 = vpop.permute.xlu1 %2290  ;;  %vm2560_vm4 = vcmp.lt.s32.totalorder %v2546_v3, 256 }
 0x358   : > { %v2342_v50 = vpop.permute.xlu0 %2341  ;;  %v2295_v44 = vadd.f32 %v2291_v11, %v2275_v27 }
 0x359   : > { %v2347_v10 = vadd.f32 %v2342_v50, %v2327_v43 }
 0x35b   : > { %v2311_v12 = vpop.permute.xlu1 %2310 }
 0x35c   : > { %v2362_v59 = vpop.permute.xlu0 %2361  ;;  %v2315_v4 = vadd.f32 %v2311_v12, %v2295_v44 }
 0x35d   : > { %v2367_v37 = vadd.f32 %v2362_v59, %v2347_v10  ;;  %v2547_v10 = vshrl.u32 %v2546_v3, 7 }
 0x35f   : > { %v2324_v24 = vpop.permute.xlu1 %2323 }
 0x360   : > { %v2382_v15 = vpop.permute.xlu0 %2381  ;;  %v2328_v45 = vadd.f32 %v2324_v24, %v2315_v4 }
 0x361   : > { %v2387_v61 = vadd.f32 %v2382_v15, %v2367_v37  ;;  %v2544_v15 = vunpack.c.l.s4 %v3076_v25 }
 0x363   : > { %v2344_v20 = vpop.permute.xlu1 %2343 }
 0x364   : > { %v2402_v63 = vpop.permute.xlu0 %2401  ;;  %v2348_v23 = vadd.f32 %v2344_v20, %v2328_v45 }
 0x365   : > { %v2407_v19 = vadd.f32 %v2402_v63, %v2387_v61 }
 0x367   : > { %v2364_v54 = vpop.permute.xlu1 %2363 }
 0x368   : > { %v2422_v8 = vpop.permute.xlu0 %2421  ;;  %v2368_v26 = vadd.f32 %v2364_v54, %v2348_v23  ;;  %v2545_v54 = vunpack.c.0.s8 %v2544_v15 }
 0x369   : > { %v2427_v0 = vadd.f32 %v2422_v8, %v2407_v19 }
 0x36b   : > { %v2384_v22 = vpop.permute.xlu1 %2383 }
 0x36c   : > { %v2442_v17 = vpop.permute.xlu0 %2441  ;;  %v2388_v33 = vadd.f32 %v2384_v22, %v2368_v26 }
 0x36d   : > { %v2447_v56 = vadd.f32 %v2442_v17, %v2427_v0  ;;  %v2565_v0 = vsub.s32 0, %v2547_v10 }
 0x36f   : > { %v2820_v13 = vmul.f32 -1.442695, %v2447_v56  ;;  %v2404_v6 = vpop.permute.xlu1 %2403  ;;  %v2548_v56 = vsub.s32 %v2545_v54, %v2547_v10 }
 0x370   : > { %v2408_v40 = vadd.f32 %v2404_v6, %v2388_v33 }
 0x371   : > { %2905 = vpow2.f32 %v2820_v13 }
 0x373   : > { %v2424_v57 = vpop.permute.xlu1 %2423 }
 0x374   : > { %v2428_v31 = vadd.f32 %v2424_v57, %v2408_v40 }
 0x377   : > { %v2444_v60 = vpop.permute.xlu1 %2443 }
 0x378   : > { %v2448_v48 = vadd.f32 %v2444_v60, %v2428_v31  ;;  %v2913_v60 = vld [vmem:[%s3222_s14] sm:$0xff]  ;;  %s3077_s14 = smov [#allocation7]  }
 0x37a   : > { %v2821_v28 = vmul.f32 -1.442695, %v2448_v48 }
 0x37b   : > { %v2906_v53 = vpop.eup %2905 }
 0x37c   : > { %v2455_v51 = vadd.f32 1.0, %v2906_v53  ;;  %2907 = vpow2.f32 %v2821_v28 }
 0x37e   : > { %2909 = vrcp.f32 %v2455_v51 }
 0x386   : > { %v2908_v5 = vpop.eup %2907 }
 0x387   : > { %v2456_v47 = vadd.f32 1.0, %v2908_v5 }
 0x388   : > { %v2910_v55 = vpop.eup %2909 }
 0x389   : > { %2911 = vrcp.f32 %v2456_v47  ;;  %v2462_v16 = vrot.slane %v2910_v55, 1  ;;  %v2466_v41 = vrot.slane %v2910_v55, 2  ;;  %v2470_v58 = vrot.slane %v2910_v55, 3 }
 0x38a   : > { %v2474_v36 = vrot.slane %v2910_v55, 4  ;;  %v2478_v39 = vrot.slane %v2910_v55, 5  ;;  %v2482_v35 = vrot.slane %v2910_v55, 6  ;;  %v2486_v42 = vrot.slane %v2910_v55, 7 }
 0x38b   : > { %2463 = vrot.lane.b32.xlu0 %v2462_v16, %s3064_s19 }
 0x38f   : > { %2467 = vrot.lane.b32.xlu0 %v2466_v41, %s5077_s28 }
 0x393   : > { %v2912_v62 = vpop.eup %2911  ;;  %2471 = vrot.lane.b32.xlu0 %v2470_v58, %s5078_s29 }
 0x394   : > { %v2491_v1 = vrot.slane %v2912_v62, 1  ;;  %v2495_v2 = vrot.slane %v2912_v62, 2  ;;  %v2499_v32 = vrot.slane %v2912_v62, 3  ;;  %v2503_v18 = vrot.slane %v2912_v62, 4 }
 0x395   : > { %v2507_v29 = vrot.slane %v2912_v62, 5  ;;  %v2511_v7 = vrot.slane %v2912_v62, 6  ;;  %v2515_v11 = vrot.slane %v2912_v62, 7 }
 0x396   : > { %2492 = vrot.lane.b32.xlu1 %v2491_v1, %s3064_s19  ;;  %s2722_s19 = sshll.u32 %s3216_s10, 1 }
 0x397   : > { %2475 = vrot.lane.b32.xlu0 %v2474_v36, %s5079_s11  ;;  %s175_s18 = scalar_lea.vmem [#allocation8], %s2722_s19 }
 0x398   : > { %s2611_s8 = sshll.u32 %s175_s18, 4  ;;  %s4962_s8 = int_to_ptr.vmem [resolvable:$true] %s2611_s8 }
 0x39a   : > { %2496 = vrot.lane.b32.xlu1 %v2495_v2, %s5077_s28 }
 0x39b   : > { %2479 = vrot.lane.b32.xlu0 %v2478_v39, %s5080_s26 }
 0x39e   : > { %2500 = vrot.lane.b32.xlu1 %v2499_v32, %s5078_s29 }
 0x39f   : > { %2483 = vrot.lane.b32.xlu0 %v2482_v35, %s5081_s13 }
 0x3a2   : > { %2504 = vrot.lane.b32.xlu1 %v2503_v18, %s5079_s11  ;;  %s2578_s11 = scalar_lea.sflag [#allocation6], %s3216_s10 }
 0x3a3   : > { %2487 = vrot.lane.b32.xlu0 %v2486_v42, %s5082_s16 }
 0x3a6   : > { %2508 = vrot.lane.b32.xlu1 %v2507_v29, %s5080_s26  ;;  %s2954_s26 = scalar_lea.vmem %s4955_s12, 128 }
 0x3a7   : > { %p2955_p9 = scmp.ne.s32.totalorder %s4955_s12, %s2954_s26 }
 0x3a9   : > { %p2956_p1 = pnand %p2955_p9, %p5084_p0 }
 0x3aa   : > { %2512 = vrot.lane.b32.xlu1 %v2511_v7, %s5081_s13  ;;  %s2958_s13 = sshll.u32 %s3077_s14, 4  ;;  %s2959_s13 = int_to_ptr.vmem [resolvable:$false] %s2958_s13 }
 0x3ab   : > { %p2957_p2 = pneg %p2956_p1  ;;  %p2961_p10 = scmp.lt.s32.totalorder %s4955_s12, %s2959_s13 }
 0x3ae   : > { %2516 = vrot.lane.b32.xlu1 %v2515_v11, %s5082_s16  ;;  %s2960_s16 = scalar_lea.vmem %s2959_s13, 256 }
 0x3af   : > { %p2962_p13 = scmp.lt.s32.totalorder %s2960_s16, %s2954_s26 }
 0x3b1   : > { %p2963_p5 = por %p2962_p13, %p2961_p10 }
 0x3b3   : > { %p2964_p7 = pnand %p2963_p5, %p2957_p2 }
 0x3fd   : > { %v2464_v14 = vpop.permute.xlu0 %2463 }
 0x3fe   : > { %v2520_v43 = vsel %vm2519_vm13, %v2910_v55, %v2464_v14 }
 0x401   : > { %v2468_v50 = vpop.permute.xlu0 %2467 }
 0x402   : > { %v2522_v38 = vsel %vm2521_vm14, %v2520_v43, %v2468_v50 }
 0x405   : > { %v2472_v52 = vpop.permute.xlu0 %2471 }
 0x406   : > { %v2524_v20 = vsel %vm2523_vm15, %v2522_v38, %v2472_v52 }
 0x408   : > { %v2493_v30 = vpop.permute.xlu1 %2492 }
 0x409   : > { %v2476_v34 = vpop.permute.xlu0 %2475  ;;  %v2533_v21 = vsel %vm2519_vm13, %v2912_v62, %v2493_v30 }
 0x40a   : > { %v2526_v63 = vsel %vm2525_vm0, %v2524_v20, %v2476_v34 }
 0x40c   : > { %v2497_v12 = vpop.permute.xlu1 %2496 }
 0x40d   : > { %v2480_v9 = vpop.permute.xlu0 %2479  ;;  %v2534_v37 = vsel %vm2521_vm14, %v2533_v21, %v2497_v12 }
 0x40e   : > { %v2528_v44 = vsel %vm2527_vm1, %v2526_v63, %v2480_v9 }
 0x410   : > { %v2501_v59 = vpop.permute.xlu1 %2500 }
 0x411   : > { %v2484_v49 = vpop.permute.xlu0 %2483  ;;  %v2535_v8 = vsel %vm2523_vm15, %v2534_v37, %v2501_v59 }
 0x412   : > { %v2530_v19 = vsel %vm2529_vm2, %v2528_v44, %v2484_v49 }
 0x414   : > { %v2505_v46 = vpop.permute.xlu1 %2504 }
 0x415   : > { %v2488_v27 = vpop.permute.xlu0 %2487  ;;  %v2536_v4 = vsel %vm2525_vm0, %v2535_v8, %v2505_v46 }
 0x416   : > { %v2532_v22 = vsel %vm2531_vm3, %v2530_v19, %v2488_v27 }
 0x417   : > { %v2566_v6 = vrot.slane %v2532_v22, %v2565_v0 }
 0x418   : > { %v2509_v24 = vpop.permute.xlu1 %2508 }
 0x419   : > { %v2537_v45 = vsel %vm2527_vm1, %v2536_v4, %v2509_v24 }
 0x41c   : > { %v2513_v61 = vpop.permute.xlu1 %2512 }
 0x41d   : > { %v2538_v17 = vsel %vm2529_vm2, %v2537_v45, %v2513_v61 }
 0x420   : > { %v2517_v23 = vpop.permute.xlu1 %2516 }
 0x421   : > { %v2539_v13 = vsel %vm2531_vm3, %v2538_v17, %v2517_v23 }
 0x422   : > { %v2542_v26 = vcombine.low %v2532_v22, %v2539_v13  ;;  %v2570_v33 = vrot.slane %v2539_v13, %v2565_v0 }
 0x424   : > { %v2549_v57 = vrot.slane %v2542_v26, %v2548_v56  ;;  %v2573_v40 = vcombine.low %v2566_v6, %v2570_v33 }
 0x426   : > { %v2556_v31 = vrot.slane %v2549_v57, %v2548_v56  ;;  %v2575_v48 = vmul.f32 %v2913_v60, %v2573_v40 }
 0x428   : > { %2576 = vst [vmem:[%s168_s15] sm:$0xff] %v2575_v48  ;;  %2562 = vst.msk [vmem:[%s175_s18] sm:$0x3] %vm2560_vm4, %v2556_v31 }
 0x429   : > { %2967 = shalt.err (!%p2964_p7)
}
 0x42a   : > { %s2968_s19 = scalar_lea.hbm %s4952_s4, 128  ;;  %s2972_s15 = scalar_lea.hbm %s5028_s2, 256 }
 0x42b   : > { %p2969_p8 = scmp.ne.s32.totalorder %s4952_s4, %s2968_s19  ;;  %p2973_p3 = scmp.lt.u32.totalorder %s4952_s4, %s5028_s2 }
 0x42c   : > { %p2974_p4 = scmp.lt.u32.totalorder %s2972_s15, %s2968_s19  ;;  %p2976_p9 = scmp.lt.u32.totalorder %s2968_s19, %s4952_s4 }
 0x42d   : > { %p2970_p11 = pnand %p2969_p8, %p5084_p0 }
 0x42e   : > { %p2975_p6 = por %p2974_p4, %p2973_p3 }
 0x42f   : > { %p2971_p12 = pneg %p2970_p11 }
 0x430   : > { %p2977_p1 = por %p2976_p9, %p2975_p6 }
 0x432   : > { %p2978_p2 = pnand %p2977_p1, %p2971_p12 }
 0x434   : > { %2981 = shalt.err (!%p2978_p2)
}
 0x435   : > { %2835 = dma.vmem_to_hbm [thread:$0]  (%p5084_p0), %s4955_s12, 128, %s4952_s4, %s2578_s11  }
 0x436   : > { %s2583_s9 = scalar_lea.sflag [#allocation9], %s3216_s10  ;;  %s2982_s20 = scalar_lea.vmem %s4962_s8, 32 }
 0x437   : > { %p2983_p10 = scmp.ne.s32.totalorder %s4962_s8, %s2982_s20  ;;  %s3078_s28 = smov [#allocation8]  }
 0x438   : > { %s2986_s29 = sshll.u32 %s3078_s28, 4  ;;  %s2987_s29 = int_to_ptr.vmem [resolvable:$false] %s2986_s29 }
 0x439   : > { %p2984_p13 = pnand %p2983_p10, %p5084_p0  ;;  %s2988_s26 = scalar_lea.vmem %s2987_s29, 64 }
 0x43a   : > { %p2989_p7 = scmp.lt.s32.totalorder %s4962_s8, %s2987_s29  ;;  %p2990_p8 = scmp.lt.s32.totalorder %s2988_s26, %s2982_s20 }
 0x43b   : > { %p2985_p5 = pneg %p2984_p13 }
 0x43c   : > { %p2991_p11 = por %p2990_p8, %p2989_p7 }
 0x43e   : > { %p2992_p12 = pnand %p2991_p11, %p2985_p5 }
 0x440   : > { %2995 = shalt.err (!%p2992_p12)
}
 0x441   : > { %s2996_s10 = scalar_lea.hbm %s4960_s0, 32  ;;  %s3000_s11 = scalar_lea.hbm %s5029_s3, 64 }
 0x442   : > { %p2997_p3 = scmp.ne.s32.totalorder %s4960_s0, %s2996_s10  ;;  %p3001_p9 = scmp.lt.u32.totalorder %s4960_s0, %s5029_s3 }
 0x443   : > { %p3002_p1 = scmp.lt.u32.totalorder %s3000_s11, %s2996_s10  ;;  %p3004_p10 = scmp.lt.u32.totalorder %s2996_s10, %s4960_s0 }
 0x444   : > { %p2998_p4 = pnand %p2997_p3, %p5084_p0 }
 0x445   : > { %p3003_p2 = por %p3002_p1, %p3001_p9 }
 0x446   : > { %p2999_p6 = pneg %p2998_p4 }
 0x447   : > { %p3005_p13 = por %p3004_p10, %p3003_p2 }
 0x449   : > { %p3006_p5 = pnand %p3005_p13, %p2999_p6 }
 0x44b   : > { %3009 = shalt.err (!%p3006_p5)
}
 0x44c   : > { %2836 = dma.vmem_to_hbm [thread:$0]  (%p5084_p0), %s4962_s8, 32, %s4960_s0, %s2583_s9  }
 0x44d PF: > { %s2623_s16 = sand.u32 1, %s3042_s22   ;;  %p5085_p7 = scmp.ne.s32.totalorder %s5055_s7, 0 }
 0x44e   : > { %p5086_p8 = scmp.ge.s32.totalorder %s3054_s25, 2  ;;  %s2624_s19 = scalar_lea.sflag [#allocation6], %s2623_s16 }
 0x450   : > { %p2844_p11 = pnand %p5086_p8, %p5085_p7 }
 0x452   : > { %3033 = dma.done.wait (!%p2844_p11), %s2624_s19, 128  }
 0x453   : > { %3035 = vsyncadd (!%p2844_p11), %s2624_s19, 4294967168  ;;  %s2633_s21 = scalar_lea.sflag [#allocation9], %s2623_s16 }
 0x454   : > { %3037 = dma.done.wait (!%p2844_p11), %s2633_s21, 32  }
 0x455   : > { %3039 = vsyncadd (!%p2844_p11), %s2633_s21, 4294967264  ;;  %p24_p0 = scmp.ge.s32.totalorder %s3136_s27, 4   ;;  %s5087_s22 = smov %s3046_s23 }
 0x456   : > { %s5088_s23 = smov %s3050_s24  ;;  %s5089_s24 = smov %s3148_s30 }
 0x457   : > { %s5090_s25 = smov %s3136_s27  ;;  %26 = sbr.rel (!%p24_p0) target bundleno = 19 (0x13), region = 86 }
 0x45e   :  { %2638 = vsyncpa [#allocation5], 1 }
 0x45f   :  { %2640 = vsyncpa [#allocation5 + $0x1], 1 }
 0x460   :  { %2641 = vsyncpa [#allocation6], 1 }
 0x461   :  { %2643 = vsyncpa [#allocation6 + $0x1], 1 }
 0x462   :  { %2644 = vsyncpa [#allocation9], 1 }
 0x463   :  { %2646 = vsyncpa [#allocation9 + $0x1], 1 }

</bundles_post_ra>
